<compile_context>
chip_gen: v6e
topology: v6e:2x2x1
jax: 0.10.0
libtpu: 0.0.40
codegen_flags: <defaults>
</compile_context>

<pallas_src>
import math

import jax
import jax.numpy as jnp
import numpy as np
from jax.experimental import pallas as pl
from jax.experimental.pallas import tpu as pltpu

# ---------------- small CLIP-like config ----------------
B = 2                      # batch of images
C = 3                      # image channels
IMG = 16                   # image H == W
PATCH = 4                  # patch size (== conv kernel == stride)
N_PATCH = (IMG // PATCH) ** 2          # 16 patches
PATCH_DIM = C * PATCH * PATCH          # 48
D = 64                                 # transformer width (both towers)
HEADS = 4
HEAD_DIM = D // HEADS                  # 16
MLP = 2 * D                            # 128
S_IMG = N_PATCH + 1                    # CLS + patches = 17
K_CLASSES = 4                          # len(class_name_list)
L_TXT = 8                              # text context length
VOCAB = 32
E = 32                                 # joint embedding dim
LN_EPS = 1e-5
NEG_INF = -1e30

S_IMG_ALL = B * S_IMG                  # 34 : fused image sequence
S_TXT_ALL = K_CLASSES * L_TXT          # 32 : fused text sequence

# MXU input dtype.  bf16 would halve weight vreg/vld traffic (MXU-native everywhere) but
# the MXU is nowhere near the bottleneck at these shapes, so keep f32 + tight reference check.
MATMUL_DTYPE = jnp.float32

# static tower index baked into ref indices (0 = image tower, 1 = text tower)
IMG_T, TXT_T = 0, 1
# rows of the packed per-tower small-vector slab [VEC_ROWS, MLP]
R_LN1G, R_LN1B, R_LN2G, R_LN2B, R_LNFG, R_LNFB, R_BO, R_B2, R_B1 = range(9)
VEC_ROWS = 16


# ---------------- shared pure-jnp math (usable inside Pallas kernels) ----------------
def _mm(a, b):
    """A @ B with configurable MXU input dtype and f32 accumulation."""
    return jnp.dot(a.astype(MATMUL_DTYPE), b.astype(MATMUL_DTYPE),
                   preferred_element_type=jnp.float32)


def _mm_nt(a, b):
    """A @ B.T (contract last dims of both) with f32 accumulation."""
    return jax.lax.dot_general(a.astype(MATMUL_DTYPE), b.astype(MATMUL_DTYPE),
                               (((1,), (1,)), ((), ())),
                               preferred_element_type=jnp.float32)


def _layernorm(x, g, b):
    mu = jnp.mean(x, axis=-1, keepdims=True)
    var = jnp.mean(jnp.square(x - mu), axis=-1, keepdims=True)
    return (x - mu) * jax.lax.rsqrt(var + LN_EPS) * g + b


# ---------------- in-kernel tower pieces ----------------
def _vrow(vec_ref, t, row, width):
    """One packed (1, width) parameter row (static sublane/lane offsets)."""
    return vec_ref[t, row:row + 1, :width]


def _tower_block(x, t, bias, attn_w_ref, qkv_b_ref, w1_ref, w2_ref, vec_ref):
    """Pre-LN transformer block on a fused [S, D] tile.  `t` is a static tower index,
    `bias` is the precomputed additive attention-bias slab ([S, S], 0 / -1e30)."""
    h = _layernorm(x, _vrow(vec_ref, t, R_LN1G, D), _vrow(vec_ref, t, R_LN1B, D))
    inv_sqrt = 1.0 / math.sqrt(HEAD_DIM)
    attn = None
    for hh in range(HEADS):                                    # unrolled (4 heads)
        # attn_w layout: [(t*4 + {0:q,1:k,2:v,3:o}) * HEADS + head] -> [HEAD_DIM, D]
        q = _mm_nt(h, attn_w_ref[(t * 4 + 0) * HEADS + hh]) + qkv_b_ref[(t * 3 + 0) * HEADS + hh]
        k = _mm_nt(h, attn_w_ref[(t * 4 + 1) * HEADS + hh]) + qkv_b_ref[(t * 3 + 1) * HEADS + hh]
        v = _mm_nt(h, attn_w_ref[(t * 4 + 2) * HEADS + hh]) + qkv_b_ref[(t * 3 + 2) * HEADS + hh]
        s = _mm_nt(q, k) * inv_sqrt + bias                      # [S, S]
        s = s - jnp.max(s, axis=-1, keepdims=True)
        p = jnp.exp(s)
        p = p * pl.reciprocal(jnp.sum(p, axis=-1, keepdims=True), approx=True)
        contrib = _mm(_mm(p, v), attn_w_ref[(t * 4 + 3) * HEADS + hh])   # [S, D]
        attn = contrib if attn is None else attn + contrib
    x = x + attn + _vrow(vec_ref, t, R_BO, D)
    h = _layernorm(x, _vrow(vec_ref, t, R_LN2G, D), _vrow(vec_ref, t, R_LN2B, D))
    m = jax.nn.gelu(_mm(h, w1_ref[t]) + _vrow(vec_ref, t, R_B1, MLP), approximate=True)
    return x + _mm(m, w2_ref[t]) + _vrow(vec_ref, t, R_B2, D)


def _tower_head(pooled, t, proj_ref, vec_ref):
    """Final LN -> projection -> L2 normalize."""
    e = _mm(_layernorm(pooled, _vrow(vec_ref, t, R_LNFG, D), _vrow(vec_ref, t, R_LNFB, D)),
            proj_ref[t])
    return e * jax.lax.rsqrt(jnp.sum(e * e, axis=-1, keepdims=True))


# ---------------- single fused Pallas kernel ----------------
def _clip_kernel(scale_ref, patches_ref, tokemb_ref, add_img_ref,
                 bias_img_ref, bias_txt_ref, sel_img_ref, sel_txt_ref,
                 w_patch_ref, attn_w_ref, qkv_b_ref, w1_ref, w2_ref,
                 proj_ref, vec_ref, out_ref):
    # ---- image tower: all B images fused along the sequence axis ([B*S_IMG, D]) ----
    # add_img already contains tiled pos emb + (CLS token | patch-embed bias) per row,
    # so patch embed is a single matmul + add (CLS rows of patches_ref are zeros).
    x = _mm(patches_ref[...], w_patch_ref[...]) + add_img_ref[...]
    x = _tower_block(x, IMG_T, bias_img_ref[...], attn_w_ref, qkv_b_ref,
                     w1_ref, w2_ref, vec_ref)
    cls_tok = jnp.dot(sel_img_ref[...], x, preferred_element_type=jnp.float32)   # [B, D]
    img_emb = _tower_head(cls_tok, IMG_T, proj_ref, vec_ref)                     # [B, E]

    # ---- text tower: all K prompts fused along the sequence axis ([K*L, D]) ----
    # tokemb already has the per-prompt positional embedding folded in host-side.
    xt = tokemb_ref[...]
    xt = _tower_block(xt, TXT_T, bias_txt_ref[...], attn_w_ref, qkv_b_ref,
                      w1_ref, w2_ref, vec_ref)
    # TODO(synk): open_clip pools the text feature at argmax(token_id) (EOT); the
    # synthetic prompts are fixed-length so sel_txt pools the last position of each prompt.
    last = jnp.dot(sel_txt_ref[...], xt, preferred_element_type=jnp.float32)     # [K, D]
    txt_emb = _tower_head(last, TXT_T, proj_ref, vec_ref)                        # [K, E]

    # ---- logits = exp(logit_scale) * image_emb @ text_emb.T ----
    sim = _mm_nt(img_emb, txt_emb)                                               # [B, K]
    out_ref[...] = scale_ref[0, 0] * sim


# ---------------- wrapper (one pallas_call, everything VMEM-resident) ----------------
def clip_forward(images, class_tokens, pk):
    patches = _pad_cls_slot(_patchify(images))                        # [B*S_IMG, PATCH_DIM]
    tok = pk["tok_table"][class_tokens].reshape(S_TXT_ALL, D) + pk["pos_txt_all"]
    return pl.pallas_call(
        _clip_kernel,
        out_shape=jax.ShapeDtypeStruct((B, K_CLASSES), jnp.float32),
        in_specs=[pl.BlockSpec(memory_space=pltpu.MemorySpace.SMEM)]          # scale
                 + [pl.BlockSpec(memory_space=pltpu.MemorySpace.VMEM)] * 14,  # slabs
        out_specs=pl.BlockSpec(memory_space=pltpu.MemorySpace.VMEM),
        compiler_params=pltpu.CompilerParams(vmem_limit_bytes=32 * 1024 * 1024),
    )(pk["scale"], patches, tok, pk["add_img"], pk["bias_img"], pk["bias_txt"],
      pk["sel_img"], pk["sel_txt"], pk["w_patch"], pk["attn_w"], pk["qkv_b"],
      pk["w1"], pk["w2"], pk["proj"], pk["vec"])


# ---------------- pure-JAX glue (data layout only) ----------------
def _patchify(images):
    # NCHW -> [B, N_patches, C*P*P]; per-patch feature order (c, ph, pw) matches a
    # flattened Conv2d weight of shape [D, C, P, P].
    x = images.reshape(B, C, IMG // PATCH, PATCH, IMG // PATCH, PATCH)
    x = x.transpose(0, 2, 4, 1, 3, 5)
    return x.reshape(B, N_PATCH, PATCH_DIM)


def _pad_cls_slot(patches):
    # prepend a zero row per image (the CLS slot; the learned CLS token + pos come in
    # through add_img inside the kernel) and flatten to the fused [B*S_IMG, PATCH_DIM].
    z = jnp.zeros((B, 1, PATCH_DIM), jnp.float32)
    return jnp.concatenate([z, patches], axis=1).reshape(S_IMG_ALL, PATCH_DIM)


# ---------------- host-side parameter packing (done once) ----------------
def pack_params(img_p, txt_p, logit_scale):
    def attn_slab(p):
        wqkv, wo = np.asarray(p["wqkv"]), np.asarray(p["wo"])
        wq, wk, wv = wqkv[:, :D], wqkv[:, D:2 * D], wqkv[:, 2 * D:]
        # q/k/v stored transposed per head ([HEAD_DIM, D], lane-dense), wo per head natural.
        return np.concatenate([wq.T.reshape(HEADS, HEAD_DIM, D),
                               wk.T.reshape(HEADS, HEAD_DIM, D),
                               wv.T.reshape(HEADS, HEAD_DIM, D),
                               wo.reshape(HEADS, HEAD_DIM, D)], axis=0)   # [4*HEADS, HD, D]

    def qkv_bias_slab(p):
        return np.asarray(p["bqkv"]).reshape(3 * HEADS, 1, HEAD_DIM)      # q heads, k heads, v heads

    def vec_slab(p):
        v = np.zeros((VEC_ROWS, MLP), np.float32)
        for row, key in ((R_LN1G, "ln1g"), (R_LN1B, "ln1b"), (R_LN2G, "ln2g"),
                         (R_LN2B, "ln2b"), (R_LNFG, "lnfg"), (R_LNFB, "lnfb"),
                         (R_BO, "bo"), (R_B2, "b2"), (R_B1, "b1")):
            val = np.asarray(p[key])[0]
            v[row, :val.shape[0]] = val
        return v

    # fused additive slab: tiled pos emb + (CLS token on CLS rows | patch bias elsewhere)
    within = np.arange(S_IMG_ALL) % S_IMG
    is_cls = (within == 0)[:, None]
    add_img = (np.asarray(img_p["pos"])[within]
               + np.where(is_cls, np.asarray(img_p["cls"]), np.asarray(img_p["b_patch"])))

    # additive attention-bias slabs: 0 within an image / causal within a prompt, -1e30 elsewhere
    blk_i = np.arange(S_IMG_ALL) // S_IMG
    bias_img = np.where(blk_i[:, None] == blk_i[None, :], 0.0, NEG_INF).astype(np.float32)
    r_t = np.arange(S_TXT_ALL)
    blk_t = r_t // L_TXT
    bias_txt = np.where((blk_t[:, None] == blk_t[None, :]) & (r_t[:, None] >= r_t[None, :]),
                        0.0, NEG_INF).astype(np.float32)

    # one-hot pooling matrices: CLS row per image, last token per prompt
    sel_img = np.zeros((B, S_IMG_ALL), np.float32)
    sel_img[np.arange(B), np.arange(B) * S_IMG] = 1.0
    sel_txt = np.zeros((K_CLASSES, S_TXT_ALL), np.float32)
    sel_txt[np.arange(K_CLASSES), np.arange(K_CLASSES) * L_TXT + L_TXT - 1] = 1.0

    return dict(
        scale=jnp.exp(logit_scale).astype(jnp.float32),              # exp() folded host-side
        add_img=jnp.asarray(add_img, jnp.float32),
        bias_img=jnp.asarray(bias_img), bias_txt=jnp.asarray(bias_txt),
        sel_img=jnp.asarray(sel_img), sel_txt=jnp.asarray(sel_txt),
        w_patch=img_p["w_patch"],
        attn_w=jnp.asarray(np.concatenate([attn_slab(img_p), attn_slab(txt_p)], 0)),
        qkv_b=jnp.asarray(np.concatenate([qkv_bias_slab(img_p), qkv_bias_slab(txt_p)], 0)),
        w1=jnp.stack([img_p["w1"], txt_p["w1"]]),
        w2=jnp.stack([img_p["w2"], txt_p["w2"]]),
        proj=jnp.stack([img_p["proj"], txt_p["proj"]]),
        vec=jnp.asarray(np.stack([vec_slab(img_p), vec_slab(txt_p)])),
        tok_table=txt_p["tok_emb_table"],
        pos_txt_all=jnp.tile(txt_p["pos"], (K_CLASSES, 1)),
    )


# ---------------- deterministic synthetic parameters ----------------
def init_params(key):
    keys = iter(jax.random.split(key, 32))

    def w(shape, scale=0.02):
        return (scale * jax.random.normal(next(keys), shape)).astype(jnp.float32)

    def tower():
        return dict(
            ln1g=jnp.ones((1, D), jnp.float32), ln1b=jnp.zeros((1, D), jnp.float32),
            wqkv=w((D, 3 * D)), bqkv=jnp.zeros((1, 3 * D), jnp.float32),
            wo=w((D, D)), bo=jnp.zeros((1, D), jnp.float32),
            ln2g=jnp.ones((1, D), jnp.float32), ln2b=jnp.zeros((1, D), jnp.float32),
            w1=w((D, MLP)), b1=jnp.zeros((1, MLP), jnp.float32),
            w2=w((MLP, D)), b2=jnp.zeros((1, D), jnp.float32),
            lnfg=jnp.ones((1, D), jnp.float32), lnfb=jnp.zeros((1, D), jnp.float32),
            proj=w((D, E)),
        )

    img = tower()
    img.update(w_patch=w((PATCH_DIM, D)), b_patch=jnp.zeros((1, D), jnp.float32),
               cls=w((1, D)), pos=w((S_IMG, D)))
    txt = tower()
    txt.update(tok_emb_table=w((VOCAB, D)), pos=w((L_TXT, D)))
    logit_scale = jnp.full((1, 1), math.log(1.0 / 0.07), jnp.float32)
    return img, txt, logit_scale


# ---------------- pure-JAX reference (for correctness check) ----------------
def _l2n(x):
    return x / jnp.linalg.norm(x, axis=-1, keepdims=True)


def _block_ref(x, p, causal):
    S = x.shape[0]
    h = _layernorm(x, p["ln1g"], p["ln1b"])
    qkv = h @ p["wqkv"] + p["bqkv"]
    q, k, v = qkv[:, :D], qkv[:, D:2 * D], qkv[:, 2 * D:]
    scale = 1.0 / math.sqrt(HEAD_DIM)
    outs = []
    for hh in range(HEADS):
        sl = slice(hh * HEAD_DIM, (hh + 1) * HEAD_DIM)
        s = (q[:, sl] @ k[:, sl].T) * scale
        if causal:
            s = jnp.where(jnp.tril(jnp.ones((S, S), bool)), s, NEG_INF)
        s = s - jnp.max(s, -1, keepdims=True)
        pp = jnp.exp(s)
        pp = pp / jnp.sum(pp, -1, keepdims=True)
        outs.append(pp @ v[:, sl])
    x = x + jnp.concatenate(outs, -1) @ p["wo"] + p["bo"]
    h = _layernorm(x, p["ln2g"], p["ln2b"])
    return x + jax.nn.gelu(h @ p["w1"] + p["b1"], approximate=True) @ p["w2"] + p["b2"]


def reference_forward(images, class_tokens, img_p, txt_p, logit_scale):
    patches = _patchify(images)
    img_embs = []
    for b in range(B):
        pe = patches[b] @ img_p["w_patch"] + img_p["b_patch"]
        x = jnp.concatenate([img_p["cls"], pe], 0) + img_p["pos"]
        x = _block_ref(x, img_p, causal=False)
        c = _layernorm(x[0:1], img_p["lnfg"], img_p["lnfb"])
        img_embs.append(_l2n(c @ img_p["proj"]))
    img_emb = jnp.concatenate(img_embs, 0)

    tok = txt_p["tok_emb_table"][class_tokens]                               # [K, L, D]
    txt_embs = []
    for kk in range(K_CLASSES):
        x = tok[kk] + txt_p["pos"]
        x = _block_ref(x, txt_p, causal=True)
        last = _layernorm(x[L_TXT - 1:L_TXT], txt_p["lnfg"], txt_p["lnfb"])
        txt_embs.append(_l2n(last @ txt_p["proj"]))
    txt_emb = jnp.concatenate(txt_embs, 0)
    return jnp.exp(logit_scale[0, 0]) * img_emb @ txt_emb.T


# ---------------- main ----------------
if __name__ == "__main__":
    key = jax.random.PRNGKey(0)
    k_img, k_tok, k_param = jax.random.split(key, 3)

    images = jax.random.normal(k_img, (B, C, IMG, IMG), jnp.float32)         # NCHW, like PyTorch
    class_tokens = jax.random.randint(k_tok, (K_CLASSES, L_TXT), 0, VOCAB)   # synthetic tokenizer output
    img_p, txt_p, logit_scale = init_params(k_param)

    packed = pack_params(img_p, txt_p, logit_scale)                          # one-time host packing
    logits = clip_forward(images, class_tokens, packed)                      # [B, K]
    logits = jax.block_until_ready(logits)

    ref = reference_forward(images, class_tokens, img_p, txt_p, logit_scale)
    assert logits.shape == (B, K_CLASSES)
    assert np.allclose(np.asarray(logits), np.asarray(ref), atol=5e-3, rtol=5e-3)
    print("KERNEL_OK")
</pallas_src>

<mosaic_0001>
module attributes {stable_mosaic.version = 11 : i64} {
  func.func @_clip_kernel(%arg0: memref<1x1xf32, #tpu.memory_space<smem>>, %arg1: memref<34x48xf32, #tpu.memory_space<vmem>>, %arg2: memref<32x64xf32, #tpu.memory_space<vmem>>, %arg3: memref<34x64xf32, #tpu.memory_space<vmem>>, %arg4: memref<34x34xf32, #tpu.memory_space<vmem>>, %arg5: memref<32x32xf32, #tpu.memory_space<vmem>>, %arg6: memref<2x34xf32, #tpu.memory_space<vmem>>, %arg7: memref<4x32xf32, #tpu.memory_space<vmem>>, %arg8: memref<48x64xf32, #tpu.memory_space<vmem>>, %arg9: memref<32x16x64xf32, #tpu.memory_space<vmem>>, %arg10: memref<24x1x16xf32, #tpu.memory_space<vmem>>, %arg11: memref<2x64x128xf32, #tpu.memory_space<vmem>>, %arg12: memref<2x128x64xf32, #tpu.memory_space<vmem>>, %arg13: memref<2x64x32xf32, #tpu.memory_space<vmem>>, %arg14: memref<2x16x128xf32, #tpu.memory_space<vmem>>, %arg15: memref<2x4xf32, #tpu.memory_space<vmem>>) attributes {dimension_semantics = [], scalar_prefetch = 0 : i64, scratch_operands = 0 : i64, tpu.core_type = #tpu.core_type<tc>} {
    %c0 = arith.constant 0 : index
    %c0_0 = arith.constant 0 : index
    %0 = vector.load %arg1[%c0, %c0_0] : memref<34x48xf32, #tpu.memory_space<vmem>>, vector<34x48xf32>
    %c0_1 = arith.constant 0 : index
    %c0_2 = arith.constant 0 : index
    %1 = vector.load %arg8[%c0_1, %c0_2] : memref<48x64xf32, #tpu.memory_space<vmem>>, vector<48x64xf32>
    %cst = arith.constant dense<0.000000e+00> : vector<34x64xf32>
    %2 = tpu.matmul %0, %1, %cst {dimension_numbers = #tpu.dot_dimension_numbers<[1], [0], [0], [1], [0, 0, 1, 1], [], []>} : vector<34x48xf32>, vector<48x64xf32>, vector<34x64xf32> -> vector<34x64xf32>
    %c0_3 = arith.constant 0 : index
    %c0_4 = arith.constant 0 : index
    %3 = vector.load %arg3[%c0_3, %c0_4] : memref<34x64xf32, #tpu.memory_space<vmem>>, vector<34x64xf32>
    %4 = arith.addf %2, %3 : vector<34x64xf32>
    %c0_5 = arith.constant 0 : index
    %c0_6 = arith.constant 0 : index
    %5 = vector.load %arg4[%c0_5, %c0_6] : memref<34x34xf32, #tpu.memory_space<vmem>>, vector<34x34xf32>
    %c0_7 = arith.constant 0 : index
    %c0_8 = arith.constant 0 : index
    %c0_9 = arith.constant 0 : index
    %6 = vector.load %arg14[%c0_7, %c0_8, %c0_9] : memref<2x16x128xf32, #tpu.memory_space<vmem>>, vector<1x1x64xf32>
    %7 = vector.shape_cast %6 : vector<1x1x64xf32> to vector<1x64xf32>
    %c0_10 = arith.constant 0 : index
    %c1 = arith.constant 1 : index
    %c0_11 = arith.constant 0 : index
    %8 = vector.load %arg14[%c0_10, %c1, %c0_11] : memref<2x16x128xf32, #tpu.memory_space<vmem>>, vector<1x1x64xf32>
    %9 = vector.shape_cast %8 : vector<1x1x64xf32> to vector<1x64xf32>
    %cst_12 = arith.constant dense<0.000000e+00> : vector<34xf32>
    %10 = vector.multi_reduction <add>, %4, %cst_12 [1] : vector<34x64xf32> to vector<34xf32>
    %11 = vector.shape_cast %10 : vector<34xf32> to vector<34x1xf32>
    %cst_13 = arith.constant 6.400000e+01 : f32
    %12 = vector.broadcast %cst_13 : f32 to vector<34x1xf32>
    %13 = arith.divf %11, %12 : vector<34x1xf32>
    %14 = vector.broadcast %13 : vector<34x1xf32> to vector<34x64xf32>
    %15 = arith.subf %4, %14 : vector<34x64xf32>
    %16 = arith.mulf %15, %15 : vector<34x64xf32>
    %cst_14 = arith.constant dense<0.000000e+00> : vector<34xf32>
    %17 = vector.multi_reduction <add>, %16, %cst_14 [1] : vector<34x64xf32> to vector<34xf32>
    %18 = vector.shape_cast %17 : vector<34xf32> to vector<34x1xf32>
    %cst_15 = arith.constant 6.400000e+01 : f32
    %19 = vector.broadcast %cst_15 : f32 to vector<34x1xf32>
    %20 = arith.divf %18, %19 : vector<34x1xf32>
    %21 = vector.broadcast %13 : vector<34x1xf32> to vector<34x64xf32>
    %22 = arith.subf %4, %21 : vector<34x64xf32>
    %cst_16 = arith.constant 9.99999974E-6 : f32
    %23 = vector.broadcast %cst_16 : f32 to vector<34x1xf32>
    %24 = arith.addf %20, %23 : vector<34x1xf32>
    %25 = math.rsqrt %24 : vector<34x1xf32>
    %26 = vector.broadcast %25 : vector<34x1xf32> to vector<34x64xf32>
    %27 = arith.mulf %22, %26 : vector<34x64xf32>
    %28 = vector.broadcast %7 : vector<1x64xf32> to vector<34x64xf32>
    %29 = arith.mulf %27, %28 : vector<34x64xf32>
    %30 = vector.broadcast %9 : vector<1x64xf32> to vector<34x64xf32>
    %31 = arith.addf %29, %30 : vector<34x64xf32>
    %c0_17 = arith.constant 0 : index
    %c0_18 = arith.constant 0 : index
    %c0_19 = arith.constant 0 : index
    %32 = vector.load %arg9[%c0_17, %c0_18, %c0_19] : memref<32x16x64xf32, #tpu.memory_space<vmem>>, vector<1x16x64xf32>
    %33 = vector.shape_cast %32 : vector<1x16x64xf32> to vector<16x64xf32>
    %cst_20 = arith.constant dense<0.000000e+00> : vector<34x16xf32>
    %34 = tpu.matmul %31, %33, %cst_20 {dimension_numbers = #tpu.dot_dimension_numbers<[1], [1], [0], [0], [0, 0, 1, 0], [], []>} : vector<34x64xf32>, vector<16x64xf32>, vector<34x16xf32> -> vector<34x16xf32>
    %c0_21 = arith.constant 0 : index
    %c0_22 = arith.constant 0 : index
    %c0_23 = arith.constant 0 : index
    %35 = vector.load %arg10[%c0_21, %c0_22, %c0_23] : memref<24x1x16xf32, #tpu.memory_space<vmem>>, vector<1x1x16xf32>
    %36 = vector.shape_cast %35 : vector<1x1x16xf32> to vector<1x16xf32>
    %37 = vector.broadcast %36 : vector<1x16xf32> to vector<34x16xf32>
    %38 = arith.addf %34, %37 : vector<34x16xf32>
    %c4 = arith.constant 4 : index
    %c0_24 = arith.constant 0 : index
    %c0_25 = arith.constant 0 : index
    %39 = vector.load %arg9[%c4, %c0_24, %c0_25] : memref<32x16x64xf32, #tpu.memory_space<vmem>>, vector<1x16x64xf32>
    %40 = vector.shape_cast %39 : vector<1x16x64xf32> to vector<16x64xf32>
    %cst_26 = arith.constant dense<0.000000e+00> : vector<34x16xf32>
    %41 = tpu.matmul %31, %40, %cst_26 {dimension_numbers = #tpu.dot_dimension_numbers<[1], [1], [0], [0], [0, 0, 1, 0], [], []>} : vector<34x64xf32>, vector<16x64xf32>, vector<34x16xf32> -> vector<34x16xf32>
    %c4_27 = arith.constant 4 : index
    %c0_28 = arith.constant 0 : index
    %c0_29 = arith.constant 0 : index
    %42 = vector.load %arg10[%c4_27, %c0_28, %c0_29] : memref<24x1x16xf32, #tpu.memory_space<vmem>>, vector<1x1x16xf32>
    %43 = vector.shape_cast %42 : vector<1x1x16xf32> to vector<1x16xf32>
    %44 = vector.broadcast %43 : vector<1x16xf32> to vector<34x16xf32>
    %45 = arith.addf %41, %44 : vector<34x16xf32>
    %c8 = arith.constant 8 : index
    %c0_30 = arith.constant 0 : index
    %c0_31 = arith.constant 0 : index
    %46 = vector.load %arg9[%c8, %c0_30, %c0_31] : memref<32x16x64xf32, #tpu.memory_space<vmem>>, vector<1x16x64xf32>
    %47 = vector.shape_cast %46 : vector<1x16x64xf32> to vector<16x64xf32>
    %cst_32 = arith.constant dense<0.000000e+00> : vector<34x16xf32>
    %48 = tpu.matmul %31, %47, %cst_32 {dimension_numbers = #tpu.dot_dimension_numbers<[1], [1], [0], [0], [0, 0, 1, 0], [], []>} : vector<34x64xf32>, vector<16x64xf32>, vector<34x16xf32> -> vector<34x16xf32>
    %c8_33 = arith.constant 8 : index
    %c0_34 = arith.constant 0 : index
    %c0_35 = arith.constant 0 : index
    %49 = vector.load %arg10[%c8_33, %c0_34, %c0_35] : memref<24x1x16xf32, #tpu.memory_space<vmem>>, vector<1x1x16xf32>
    %50 = vector.shape_cast %49 : vector<1x1x16xf32> to vector<1x16xf32>
    %51 = vector.broadcast %50 : vector<1x16xf32> to vector<34x16xf32>
    %52 = arith.addf %48, %51 : vector<34x16xf32>
    %cst_36 = arith.constant dense<0.000000e+00> : vector<34x34xf32>
    %53 = tpu.matmul %38, %45, %cst_36 {dimension_numbers = #tpu.dot_dimension_numbers<[1], [1], [0], [0], [0, 0, 1, 0], [], []>} : vector<34x16xf32>, vector<34x16xf32>, vector<34x34xf32> -> vector<34x34xf32>
    %cst_37 = arith.constant 2.500000e-01 : f32
    %54 = vector.broadcast %cst_37 : f32 to vector<34x34xf32>
    %55 = arith.mulf %53, %54 : vector<34x34xf32>
    %56 = arith.addf %55, %5 : vector<34x34xf32>
    %cst_38 = arith.constant dense<0xFF800000> : vector<34xf32>
    %57 = vector.multi_reduction <maximumf>, %56, %cst_38 [1] : vector<34x34xf32> to vector<34xf32>
    %58 = vector.shape_cast %57 : vector<34xf32> to vector<34x1xf32>
    %59 = vector.broadcast %58 : vector<34x1xf32> to vector<34x34xf32>
    %60 = arith.subf %56, %59 : vector<34x34xf32>
    %61 = math.exp %60 : vector<34x34xf32>
    %cst_39 = arith.constant dense<0.000000e+00> : vector<34xf32>
    %62 = vector.multi_reduction <add>, %61, %cst_39 [1] : vector<34x34xf32> to vector<34xf32>
    %63 = vector.shape_cast %62 : vector<34xf32> to vector<34x1xf32>
    %64 = tpu.reciprocal %63 {approx = true} : vector<34x1xf32> -> vector<34x1xf32>
    %65 = vector.broadcast %64 : vector<34x1xf32> to vector<34x34xf32>
    %66 = arith.mulf %61, %65 : vector<34x34xf32>
    %cst_40 = arith.constant dense<0.000000e+00> : vector<34x16xf32>
    %67 = tpu.matmul %66, %52, %cst_40 {dimension_numbers = #tpu.dot_dimension_numbers<[1], [0], [0], [1], [0, 0, 1, 1], [], []>} : vector<34x34xf32>, vector<34x16xf32>, vector<34x16xf32> -> vector<34x16xf32>
    %c12 = arith.constant 12 : index
    %c0_41 = arith.constant 0 : index
    %c0_42 = arith.constant 0 : index
    %68 = vector.load %arg9[%c12, %c0_41, %c0_42] : memref<32x16x64xf32, #tpu.memory_space<vmem>>, vector<1x16x64xf32>
    %69 = vector.shape_cast %68 : vector<1x16x64xf32> to vector<16x64xf32>
    %cst_43 = arith.constant dense<0.000000e+00> : vector<34x64xf32>
    %70 = tpu.matmul %67, %69, %cst_43 {dimension_numbers = #tpu.dot_dimension_numbers<[1], [0], [0], [1], [0, 0, 1, 1], [], []>} : vector<34x16xf32>, vector<16x64xf32>, vector<34x64xf32> -> vector<34x64xf32>
    %c1_44 = arith.constant 1 : index
    %c0_45 = arith.constant 0 : index
    %c0_46 = arith.constant 0 : index
    %71 = vector.load %arg9[%c1_44, %c0_45, %c0_46] : memref<32x16x64xf32, #tpu.memory_space<vmem>>, vector<1x16x64xf32>
    %72 = vector.shape_cast %71 : vector<1x16x64xf32> to vector<16x64xf32>
    %cst_47 = arith.constant dense<0.000000e+00> : vector<34x16xf32>
    %73 = tpu.matmul %31, %72, %cst_47 {dimension_numbers = #tpu.dot_dimension_numbers<[1], [1], [0], [0], [0, 0, 1, 0], [], []>} : vector<34x64xf32>, vector<16x64xf32>, vector<34x16xf32> -> vector<34x16xf32>
    %c1_48 = arith.constant 1 : index
    %c0_49 = arith.constant 0 : index
    %c0_50 = arith.constant 0 : index
    %74 = vector.load %arg10[%c1_48, %c0_49, %c0_50] : memref<24x1x16xf32, #tpu.memory_space<vmem>>, vector<1x1x16xf32>
    %75 = vector.shape_cast %74 : vector<1x1x16xf32> to vector<1x16xf32>
    %76 = vector.broadcast %75 : vector<1x16xf32> to vector<34x16xf32>
    %77 = arith.addf %73, %76 : vector<34x16xf32>
    %c5 = arith.constant 5 : index
    %c0_51 = arith.constant 0 : index
    %c0_52 = arith.constant 0 : index
    %78 = vector.load %arg9[%c5, %c0_51, %c0_52] : memref<32x16x64xf32, #tpu.memory_space<vmem>>, vector<1x16x64xf32>
    %79 = vector.shape_cast %78 : vector<1x16x64xf32> to vector<16x64xf32>
    %cst_53 = arith.constant dense<0.000000e+00> : vector<34x16xf32>
    %80 = tpu.matmul %31, %79, %cst_53 {dimension_numbers = #tpu.dot_dimension_numbers<[1], [1], [0], [0], [0, 0, 1, 0], [], []>} : vector<34x64xf32>, vector<16x64xf32>, vector<34x16xf32> -> vector<34x16xf32>
    %c5_54 = arith.constant 5 : index
    %c0_55 = arith.constant 0 : index
    %c0_56 = arith.constant 0 : index
    %81 = vector.load %arg10[%c5_54, %c0_55, %c0_56] : memref<24x1x16xf32, #tpu.memory_space<vmem>>, vector<1x1x16xf32>
    %82 = vector.shape_cast %81 : vector<1x1x16xf32> to vector<1x16xf32>
    %83 = vector.broadcast %82 : vector<1x16xf32> to vector<34x16xf32>
    %84 = arith.addf %80, %83 : vector<34x16xf32>
    %c9 = arith.constant 9 : index
    %c0_57 = arith.constant 0 : index
    %c0_58 = arith.constant 0 : index
    %85 = vector.load %arg9[%c9, %c0_57, %c0_58] : memref<32x16x64xf32, #tpu.memory_space<vmem>>, vector<1x16x64xf32>
    %86 = vector.shape_cast %85 : vector<1x16x64xf32> to vector<16x64xf32>
    %cst_59 = arith.constant dense<0.000000e+00> : vector<34x16xf32>
    %87 = tpu.matmul %31, %86, %cst_59 {dimension_numbers = #tpu.dot_dimension_numbers<[1], [1], [0], [0], [0, 0, 1, 0], [], []>} : vector<34x64xf32>, vector<16x64xf32>, vector<34x16xf32> -> vector<34x16xf32>
    %c9_60 = arith.constant 9 : index
    %c0_61 = arith.constant 0 : index
    %c0_62 = arith.constant 0 : index
    %88 = vector.load %arg10[%c9_60, %c0_61, %c0_62] : memref<24x1x16xf32, #tpu.memory_space<vmem>>, vector<1x1x16xf32>
    %89 = vector.shape_cast %88 : vector<1x1x16xf32> to vector<1x16xf32>
    %90 = vector.broadcast %89 : vector<1x16xf32> to vector<34x16xf32>
    %91 = arith.addf %87, %90 : vector<34x16xf32>
    %cst_63 = arith.constant dense<0.000000e+00> : vector<34x34xf32>
    %92 = tpu.matmul %77, %84, %cst_63 {dimension_numbers = #tpu.dot_dimension_numbers<[1], [1], [0], [0], [0, 0, 1, 0], [], []>} : vector<34x16xf32>, vector<34x16xf32>, vector<34x34xf32> -> vector<34x34xf32>
    %cst_64 = arith.constant 2.500000e-01 : f32
    %93 = vector.broadcast %cst_64 : f32 to vector<34x34xf32>
    %94 = arith.mulf %92, %93 : vector<34x34xf32>
    %95 = arith.addf %94, %5 : vector<34x34xf32>
    %cst_65 = arith.constant dense<0xFF800000> : vector<34xf32>
    %96 = vector.multi_reduction <maximumf>, %95, %cst_65 [1] : vector<34x34xf32> to vector<34xf32>
    %97 = vector.shape_cast %96 : vector<34xf32> to vector<34x1xf32>
    %98 = vector.broadcast %97 : vector<34x1xf32> to vector<34x34xf32>
    %99 = arith.subf %95, %98 : vector<34x34xf32>
    %100 = math.exp %99 : vector<34x34xf32>
    %cst_66 = arith.constant dense<0.000000e+00> : vector<34xf32>
    %101 = vector.multi_reduction <add>, %100, %cst_66 [1] : vector<34x34xf32> to vector<34xf32>
    %102 = vector.shape_cast %101 : vector<34xf32> to vector<34x1xf32>
    %103 = tpu.reciprocal %102 {approx = true} : vector<34x1xf32> -> vector<34x1xf32>
    %104 = vector.broadcast %103 : vector<34x1xf32> to vector<34x34xf32>
    %105 = arith.mulf %100, %104 : vector<34x34xf32>
    %cst_67 = arith.constant dense<0.000000e+00> : vector<34x16xf32>
    %106 = tpu.matmul %105, %91, %cst_67 {dimension_numbers = #tpu.dot_dimension_numbers<[1], [0], [0], [1], [0, 0, 1, 1], [], []>} : vector<34x34xf32>, vector<34x16xf32>, vector<34x16xf32> -> vector<34x16xf32>
    %c13 = arith.constant 13 : index
    %c0_68 = arith.constant 0 : index
    %c0_69 = arith.constant 0 : index
    %107 = vector.load %arg9[%c13, %c0_68, %c0_69] : memref<32x16x64xf32, #tpu.memory_space<vmem>>, vector<1x16x64xf32>
    %108 = vector.shape_cast %107 : vector<1x16x64xf32> to vector<16x64xf32>
    %cst_70 = arith.constant dense<0.000000e+00> : vector<34x64xf32>
    %109 = tpu.matmul %106, %108, %cst_70 {dimension_numbers = #tpu.dot_dimension_numbers<[1], [0], [0], [1], [0, 0, 1, 1], [], []>} : vector<34x16xf32>, vector<16x64xf32>, vector<34x64xf32> -> vector<34x64xf32>
    %110 = arith.addf %70, %109 : vector<34x64xf32>
    %c2 = arith.constant 2 : index
    %c0_71 = arith.constant 0 : index
    %c0_72 = arith.constant 0 : index
    %111 = vector.load %arg9[%c2, %c0_71, %c0_72] : memref<32x16x64xf32, #tpu.memory_space<vmem>>, vector<1x16x64xf32>
    %112 = vector.shape_cast %111 : vector<1x16x64xf32> to vector<16x64xf32>
    %cst_73 = arith.constant dense<0.000000e+00> : vector<34x16xf32>
    %113 = tpu.matmul %31, %112, %cst_73 {dimension_numbers = #tpu.dot_dimension_numbers<[1], [1], [0], [0], [0, 0, 1, 0], [], []>} : vector<34x64xf32>, vector<16x64xf32>, vector<34x16xf32> -> vector<34x16xf32>
    %c2_74 = arith.constant 2 : index
    %c0_75 = arith.constant 0 : index
    %c0_76 = arith.constant 0 : index
    %114 = vector.load %arg10[%c2_74, %c0_75, %c0_76] : memref<24x1x16xf32, #tpu.memory_space<vmem>>, vector<1x1x16xf32>
    %115 = vector.shape_cast %114 : vector<1x1x16xf32> to vector<1x16xf32>
    %116 = vector.broadcast %115 : vector<1x16xf32> to vector<34x16xf32>
    %117 = arith.addf %113, %116 : vector<34x16xf32>
    %c6 = arith.constant 6 : index
    %c0_77 = arith.constant 0 : index
    %c0_78 = arith.constant 0 : index
    %118 = vector.load %arg9[%c6, %c0_77, %c0_78] : memref<32x16x64xf32, #tpu.memory_space<vmem>>, vector<1x16x64xf32>
    %119 = vector.shape_cast %118 : vector<1x16x64xf32> to vector<16x64xf32>
    %cst_79 = arith.constant dense<0.000000e+00> : vector<34x16xf32>
    %120 = tpu.matmul %31, %119, %cst_79 {dimension_numbers = #tpu.dot_dimension_numbers<[1], [1], [0], [0], [0, 0, 1, 0], [], []>} : vector<34x64xf32>, vector<16x64xf32>, vector<34x16xf32> -> vector<34x16xf32>
    %c6_80 = arith.constant 6 : index
    %c0_81 = arith.constant 0 : index
    %c0_82 = arith.constant 0 : index
    %121 = vector.load %arg10[%c6_80, %c0_81, %c0_82] : memref<24x1x16xf32, #tpu.memory_space<vmem>>, vector<1x1x16xf32>
    %122 = vector.shape_cast %121 : vector<1x1x16xf32> to vector<1x16xf32>
    %123 = vector.broadcast %122 : vector<1x16xf32> to vector<34x16xf32>
    %124 = arith.addf %120, %123 : vector<34x16xf32>
    %c10 = arith.constant 10 : index
    %c0_83 = arith.constant 0 : index
    %c0_84 = arith.constant 0 : index
    %125 = vector.load %arg9[%c10, %c0_83, %c0_84] : memref<32x16x64xf32, #tpu.memory_space<vmem>>, vector<1x16x64xf32>
    %126 = vector.shape_cast %125 : vector<1x16x64xf32> to vector<16x64xf32>
    %cst_85 = arith.constant dense<0.000000e+00> : vector<34x16xf32>
    %127 = tpu.matmul %31, %126, %cst_85 {dimension_numbers = #tpu.dot_dimension_numbers<[1], [1], [0], [0], [0, 0, 1, 0], [], []>} : vector<34x64xf32>, vector<16x64xf32>, vector<34x16xf32> -> vector<34x16xf32>
    %c10_86 = arith.constant 10 : index
    %c0_87 = arith.constant 0 : index
    %c0_88 = arith.constant 0 : index
    %128 = vector.load %arg10[%c10_86, %c0_87, %c0_88] : memref<24x1x16xf32, #tpu.memory_space<vmem>>, vector<1x1x16xf32>
    %129 = vector.shape_cast %128 : vector<1x1x16xf32> to vector<1x16xf32>
    %130 = vector.broadcast %129 : vector<1x16xf32> to vector<34x16xf32>
    %131 = arith.addf %127, %130 : vector<34x16xf32>
    %cst_89 = arith.constant dense<0.000000e+00> : vector<34x34xf32>
    %132 = tpu.matmul %117, %124, %cst_89 {dimension_numbers = #tpu.dot_dimension_numbers<[1], [1], [0], [0], [0, 0, 1, 0], [], []>} : vector<34x16xf32>, vector<34x16xf32>, vector<34x34xf32> -> vector<34x34xf32>
    %cst_90 = arith.constant 2.500000e-01 : f32
    %133 = vector.broadcast %cst_90 : f32 to vector<34x34xf32>
    %134 = arith.mulf %132, %133 : vector<34x34xf32>
    %135 = arith.addf %134, %5 : vector<34x34xf32>
    %cst_91 = arith.constant dense<0xFF800000> : vector<34xf32>
    %136 = vector.multi_reduction <maximumf>, %135, %cst_91 [1] : vector<34x34xf32> to vector<34xf32>
    %137 = vector.shape_cast %136 : vector<34xf32> to vector<34x1xf32>
    %138 = vector.broadcast %137 : vector<34x1xf32> to vector<34x34xf32>
    %139 = arith.subf %135, %138 : vector<34x34xf32>
    %140 = math.exp %139 : vector<34x34xf32>
    %cst_92 = arith.constant dense<0.000000e+00> : vector<34xf32>
    %141 = vector.multi_reduction <add>, %140, %cst_92 [1] : vector<34x34xf32> to vector<34xf32>
    %142 = vector.shape_cast %141 : vector<34xf32> to vector<34x1xf32>
    %143 = tpu.reciprocal %142 {approx = true} : vector<34x1xf32> -> vector<34x1xf32>
    %144 = vector.broadcast %143 : vector<34x1xf32> to vector<34x34xf32>
    %145 = arith.mulf %140, %144 : vector<34x34xf32>
    %cst_93 = arith.constant dense<0.000000e+00> : vector<34x16xf32>
    %146 = tpu.matmul %145, %131, %cst_93 {dimension_numbers = #tpu.dot_dimension_numbers<[1], [0], [0], [1], [0, 0, 1, 1], [], []>} : vector<34x34xf32>, vector<34x16xf32>, vector<34x16xf32> -> vector<34x16xf32>
    %c14 = arith.constant 14 : index
    %c0_94 = arith.constant 0 : index
    %c0_95 = arith.constant 0 : index
    %147 = vector.load %arg9[%c14, %c0_94, %c0_95] : memref<32x16x64xf32, #tpu.memory_space<vmem>>, vector<1x16x64xf32>
    %148 = vector.shape_cast %147 : vector<1x16x64xf32> to vector<16x64xf32>
    %cst_96 = arith.constant dense<0.000000e+00> : vector<34x64xf32>
    %149 = tpu.matmul %146, %148, %cst_96 {dimension_numbers = #tpu.dot_dimension_numbers<[1], [0], [0], [1], [0, 0, 1, 1], [], []>} : vector<34x16xf32>, vector<16x64xf32>, vector<34x64xf32> -> vector<34x64xf32>
    %150 = arith.addf %110, %149 : vector<34x64xf32>
    %c3 = arith.constant 3 : index
    %c0_97 = arith.constant 0 : index
    %c0_98 = arith.constant 0 : index
    %151 = vector.load %arg9[%c3, %c0_97, %c0_98] : memref<32x16x64xf32, #tpu.memory_space<vmem>>, vector<1x16x64xf32>
    %152 = vector.shape_cast %151 : vector<1x16x64xf32> to vector<16x64xf32>
    %cst_99 = arith.constant dense<0.000000e+00> : vector<34x16xf32>
    %153 = tpu.matmul %31, %152, %cst_99 {dimension_numbers = #tpu.dot_dimension_numbers<[1], [1], [0], [0], [0, 0, 1, 0], [], []>} : vector<34x64xf32>, vector<16x64xf32>, vector<34x16xf32> -> vector<34x16xf32>
    %c3_100 = arith.constant 3 : index
    %c0_101 = arith.constant 0 : index
    %c0_102 = arith.constant 0 : index
    %154 = vector.load %arg10[%c3_100, %c0_101, %c0_102] : memref<24x1x16xf32, #tpu.memory_space<vmem>>, vector<1x1x16xf32>
    %155 = vector.shape_cast %154 : vector<1x1x16xf32> to vector<1x16xf32>
    %156 = vector.broadcast %155 : vector<1x16xf32> to vector<34x16xf32>
    %157 = arith.addf %153, %156 : vector<34x16xf32>
    %c7 = arith.constant 7 : index
    %c0_103 = arith.constant 0 : index
    %c0_104 = arith.constant 0 : index
    %158 = vector.load %arg9[%c7, %c0_103, %c0_104] : memref<32x16x64xf32, #tpu.memory_space<vmem>>, vector<1x16x64xf32>
    %159 = vector.shape_cast %158 : vector<1x16x64xf32> to vector<16x64xf32>
    %cst_105 = arith.constant dense<0.000000e+00> : vector<34x16xf32>
    %160 = tpu.matmul %31, %159, %cst_105 {dimension_numbers = #tpu.dot_dimension_numbers<[1], [1], [0], [0], [0, 0, 1, 0], [], []>} : vector<34x64xf32>, vector<16x64xf32>, vector<34x16xf32> -> vector<34x16xf32>
    %c7_106 = arith.constant 7 : index
    %c0_107 = arith.constant 0 : index
    %c0_108 = arith.constant 0 : index
    %161 = vector.load %arg10[%c7_106, %c0_107, %c0_108] : memref<24x1x16xf32, #tpu.memory_space<vmem>>, vector<1x1x16xf32>
    %162 = vector.shape_cast %161 : vector<1x1x16xf32> to vector<1x16xf32>
    %163 = vector.broadcast %162 : vector<1x16xf32> to vector<34x16xf32>
    %164 = arith.addf %160, %163 : vector<34x16xf32>
    %c11 = arith.constant 11 : index
    %c0_109 = arith.constant 0 : index
    %c0_110 = arith.constant 0 : index
    %165 = vector.load %arg9[%c11, %c0_109, %c0_110] : memref<32x16x64xf32, #tpu.memory_space<vmem>>, vector<1x16x64xf32>
    %166 = vector.shape_cast %165 : vector<1x16x64xf32> to vector<16x64xf32>
    %cst_111 = arith.constant dense<0.000000e+00> : vector<34x16xf32>
    %167 = tpu.matmul %31, %166, %cst_111 {dimension_numbers = #tpu.dot_dimension_numbers<[1], [1], [0], [0], [0, 0, 1, 0], [], []>} : vector<34x64xf32>, vector<16x64xf32>, vector<34x16xf32> -> vector<34x16xf32>
    %c11_112 = arith.constant 11 : index
    %c0_113 = arith.constant 0 : index
    %c0_114 = arith.constant 0 : index
    %168 = vector.load %arg10[%c11_112, %c0_113, %c0_114] : memref<24x1x16xf32, #tpu.memory_space<vmem>>, vector<1x1x16xf32>
    %169 = vector.shape_cast %168 : vector<1x1x16xf32> to vector<1x16xf32>
    %170 = vector.broadcast %169 : vector<1x16xf32> to vector<34x16xf32>
    %171 = arith.addf %167, %170 : vector<34x16xf32>
    %cst_115 = arith.constant dense<0.000000e+00> : vector<34x34xf32>
    %172 = tpu.matmul %157, %164, %cst_115 {dimension_numbers = #tpu.dot_dimension_numbers<[1], [1], [0], [0], [0, 0, 1, 0], [], []>} : vector<34x16xf32>, vector<34x16xf32>, vector<34x34xf32> -> vector<34x34xf32>
    %cst_116 = arith.constant 2.500000e-01 : f32
    %173 = vector.broadcast %cst_116 : f32 to vector<34x34xf32>
    %174 = arith.mulf %172, %173 : vector<34x34xf32>
    %175 = arith.addf %174, %5 : vector<34x34xf32>
    %cst_117 = arith.constant dense<0xFF800000> : vector<34xf32>
    %176 = vector.multi_reduction <maximumf>, %175, %cst_117 [1] : vector<34x34xf32> to vector<34xf32>
    %177 = vector.shape_cast %176 : vector<34xf32> to vector<34x1xf32>
    %178 = vector.broadcast %177 : vector<34x1xf32> to vector<34x34xf32>
    %179 = arith.subf %175, %178 : vector<34x34xf32>
    %180 = math.exp %179 : vector<34x34xf32>
    %cst_118 = arith.constant dense<0.000000e+00> : vector<34xf32>
    %181 = vector.multi_reduction <add>, %180, %cst_118 [1] : vector<34x34xf32> to vector<34xf32>
    %182 = vector.shape_cast %181 : vector<34xf32> to vector<34x1xf32>
    %183 = tpu.reciprocal %182 {approx = true} : vector<34x1xf32> -> vector<34x1xf32>
    %184 = vector.broadcast %183 : vector<34x1xf32> to vector<34x34xf32>
    %185 = arith.mulf %180, %184 : vector<34x34xf32>
    %cst_119 = arith.constant dense<0.000000e+00> : vector<34x16xf32>
    %186 = tpu.matmul %185, %171, %cst_119 {dimension_numbers = #tpu.dot_dimension_numbers<[1], [0], [0], [1], [0, 0, 1, 1], [], []>} : vector<34x34xf32>, vector<34x16xf32>, vector<34x16xf32> -> vector<34x16xf32>
    %c15 = arith.constant 15 : index
    %c0_120 = arith.constant 0 : index
    %c0_121 = arith.constant 0 : index
    %187 = vector.load %arg9[%c15, %c0_120, %c0_121] : memref<32x16x64xf32, #tpu.memory_space<vmem>>, vector<1x16x64xf32>
    %188 = vector.shape_cast %187 : vector<1x16x64xf32> to vector<16x64xf32>
    %cst_122 = arith.constant dense<0.000000e+00> : vector<34x64xf32>
    %189 = tpu.matmul %186, %188, %cst_122 {dimension_numbers = #tpu.dot_dimension_numbers<[1], [0], [0], [1], [0, 0, 1, 1], [], []>} : vector<34x16xf32>, vector<16x64xf32>, vector<34x64xf32> -> vector<34x64xf32>
    %190 = arith.addf %150, %189 : vector<34x64xf32>
    %191 = arith.addf %4, %190 : vector<34x64xf32>
    %c0_123 = arith.constant 0 : index
    %c6_124 = arith.constant 6 : index
    %c0_125 = arith.constant 0 : index
    %192 = vector.load %arg14[%c0_123, %c6_124, %c0_125] : memref<2x16x128xf32, #tpu.memory_space<vmem>>, vector<1x1x64xf32>
    %193 = vector.shape_cast %192 : vector<1x1x64xf32> to vector<1x64xf32>
    %194 = vector.broadcast %193 : vector<1x64xf32> to vector<34x64xf32>
    %195 = arith.addf %191, %194 : vector<34x64xf32>
    %c0_126 = arith.constant 0 : index
    %c2_127 = arith.constant 2 : index
    %c0_128 = arith.constant 0 : index
    %196 = vector.load %arg14[%c0_126, %c2_127, %c0_128] : memref<2x16x128xf32, #tpu.memory_space<vmem>>, vector<1x1x64xf32>
    %197 = vector.shape_cast %196 : vector<1x1x64xf32> to vector<1x64xf32>
    %c0_129 = arith.constant 0 : index
    %c3_130 = arith.constant 3 : index
    %c0_131 = arith.constant 0 : index
    %198 = vector.load %arg14[%c0_129, %c3_130, %c0_131] : memref<2x16x128xf32, #tpu.memory_space<vmem>>, vector<1x1x64xf32>
    %199 = vector.shape_cast %198 : vector<1x1x64xf32> to vector<1x64xf32>
    %cst_132 = arith.constant dense<0.000000e+00> : vector<34xf32>
    %200 = vector.multi_reduction <add>, %195, %cst_132 [1] : vector<34x64xf32> to vector<34xf32>
    %201 = vector.shape_cast %200 : vector<34xf32> to vector<34x1xf32>
    %cst_133 = arith.constant 6.400000e+01 : f32
    %202 = vector.broadcast %cst_133 : f32 to vector<34x1xf32>
    %203 = arith.divf %201, %202 : vector<34x1xf32>
    %204 = vector.broadcast %203 : vector<34x1xf32> to vector<34x64xf32>
    %205 = arith.subf %195, %204 : vector<34x64xf32>
    %206 = arith.mulf %205, %205 : vector<34x64xf32>
    %cst_134 = arith.constant dense<0.000000e+00> : vector<34xf32>
    %207 = vector.multi_reduction <add>, %206, %cst_134 [1] : vector<34x64xf32> to vector<34xf32>
    %208 = vector.shape_cast %207 : vector<34xf32> to vector<34x1xf32>
    %cst_135 = arith.constant 6.400000e+01 : f32
    %209 = vector.broadcast %cst_135 : f32 to vector<34x1xf32>
    %210 = arith.divf %208, %209 : vector<34x1xf32>
    %211 = vector.broadcast %203 : vector<34x1xf32> to vector<34x64xf32>
    %212 = arith.subf %195, %211 : vector<34x64xf32>
    %cst_136 = arith.constant 9.99999974E-6 : f32
    %213 = vector.broadcast %cst_136 : f32 to vector<34x1xf32>
    %214 = arith.addf %210, %213 : vector<34x1xf32>
    %215 = math.rsqrt %214 : vector<34x1xf32>
    %216 = vector.broadcast %215 : vector<34x1xf32> to vector<34x64xf32>
    %217 = arith.mulf %212, %216 : vector<34x64xf32>
    %218 = vector.broadcast %197 : vector<1x64xf32> to vector<34x64xf32>
    %219 = arith.mulf %217, %218 : vector<34x64xf32>
    %220 = vector.broadcast %199 : vector<1x64xf32> to vector<34x64xf32>
    %221 = arith.addf %219, %220 : vector<34x64xf32>
    %c0_137 = arith.constant 0 : index
    %c0_138 = arith.constant 0 : index
    %c0_139 = arith.constant 0 : index
    %222 = vector.load %arg11[%c0_137, %c0_138, %c0_139] : memref<2x64x128xf32, #tpu.memory_space<vmem>>, vector<1x64x128xf32>
    %223 = vector.shape_cast %222 : vector<1x64x128xf32> to vector<64x128xf32>
    %cst_140 = arith.constant dense<0.000000e+00> : vector<34x128xf32>
    %224 = tpu.matmul %221, %223, %cst_140 {dimension_numbers = #tpu.dot_dimension_numbers<[1], [0], [0], [1], [0, 0, 1, 1], [], []>} : vector<34x64xf32>, vector<64x128xf32>, vector<34x128xf32> -> vector<34x128xf32>
    %c0_141 = arith.constant 0 : index
    %c8_142 = arith.constant 8 : index
    %c0_143 = arith.constant 0 : index
    %225 = vector.load %arg14[%c0_141, %c8_142, %c0_143] : memref<2x16x128xf32, #tpu.memory_space<vmem>>, vector<1x1x128xf32>
    %226 = vector.shape_cast %225 : vector<1x1x128xf32> to vector<1x128xf32>
    %227 = vector.broadcast %226 : vector<1x128xf32> to vector<34x128xf32>
    %228 = arith.addf %224, %227 : vector<34x128xf32>
    %229 = arith.mulf %228, %228 : vector<34x128xf32>
    %230 = arith.mulf %228, %229 : vector<34x128xf32>
    %cst_144 = arith.constant 4.471500e-02 : f32
    %231 = vector.broadcast %cst_144 : f32 to vector<34x128xf32>
    %232 = arith.mulf %231, %230 : vector<34x128xf32>
    %233 = arith.addf %228, %232 : vector<34x128xf32>
    %cst_145 = arith.constant 0.797884583 : f32
    %234 = vector.broadcast %cst_145 : f32 to vector<34x128xf32>
    %235 = arith.mulf %234, %233 : vector<34x128xf32>
    %236 = math.tanh %235 : vector<34x128xf32>
    %cst_146 = arith.constant 1.000000e+00 : f32
    %237 = vector.broadcast %cst_146 : f32 to vector<34x128xf32>
    %238 = arith.addf %237, %236 : vector<34x128xf32>
    %cst_147 = arith.constant 5.000000e-01 : f32
    %239 = vector.broadcast %cst_147 : f32 to vector<34x128xf32>
    %240 = arith.mulf %239, %238 : vector<34x128xf32>
    %241 = arith.mulf %228, %240 : vector<34x128xf32>
    %c0_148 = arith.constant 0 : index
    %c0_149 = arith.constant 0 : index
    %c0_150 = arith.constant 0 : index
    %242 = vector.load %arg12[%c0_148, %c0_149, %c0_150] : memref<2x128x64xf32, #tpu.memory_space<vmem>>, vector<1x128x64xf32>
    %243 = vector.shape_cast %242 : vector<1x128x64xf32> to vector<128x64xf32>
    %cst_151 = arith.constant dense<0.000000e+00> : vector<34x64xf32>
    %244 = tpu.matmul %241, %243, %cst_151 {dimension_numbers = #tpu.dot_dimension_numbers<[1], [0], [0], [1], [0, 0, 1, 1], [], []>} : vector<34x128xf32>, vector<128x64xf32>, vector<34x64xf32> -> vector<34x64xf32>
    %245 = arith.addf %195, %244 : vector<34x64xf32>
    %c0_152 = arith.constant 0 : index
    %c7_153 = arith.constant 7 : index
    %c0_154 = arith.constant 0 : index
    %246 = vector.load %arg14[%c0_152, %c7_153, %c0_154] : memref<2x16x128xf32, #tpu.memory_space<vmem>>, vector<1x1x64xf32>
    %247 = vector.shape_cast %246 : vector<1x1x64xf32> to vector<1x64xf32>
    %248 = vector.broadcast %247 : vector<1x64xf32> to vector<34x64xf32>
    %249 = arith.addf %245, %248 : vector<34x64xf32>
    %c0_155 = arith.constant 0 : index
    %c0_156 = arith.constant 0 : index
    %250 = vector.load %arg6[%c0_155, %c0_156] : memref<2x34xf32, #tpu.memory_space<vmem>>, vector<2x34xf32>
    %cst_157 = arith.constant dense<0.000000e+00> : vector<2x64xf32>
    %251 = tpu.matmul %250, %249, %cst_157 {dimension_numbers = #tpu.dot_dimension_numbers<[1], [0], [0], [1], [0, 0, 1, 1], [], []>} : vector<2x34xf32>, vector<34x64xf32>, vector<2x64xf32> -> vector<2x64xf32>
    %c0_158 = arith.constant 0 : index
    %c4_159 = arith.constant 4 : index
    %c0_160 = arith.constant 0 : index
    %252 = vector.load %arg14[%c0_158, %c4_159, %c0_160] : memref<2x16x128xf32, #tpu.memory_space<vmem>>, vector<1x1x64xf32>
    %253 = vector.shape_cast %252 : vector<1x1x64xf32> to vector<1x64xf32>
    %c0_161 = arith.constant 0 : index
    %c5_162 = arith.constant 5 : index
    %c0_163 = arith.constant 0 : index
    %254 = vector.load %arg14[%c0_161, %c5_162, %c0_163] : memref<2x16x128xf32, #tpu.memory_space<vmem>>, vector<1x1x64xf32>
    %255 = vector.shape_cast %254 : vector<1x1x64xf32> to vector<1x64xf32>
    %cst_164 = arith.constant dense<0.000000e+00> : vector<2xf32>
    %256 = vector.multi_reduction <add>, %251, %cst_164 [1] : vector<2x64xf32> to vector<2xf32>
    %257 = vector.shape_cast %256 : vector<2xf32> to vector<2x1xf32>
    %cst_165 = arith.constant 6.400000e+01 : f32
    %258 = vector.broadcast %cst_165 : f32 to vector<2x1xf32>
    %259 = arith.divf %257, %258 : vector<2x1xf32>
    %260 = vector.broadcast %259 : vector<2x1xf32> to vector<2x64xf32>
    %261 = arith.subf %251, %260 : vector<2x64xf32>
    %262 = arith.mulf %261, %261 : vector<2x64xf32>
    %cst_166 = arith.constant dense<0.000000e+00> : vector<2xf32>
    %263 = vector.multi_reduction <add>, %262, %cst_166 [1] : vector<2x64xf32> to vector<2xf32>
    %264 = vector.shape_cast %263 : vector<2xf32> to vector<2x1xf32>
    %cst_167 = arith.constant 6.400000e+01 : f32
    %265 = vector.broadcast %cst_167 : f32 to vector<2x1xf32>
    %266 = arith.divf %264, %265 : vector<2x1xf32>
    %267 = vector.broadcast %259 : vector<2x1xf32> to vector<2x64xf32>
    %268 = arith.subf %251, %267 : vector<2x64xf32>
    %cst_168 = arith.constant 9.99999974E-6 : f32
    %269 = vector.broadcast %cst_168 : f32 to vector<2x1xf32>
    %270 = arith.addf %266, %269 : vector<2x1xf32>
    %271 = math.rsqrt %270 : vector<2x1xf32>
    %272 = vector.broadcast %271 : vector<2x1xf32> to vector<2x64xf32>
    %273 = arith.mulf %268, %272 : vector<2x64xf32>
    %274 = vector.broadcast %253 : vector<1x64xf32> to vector<2x64xf32>
    %275 = arith.mulf %273, %274 : vector<2x64xf32>
    %276 = vector.broadcast %255 : vector<1x64xf32> to vector<2x64xf32>
    %277 = arith.addf %275, %276 : vector<2x64xf32>
    %c0_169 = arith.constant 0 : index
    %c0_170 = arith.constant 0 : index
    %c0_171 = arith.constant 0 : index
    %278 = vector.load %arg13[%c0_169, %c0_170, %c0_171] : memref<2x64x32xf32, #tpu.memory_space<vmem>>, vector<1x64x32xf32>
    %279 = vector.shape_cast %278 : vector<1x64x32xf32> to vector<64x32xf32>
    %cst_172 = arith.constant dense<0.000000e+00> : vector<2x32xf32>
    %280 = tpu.matmul %277, %279, %cst_172 {dimension_numbers = #tpu.dot_dimension_numbers<[1], [0], [0], [1], [0, 0, 1, 1], [], []>} : vector<2x64xf32>, vector<64x32xf32>, vector<2x32xf32> -> vector<2x32xf32>
    %281 = arith.mulf %280, %280 : vector<2x32xf32>
    %cst_173 = arith.constant dense<0.000000e+00> : vector<2xf32>
    %282 = vector.multi_reduction <add>, %281, %cst_173 [1] : vector<2x32xf32> to vector<2xf32>
    %283 = vector.shape_cast %282 : vector<2xf32> to vector<2x1xf32>
    %284 = math.rsqrt %283 : vector<2x1xf32>
    %285 = vector.broadcast %284 : vector<2x1xf32> to vector<2x32xf32>
    %286 = arith.mulf %280, %285 : vector<2x32xf32>
    %c0_174 = arith.constant 0 : index
    %c0_175 = arith.constant 0 : index
    %287 = vector.load %arg2[%c0_174, %c0_175] : memref<32x64xf32, #tpu.memory_space<vmem>>, vector<32x64xf32>
    %c0_176 = arith.constant 0 : index
    %c0_177 = arith.constant 0 : index
    %288 = vector.load %arg5[%c0_176, %c0_177] : memref<32x32xf32, #tpu.memory_space<vmem>>, vector<32x32xf32>
    %c1_178 = arith.constant 1 : index
    %c0_179 = arith.constant 0 : index
    %c0_180 = arith.constant 0 : index
    %289 = vector.load %arg14[%c1_178, %c0_179, %c0_180] : memref<2x16x128xf32, #tpu.memory_space<vmem>>, vector<1x1x64xf32>
    %290 = vector.shape_cast %289 : vector<1x1x64xf32> to vector<1x64xf32>
    %c1_181 = arith.constant 1 : index
    %c1_182 = arith.constant 1 : index
    %c0_183 = arith.constant 0 : index
    %291 = vector.load %arg14[%c1_181, %c1_182, %c0_183] : memref<2x16x128xf32, #tpu.memory_space<vmem>>, vector<1x1x64xf32>
    %292 = vector.shape_cast %291 : vector<1x1x64xf32> to vector<1x64xf32>
    %cst_184 = arith.constant dense<0.000000e+00> : vector<32xf32>
    %293 = vector.multi_reduction <add>, %287, %cst_184 [1] : vector<32x64xf32> to vector<32xf32>
    %294 = vector.shape_cast %293 : vector<32xf32> to vector<32x1xf32>
    %cst_185 = arith.constant 6.400000e+01 : f32
    %295 = vector.broadcast %cst_185 : f32 to vector<32x1xf32>
    %296 = arith.divf %294, %295 : vector<32x1xf32>
    %297 = vector.broadcast %296 : vector<32x1xf32> to vector<32x64xf32>
    %298 = arith.subf %287, %297 : vector<32x64xf32>
    %299 = arith.mulf %298, %298 : vector<32x64xf32>
    %cst_186 = arith.constant dense<0.000000e+00> : vector<32xf32>
    %300 = vector.multi_reduction <add>, %299, %cst_186 [1] : vector<32x64xf32> to vector<32xf32>
    %301 = vector.shape_cast %300 : vector<32xf32> to vector<32x1xf32>
    %cst_187 = arith.constant 6.400000e+01 : f32
    %302 = vector.broadcast %cst_187 : f32 to vector<32x1xf32>
    %303 = arith.divf %301, %302 : vector<32x1xf32>
    %304 = vector.broadcast %296 : vector<32x1xf32> to vector<32x64xf32>
    %305 = arith.subf %287, %304 : vector<32x64xf32>
    %cst_188 = arith.constant 9.99999974E-6 : f32
    %306 = vector.broadcast %cst_188 : f32 to vector<32x1xf32>
    %307 = arith.addf %303, %306 : vector<32x1xf32>
    %308 = math.rsqrt %307 : vector<32x1xf32>
    %309 = vector.broadcast %308 : vector<32x1xf32> to vector<32x64xf32>
    %310 = arith.mulf %305, %309 : vector<32x64xf32>
    %311 = vector.broadcast %290 : vector<1x64xf32> to vector<32x64xf32>
    %312 = arith.mulf %310, %311 : vector<32x64xf32>
    %313 = vector.broadcast %292 : vector<1x64xf32> to vector<32x64xf32>
    %314 = arith.addf %312, %313 : vector<32x64xf32>
    %c16 = arith.constant 16 : index
    %c0_189 = arith.constant 0 : index
    %c0_190 = arith.constant 0 : index
    %315 = vector.load %arg9[%c16, %c0_189, %c0_190] : memref<32x16x64xf32, #tpu.memory_space<vmem>>, vector<1x16x64xf32>
    %316 = vector.shape_cast %315 : vector<1x16x64xf32> to vector<16x64xf32>
    %cst_191 = arith.constant dense<0.000000e+00> : vector<32x16xf32>
    %317 = tpu.matmul %314, %316, %cst_191 {dimension_numbers = #tpu.dot_dimension_numbers<[1], [1], [0], [0], [0, 0, 1, 0], [], []>} : vector<32x64xf32>, vector<16x64xf32>, vector<32x16xf32> -> vector<32x16xf32>
    %c12_192 = arith.constant 12 : index
    %c0_193 = arith.constant 0 : index
    %c0_194 = arith.constant 0 : index
    %318 = vector.load %arg10[%c12_192, %c0_193, %c0_194] : memref<24x1x16xf32, #tpu.memory_space<vmem>>, vector<1x1x16xf32>
    %319 = vector.shape_cast %318 : vector<1x1x16xf32> to vector<1x16xf32>
    %320 = vector.broadcast %319 : vector<1x16xf32> to vector<32x16xf32>
    %321 = arith.addf %317, %320 : vector<32x16xf32>
    %c20 = arith.constant 20 : index
    %c0_195 = arith.constant 0 : index
    %c0_196 = arith.constant 0 : index
    %322 = vector.load %arg9[%c20, %c0_195, %c0_196] : memref<32x16x64xf32, #tpu.memory_space<vmem>>, vector<1x16x64xf32>
    %323 = vector.shape_cast %322 : vector<1x16x64xf32> to vector<16x64xf32>
    %cst_197 = arith.constant dense<0.000000e+00> : vector<32x16xf32>
    %324 = tpu.matmul %314, %323, %cst_197 {dimension_numbers = #tpu.dot_dimension_numbers<[1], [1], [0], [0], [0, 0, 1, 0], [], []>} : vector<32x64xf32>, vector<16x64xf32>, vector<32x16xf32> -> vector<32x16xf32>
    %c16_198 = arith.constant 16 : index
    %c0_199 = arith.constant 0 : index
    %c0_200 = arith.constant 0 : index
    %325 = vector.load %arg10[%c16_198, %c0_199, %c0_200] : memref<24x1x16xf32, #tpu.memory_space<vmem>>, vector<1x1x16xf32>
    %326 = vector.shape_cast %325 : vector<1x1x16xf32> to vector<1x16xf32>
    %327 = vector.broadcast %326 : vector<1x16xf32> to vector<32x16xf32>
    %328 = arith.addf %324, %327 : vector<32x16xf32>
    %c24 = arith.constant 24 : index
    %c0_201 = arith.constant 0 : index
    %c0_202 = arith.constant 0 : index
    %329 = vector.load %arg9[%c24, %c0_201, %c0_202] : memref<32x16x64xf32, #tpu.memory_space<vmem>>, vector<1x16x64xf32>
    %330 = vector.shape_cast %329 : vector<1x16x64xf32> to vector<16x64xf32>
    %cst_203 = arith.constant dense<0.000000e+00> : vector<32x16xf32>
    %331 = tpu.matmul %314, %330, %cst_203 {dimension_numbers = #tpu.dot_dimension_numbers<[1], [1], [0], [0], [0, 0, 1, 0], [], []>} : vector<32x64xf32>, vector<16x64xf32>, vector<32x16xf32> -> vector<32x16xf32>
    %c20_204 = arith.constant 20 : index
    %c0_205 = arith.constant 0 : index
    %c0_206 = arith.constant 0 : index
    %332 = vector.load %arg10[%c20_204, %c0_205, %c0_206] : memref<24x1x16xf32, #tpu.memory_space<vmem>>, vector<1x1x16xf32>
    %333 = vector.shape_cast %332 : vector<1x1x16xf32> to vector<1x16xf32>
    %334 = vector.broadcast %333 : vector<1x16xf32> to vector<32x16xf32>
    %335 = arith.addf %331, %334 : vector<32x16xf32>
    %cst_207 = arith.constant dense<0.000000e+00> : vector<32x32xf32>
    %336 = tpu.matmul %321, %328, %cst_207 {dimension_numbers = #tpu.dot_dimension_numbers<[1], [1], [0], [0], [0, 0, 1, 0], [], []>} : vector<32x16xf32>, vector<32x16xf32>, vector<32x32xf32> -> vector<32x32xf32>
    %cst_208 = arith.constant 2.500000e-01 : f32
    %337 = vector.broadcast %cst_208 : f32 to vector<32x32xf32>
    %338 = arith.mulf %336, %337 : vector<32x32xf32>
    %339 = arith.addf %338, %288 : vector<32x32xf32>
    %cst_209 = arith.constant dense<0xFF800000> : vector<32xf32>
    %340 = vector.multi_reduction <maximumf>, %339, %cst_209 [1] : vector<32x32xf32> to vector<32xf32>
    %341 = vector.shape_cast %340 : vector<32xf32> to vector<32x1xf32>
    %342 = vector.broadcast %341 : vector<32x1xf32> to vector<32x32xf32>
    %343 = arith.subf %339, %342 : vector<32x32xf32>
    %344 = math.exp %343 : vector<32x32xf32>
    %cst_210 = arith.constant dense<0.000000e+00> : vector<32xf32>
    %345 = vector.multi_reduction <add>, %344, %cst_210 [1] : vector<32x32xf32> to vector<32xf32>
    %346 = vector.shape_cast %345 : vector<32xf32> to vector<32x1xf32>
    %347 = tpu.reciprocal %346 {approx = true} : vector<32x1xf32> -> vector<32x1xf32>
    %348 = vector.broadcast %347 : vector<32x1xf32> to vector<32x32xf32>
    %349 = arith.mulf %344, %348 : vector<32x32xf32>
    %cst_211 = arith.constant dense<0.000000e+00> : vector<32x16xf32>
    %350 = tpu.matmul %349, %335, %cst_211 {dimension_numbers = #tpu.dot_dimension_numbers<[1], [0], [0], [1], [0, 0, 1, 1], [], []>} : vector<32x32xf32>, vector<32x16xf32>, vector<32x16xf32> -> vector<32x16xf32>
    %c28 = arith.constant 28 : index
    %c0_212 = arith.constant 0 : index
    %c0_213 = arith.constant 0 : index
    %351 = vector.load %arg9[%c28, %c0_212, %c0_213] : memref<32x16x64xf32, #tpu.memory_space<vmem>>, vector<1x16x64xf32>
    %352 = vector.shape_cast %351 : vector<1x16x64xf32> to vector<16x64xf32>
    %cst_214 = arith.constant dense<0.000000e+00> : vector<32x64xf32>
    %353 = tpu.matmul %350, %352, %cst_214 {dimension_numbers = #tpu.dot_dimension_numbers<[1], [0], [0], [1], [0, 0, 1, 1], [], []>} : vector<32x16xf32>, vector<16x64xf32>, vector<32x64xf32> -> vector<32x64xf32>
    %c17 = arith.constant 17 : index
    %c0_215 = arith.constant 0 : index
    %c0_216 = arith.constant 0 : index
    %354 = vector.load %arg9[%c17, %c0_215, %c0_216] : memref<32x16x64xf32, #tpu.memory_space<vmem>>, vector<1x16x64xf32>
    %355 = vector.shape_cast %354 : vector<1x16x64xf32> to vector<16x64xf32>
    %cst_217 = arith.constant dense<0.000000e+00> : vector<32x16xf32>
    %356 = tpu.matmul %314, %355, %cst_217 {dimension_numbers = #tpu.dot_dimension_numbers<[1], [1], [0], [0], [0, 0, 1, 0], [], []>} : vector<32x64xf32>, vector<16x64xf32>, vector<32x16xf32> -> vector<32x16xf32>
    %c13_218 = arith.constant 13 : index
    %c0_219 = arith.constant 0 : index
    %c0_220 = arith.constant 0 : index
    %357 = vector.load %arg10[%c13_218, %c0_219, %c0_220] : memref<24x1x16xf32, #tpu.memory_space<vmem>>, vector<1x1x16xf32>
    %358 = vector.shape_cast %357 : vector<1x1x16xf32> to vector<1x16xf32>
    %359 = vector.broadcast %358 : vector<1x16xf32> to vector<32x16xf32>
    %360 = arith.addf %356, %359 : vector<32x16xf32>
    %c21 = arith.constant 21 : index
    %c0_221 = arith.constant 0 : index
    %c0_222 = arith.constant 0 : index
    %361 = vector.load %arg9[%c21, %c0_221, %c0_222] : memref<32x16x64xf32, #tpu.memory_space<vmem>>, vector<1x16x64xf32>
    %362 = vector.shape_cast %361 : vector<1x16x64xf32> to vector<16x64xf32>
    %cst_223 = arith.constant dense<0.000000e+00> : vector<32x16xf32>
    %363 = tpu.matmul %314, %362, %cst_223 {dimension_numbers = #tpu.dot_dimension_numbers<[1], [1], [0], [0], [0, 0, 1, 0], [], []>} : vector<32x64xf32>, vector<16x64xf32>, vector<32x16xf32> -> vector<32x16xf32>
    %c17_224 = arith.constant 17 : index
    %c0_225 = arith.constant 0 : index
    %c0_226 = arith.constant 0 : index
    %364 = vector.load %arg10[%c17_224, %c0_225, %c0_226] : memref<24x1x16xf32, #tpu.memory_space<vmem>>, vector<1x1x16xf32>
    %365 = vector.shape_cast %364 : vector<1x1x16xf32> to vector<1x16xf32>
    %366 = vector.broadcast %365 : vector<1x16xf32> to vector<32x16xf32>
    %367 = arith.addf %363, %366 : vector<32x16xf32>
    %c25 = arith.constant 25 : index
    %c0_227 = arith.constant 0 : index
    %c0_228 = arith.constant 0 : index
    %368 = vector.load %arg9[%c25, %c0_227, %c0_228] : memref<32x16x64xf32, #tpu.memory_space<vmem>>, vector<1x16x64xf32>
    %369 = vector.shape_cast %368 : vector<1x16x64xf32> to vector<16x64xf32>
    %cst_229 = arith.constant dense<0.000000e+00> : vector<32x16xf32>
    %370 = tpu.matmul %314, %369, %cst_229 {dimension_numbers = #tpu.dot_dimension_numbers<[1], [1], [0], [0], [0, 0, 1, 0], [], []>} : vector<32x64xf32>, vector<16x64xf32>, vector<32x16xf32> -> vector<32x16xf32>
    %c21_230 = arith.constant 21 : index
    %c0_231 = arith.constant 0 : index
    %c0_232 = arith.constant 0 : index
    %371 = vector.load %arg10[%c21_230, %c0_231, %c0_232] : memref<24x1x16xf32, #tpu.memory_space<vmem>>, vector<1x1x16xf32>
    %372 = vector.shape_cast %371 : vector<1x1x16xf32> to vector<1x16xf32>
    %373 = vector.broadcast %372 : vector<1x16xf32> to vector<32x16xf32>
    %374 = arith.addf %370, %373 : vector<32x16xf32>
    %cst_233 = arith.constant dense<0.000000e+00> : vector<32x32xf32>
    %375 = tpu.matmul %360, %367, %cst_233 {dimension_numbers = #tpu.dot_dimension_numbers<[1], [1], [0], [0], [0, 0, 1, 0], [], []>} : vector<32x16xf32>, vector<32x16xf32>, vector<32x32xf32> -> vector<32x32xf32>
    %cst_234 = arith.constant 2.500000e-01 : f32
    %376 = vector.broadcast %cst_234 : f32 to vector<32x32xf32>
    %377 = arith.mulf %375, %376 : vector<32x32xf32>
    %378 = arith.addf %377, %288 : vector<32x32xf32>
    %cst_235 = arith.constant dense<0xFF800000> : vector<32xf32>
    %379 = vector.multi_reduction <maximumf>, %378, %cst_235 [1] : vector<32x32xf32> to vector<32xf32>
    %380 = vector.shape_cast %379 : vector<32xf32> to vector<32x1xf32>
    %381 = vector.broadcast %380 : vector<32x1xf32> to vector<32x32xf32>
    %382 = arith.subf %378, %381 : vector<32x32xf32>
    %383 = math.exp %382 : vector<32x32xf32>
    %cst_236 = arith.constant dense<0.000000e+00> : vector<32xf32>
    %384 = vector.multi_reduction <add>, %383, %cst_236 [1] : vector<32x32xf32> to vector<32xf32>
    %385 = vector.shape_cast %384 : vector<32xf32> to vector<32x1xf32>
    %386 = tpu.reciprocal %385 {approx = true} : vector<32x1xf32> -> vector<32x1xf32>
    %387 = vector.broadcast %386 : vector<32x1xf32> to vector<32x32xf32>
    %388 = arith.mulf %383, %387 : vector<32x32xf32>
    %cst_237 = arith.constant dense<0.000000e+00> : vector<32x16xf32>
    %389 = tpu.matmul %388, %374, %cst_237 {dimension_numbers = #tpu.dot_dimension_numbers<[1], [0], [0], [1], [0, 0, 1, 1], [], []>} : vector<32x32xf32>, vector<32x16xf32>, vector<32x16xf32> -> vector<32x16xf32>
    %c29 = arith.constant 29 : index
    %c0_238 = arith.constant 0 : index
    %c0_239 = arith.constant 0 : index
    %390 = vector.load %arg9[%c29, %c0_238, %c0_239] : memref<32x16x64xf32, #tpu.memory_space<vmem>>, vector<1x16x64xf32>
    %391 = vector.shape_cast %390 : vector<1x16x64xf32> to vector<16x64xf32>
    %cst_240 = arith.constant dense<0.000000e+00> : vector<32x64xf32>
    %392 = tpu.matmul %389, %391, %cst_240 {dimension_numbers = #tpu.dot_dimension_numbers<[1], [0], [0], [1], [0, 0, 1, 1], [], []>} : vector<32x16xf32>, vector<16x64xf32>, vector<32x64xf32> -> vector<32x64xf32>
    %393 = arith.addf %353, %392 : vector<32x64xf32>
    %c18 = arith.constant 18 : index
    %c0_241 = arith.constant 0 : index
    %c0_242 = arith.constant 0 : index
    %394 = vector.load %arg9[%c18, %c0_241, %c0_242] : memref<32x16x64xf32, #tpu.memory_space<vmem>>, vector<1x16x64xf32>
    %395 = vector.shape_cast %394 : vector<1x16x64xf32> to vector<16x64xf32>
    %cst_243 = arith.constant dense<0.000000e+00> : vector<32x16xf32>
    %396 = tpu.matmul %314, %395, %cst_243 {dimension_numbers = #tpu.dot_dimension_numbers<[1], [1], [0], [0], [0, 0, 1, 0], [], []>} : vector<32x64xf32>, vector<16x64xf32>, vector<32x16xf32> -> vector<32x16xf32>
    %c14_244 = arith.constant 14 : index
    %c0_245 = arith.constant 0 : index
    %c0_246 = arith.constant 0 : index
    %397 = vector.load %arg10[%c14_244, %c0_245, %c0_246] : memref<24x1x16xf32, #tpu.memory_space<vmem>>, vector<1x1x16xf32>
    %398 = vector.shape_cast %397 : vector<1x1x16xf32> to vector<1x16xf32>
    %399 = vector.broadcast %398 : vector<1x16xf32> to vector<32x16xf32>
    %400 = arith.addf %396, %399 : vector<32x16xf32>
    %c22 = arith.constant 22 : index
    %c0_247 = arith.constant 0 : index
    %c0_248 = arith.constant 0 : index
    %401 = vector.load %arg9[%c22, %c0_247, %c0_248] : memref<32x16x64xf32, #tpu.memory_space<vmem>>, vector<1x16x64xf32>
    %402 = vector.shape_cast %401 : vector<1x16x64xf32> to vector<16x64xf32>
    %cst_249 = arith.constant dense<0.000000e+00> : vector<32x16xf32>
    %403 = tpu.matmul %314, %402, %cst_249 {dimension_numbers = #tpu.dot_dimension_numbers<[1], [1], [0], [0], [0, 0, 1, 0], [], []>} : vector<32x64xf32>, vector<16x64xf32>, vector<32x16xf32> -> vector<32x16xf32>
    %c18_250 = arith.constant 18 : index
    %c0_251 = arith.constant 0 : index
    %c0_252 = arith.constant 0 : index
    %404 = vector.load %arg10[%c18_250, %c0_251, %c0_252] : memref<24x1x16xf32, #tpu.memory_space<vmem>>, vector<1x1x16xf32>
    %405 = vector.shape_cast %404 : vector<1x1x16xf32> to vector<1x16xf32>
    %406 = vector.broadcast %405 : vector<1x16xf32> to vector<32x16xf32>
    %407 = arith.addf %403, %406 : vector<32x16xf32>
    %c26 = arith.constant 26 : index
    %c0_253 = arith.constant 0 : index
    %c0_254 = arith.constant 0 : index
    %408 = vector.load %arg9[%c26, %c0_253, %c0_254] : memref<32x16x64xf32, #tpu.memory_space<vmem>>, vector<1x16x64xf32>
    %409 = vector.shape_cast %408 : vector<1x16x64xf32> to vector<16x64xf32>
    %cst_255 = arith.constant dense<0.000000e+00> : vector<32x16xf32>
    %410 = tpu.matmul %314, %409, %cst_255 {dimension_numbers = #tpu.dot_dimension_numbers<[1], [1], [0], [0], [0, 0, 1, 0], [], []>} : vector<32x64xf32>, vector<16x64xf32>, vector<32x16xf32> -> vector<32x16xf32>
    %c22_256 = arith.constant 22 : index
    %c0_257 = arith.constant 0 : index
    %c0_258 = arith.constant 0 : index
    %411 = vector.load %arg10[%c22_256, %c0_257, %c0_258] : memref<24x1x16xf32, #tpu.memory_space<vmem>>, vector<1x1x16xf32>
    %412 = vector.shape_cast %411 : vector<1x1x16xf32> to vector<1x16xf32>
    %413 = vector.broadcast %412 : vector<1x16xf32> to vector<32x16xf32>
    %414 = arith.addf %410, %413 : vector<32x16xf32>
    %cst_259 = arith.constant dense<0.000000e+00> : vector<32x32xf32>
    %415 = tpu.matmul %400, %407, %cst_259 {dimension_numbers = #tpu.dot_dimension_numbers<[1], [1], [0], [0], [0, 0, 1, 0], [], []>} : vector<32x16xf32>, vector<32x16xf32>, vector<32x32xf32> -> vector<32x32xf32>
    %cst_260 = arith.constant 2.500000e-01 : f32
    %416 = vector.broadcast %cst_260 : f32 to vector<32x32xf32>
    %417 = arith.mulf %415, %416 : vector<32x32xf32>
    %418 = arith.addf %417, %288 : vector<32x32xf32>
    %cst_261 = arith.constant dense<0xFF800000> : vector<32xf32>
    %419 = vector.multi_reduction <maximumf>, %418, %cst_261 [1] : vector<32x32xf32> to vector<32xf32>
    %420 = vector.shape_cast %419 : vector<32xf32> to vector<32x1xf32>
    %421 = vector.broadcast %420 : vector<32x1xf32> to vector<32x32xf32>
    %422 = arith.subf %418, %421 : vector<32x32xf32>
    %423 = math.exp %422 : vector<32x32xf32>
    %cst_262 = arith.constant dense<0.000000e+00> : vector<32xf32>
    %424 = vector.multi_reduction <add>, %423, %cst_262 [1] : vector<32x32xf32> to vector<32xf32>
    %425 = vector.shape_cast %424 : vector<32xf32> to vector<32x1xf32>
    %426 = tpu.reciprocal %425 {approx = true} : vector<32x1xf32> -> vector<32x1xf32>
    %427 = vector.broadcast %426 : vector<32x1xf32> to vector<32x32xf32>
    %428 = arith.mulf %423, %427 : vector<32x32xf32>
    %cst_263 = arith.constant dense<0.000000e+00> : vector<32x16xf32>
    %429 = tpu.matmul %428, %414, %cst_263 {dimension_numbers = #tpu.dot_dimension_numbers<[1], [0], [0], [1], [0, 0, 1, 1], [], []>} : vector<32x32xf32>, vector<32x16xf32>, vector<32x16xf32> -> vector<32x16xf32>
    %c30 = arith.constant 30 : index
    %c0_264 = arith.constant 0 : index
    %c0_265 = arith.constant 0 : index
    %430 = vector.load %arg9[%c30, %c0_264, %c0_265] : memref<32x16x64xf32, #tpu.memory_space<vmem>>, vector<1x16x64xf32>
    %431 = vector.shape_cast %430 : vector<1x16x64xf32> to vector<16x64xf32>
    %cst_266 = arith.constant dense<0.000000e+00> : vector<32x64xf32>
    %432 = tpu.matmul %429, %431, %cst_266 {dimension_numbers = #tpu.dot_dimension_numbers<[1], [0], [0], [1], [0, 0, 1, 1], [], []>} : vector<32x16xf32>, vector<16x64xf32>, vector<32x64xf32> -> vector<32x64xf32>
    %433 = arith.addf %393, %432 : vector<32x64xf32>
    %c19 = arith.constant 19 : index
    %c0_267 = arith.constant 0 : index
    %c0_268 = arith.constant 0 : index
    %434 = vector.load %arg9[%c19, %c0_267, %c0_268] : memref<32x16x64xf32, #tpu.memory_space<vmem>>, vector<1x16x64xf32>
    %435 = vector.shape_cast %434 : vector<1x16x64xf32> to vector<16x64xf32>
    %cst_269 = arith.constant dense<0.000000e+00> : vector<32x16xf32>
    %436 = tpu.matmul %314, %435, %cst_269 {dimension_numbers = #tpu.dot_dimension_numbers<[1], [1], [0], [0], [0, 0, 1, 0], [], []>} : vector<32x64xf32>, vector<16x64xf32>, vector<32x16xf32> -> vector<32x16xf32>
    %c15_270 = arith.constant 15 : index
    %c0_271 = arith.constant 0 : index
    %c0_272 = arith.constant 0 : index
    %437 = vector.load %arg10[%c15_270, %c0_271, %c0_272] : memref<24x1x16xf32, #tpu.memory_space<vmem>>, vector<1x1x16xf32>
    %438 = vector.shape_cast %437 : vector<1x1x16xf32> to vector<1x16xf32>
    %439 = vector.broadcast %438 : vector<1x16xf32> to vector<32x16xf32>
    %440 = arith.addf %436, %439 : vector<32x16xf32>
    %c23 = arith.constant 23 : index
    %c0_273 = arith.constant 0 : index
    %c0_274 = arith.constant 0 : index
    %441 = vector.load %arg9[%c23, %c0_273, %c0_274] : memref<32x16x64xf32, #tpu.memory_space<vmem>>, vector<1x16x64xf32>
    %442 = vector.shape_cast %441 : vector<1x16x64xf32> to vector<16x64xf32>
    %cst_275 = arith.constant dense<0.000000e+00> : vector<32x16xf32>
    %443 = tpu.matmul %314, %442, %cst_275 {dimension_numbers = #tpu.dot_dimension_numbers<[1], [1], [0], [0], [0, 0, 1, 0], [], []>} : vector<32x64xf32>, vector<16x64xf32>, vector<32x16xf32> -> vector<32x16xf32>
    %c19_276 = arith.constant 19 : index
    %c0_277 = arith.constant 0 : index
    %c0_278 = arith.constant 0 : index
    %444 = vector.load %arg10[%c19_276, %c0_277, %c0_278] : memref<24x1x16xf32, #tpu.memory_space<vmem>>, vector<1x1x16xf32>
    %445 = vector.shape_cast %444 : vector<1x1x16xf32> to vector<1x16xf32>
    %446 = vector.broadcast %445 : vector<1x16xf32> to vector<32x16xf32>
    %447 = arith.addf %443, %446 : vector<32x16xf32>
    %c27 = arith.constant 27 : index
    %c0_279 = arith.constant 0 : index
    %c0_280 = arith.constant 0 : index
    %448 = vector.load %arg9[%c27, %c0_279, %c0_280] : memref<32x16x64xf32, #tpu.memory_space<vmem>>, vector<1x16x64xf32>
    %449 = vector.shape_cast %448 : vector<1x16x64xf32> to vector<16x64xf32>
    %cst_281 = arith.constant dense<0.000000e+00> : vector<32x16xf32>
    %450 = tpu.matmul %314, %449, %cst_281 {dimension_numbers = #tpu.dot_dimension_numbers<[1], [1], [0], [0], [0, 0, 1, 0], [], []>} : vector<32x64xf32>, vector<16x64xf32>, vector<32x16xf32> -> vector<32x16xf32>
    %c23_282 = arith.constant 23 : index
    %c0_283 = arith.constant 0 : index
    %c0_284 = arith.constant 0 : index
    %451 = vector.load %arg10[%c23_282, %c0_283, %c0_284] : memref<24x1x16xf32, #tpu.memory_space<vmem>>, vector<1x1x16xf32>
    %452 = vector.shape_cast %451 : vector<1x1x16xf32> to vector<1x16xf32>
    %453 = vector.broadcast %452 : vector<1x16xf32> to vector<32x16xf32>
    %454 = arith.addf %450, %453 : vector<32x16xf32>
    %cst_285 = arith.constant dense<0.000000e+00> : vector<32x32xf32>
    %455 = tpu.matmul %440, %447, %cst_285 {dimension_numbers = #tpu.dot_dimension_numbers<[1], [1], [0], [0], [0, 0, 1, 0], [], []>} : vector<32x16xf32>, vector<32x16xf32>, vector<32x32xf32> -> vector<32x32xf32>
    %cst_286 = arith.constant 2.500000e-01 : f32
    %456 = vector.broadcast %cst_286 : f32 to vector<32x32xf32>
    %457 = arith.mulf %455, %456 : vector<32x32xf32>
    %458 = arith.addf %457, %288 : vector<32x32xf32>
    %cst_287 = arith.constant dense<0xFF800000> : vector<32xf32>
    %459 = vector.multi_reduction <maximumf>, %458, %cst_287 [1] : vector<32x32xf32> to vector<32xf32>
    %460 = vector.shape_cast %459 : vector<32xf32> to vector<32x1xf32>
    %461 = vector.broadcast %460 : vector<32x1xf32> to vector<32x32xf32>
    %462 = arith.subf %458, %461 : vector<32x32xf32>
    %463 = math.exp %462 : vector<32x32xf32>
    %cst_288 = arith.constant dense<0.000000e+00> : vector<32xf32>
    %464 = vector.multi_reduction <add>, %463, %cst_288 [1] : vector<32x32xf32> to vector<32xf32>
    %465 = vector.shape_cast %464 : vector<32xf32> to vector<32x1xf32>
    %466 = tpu.reciprocal %465 {approx = true} : vector<32x1xf32> -> vector<32x1xf32>
    %467 = vector.broadcast %466 : vector<32x1xf32> to vector<32x32xf32>
    %468 = arith.mulf %463, %467 : vector<32x32xf32>
    %cst_289 = arith.constant dense<0.000000e+00> : vector<32x16xf32>
    %469 = tpu.matmul %468, %454, %cst_289 {dimension_numbers = #tpu.dot_dimension_numbers<[1], [0], [0], [1], [0, 0, 1, 1], [], []>} : vector<32x32xf32>, vector<32x16xf32>, vector<32x16xf32> -> vector<32x16xf32>
    %c31 = arith.constant 31 : index
    %c0_290 = arith.constant 0 : index
    %c0_291 = arith.constant 0 : index
    %470 = vector.load %arg9[%c31, %c0_290, %c0_291] : memref<32x16x64xf32, #tpu.memory_space<vmem>>, vector<1x16x64xf32>
    %471 = vector.shape_cast %470 : vector<1x16x64xf32> to vector<16x64xf32>
    %cst_292 = arith.constant dense<0.000000e+00> : vector<32x64xf32>
    %472 = tpu.matmul %469, %471, %cst_292 {dimension_numbers = #tpu.dot_dimension_numbers<[1], [0], [0], [1], [0, 0, 1, 1], [], []>} : vector<32x16xf32>, vector<16x64xf32>, vector<32x64xf32> -> vector<32x64xf32>
    %473 = arith.addf %433, %472 : vector<32x64xf32>
    %474 = arith.addf %287, %473 : vector<32x64xf32>
    %c1_293 = arith.constant 1 : index
    %c6_294 = arith.constant 6 : index
    %c0_295 = arith.constant 0 : index
    %475 = vector.load %arg14[%c1_293, %c6_294, %c0_295] : memref<2x16x128xf32, #tpu.memory_space<vmem>>, vector<1x1x64xf32>
    %476 = vector.shape_cast %475 : vector<1x1x64xf32> to vector<1x64xf32>
    %477 = vector.broadcast %476 : vector<1x64xf32> to vector<32x64xf32>
    %478 = arith.addf %474, %477 : vector<32x64xf32>
    %c1_296 = arith.constant 1 : index
    %c2_297 = arith.constant 2 : index
    %c0_298 = arith.constant 0 : index
    %479 = vector.load %arg14[%c1_296, %c2_297, %c0_298] : memref<2x16x128xf32, #tpu.memory_space<vmem>>, vector<1x1x64xf32>
    %480 = vector.shape_cast %479 : vector<1x1x64xf32> to vector<1x64xf32>
    %c1_299 = arith.constant 1 : index
    %c3_300 = arith.constant 3 : index
    %c0_301 = arith.constant 0 : index
    %481 = vector.load %arg14[%c1_299, %c3_300, %c0_301] : memref<2x16x128xf32, #tpu.memory_space<vmem>>, vector<1x1x64xf32>
    %482 = vector.shape_cast %481 : vector<1x1x64xf32> to vector<1x64xf32>
    %cst_302 = arith.constant dense<0.000000e+00> : vector<32xf32>
    %483 = vector.multi_reduction <add>, %478, %cst_302 [1] : vector<32x64xf32> to vector<32xf32>
    %484 = vector.shape_cast %483 : vector<32xf32> to vector<32x1xf32>
    %cst_303 = arith.constant 6.400000e+01 : f32
    %485 = vector.broadcast %cst_303 : f32 to vector<32x1xf32>
    %486 = arith.divf %484, %485 : vector<32x1xf32>
    %487 = vector.broadcast %486 : vector<32x1xf32> to vector<32x64xf32>
    %488 = arith.subf %478, %487 : vector<32x64xf32>
    %489 = arith.mulf %488, %488 : vector<32x64xf32>
    %cst_304 = arith.constant dense<0.000000e+00> : vector<32xf32>
    %490 = vector.multi_reduction <add>, %489, %cst_304 [1] : vector<32x64xf32> to vector<32xf32>
    %491 = vector.shape_cast %490 : vector<32xf32> to vector<32x1xf32>
    %cst_305 = arith.constant 6.400000e+01 : f32
    %492 = vector.broadcast %cst_305 : f32 to vector<32x1xf32>
    %493 = arith.divf %491, %492 : vector<32x1xf32>
    %494 = vector.broadcast %486 : vector<32x1xf32> to vector<32x64xf32>
    %495 = arith.subf %478, %494 : vector<32x64xf32>
    %cst_306 = arith.constant 9.99999974E-6 : f32
    %496 = vector.broadcast %cst_306 : f32 to vector<32x1xf32>
    %497 = arith.addf %493, %496 : vector<32x1xf32>
    %498 = math.rsqrt %497 : vector<32x1xf32>
    %499 = vector.broadcast %498 : vector<32x1xf32> to vector<32x64xf32>
    %500 = arith.mulf %495, %499 : vector<32x64xf32>
    %501 = vector.broadcast %480 : vector<1x64xf32> to vector<32x64xf32>
    %502 = arith.mulf %500, %501 : vector<32x64xf32>
    %503 = vector.broadcast %482 : vector<1x64xf32> to vector<32x64xf32>
    %504 = arith.addf %502, %503 : vector<32x64xf32>
    %c1_307 = arith.constant 1 : index
    %c0_308 = arith.constant 0 : index
    %c0_309 = arith.constant 0 : index
    %505 = vector.load %arg11[%c1_307, %c0_308, %c0_309] : memref<2x64x128xf32, #tpu.memory_space<vmem>>, vector<1x64x128xf32>
    %506 = vector.shape_cast %505 : vector<1x64x128xf32> to vector<64x128xf32>
    %cst_310 = arith.constant dense<0.000000e+00> : vector<32x128xf32>
    %507 = tpu.matmul %504, %506, %cst_310 {dimension_numbers = #tpu.dot_dimension_numbers<[1], [0], [0], [1], [0, 0, 1, 1], [], []>} : vector<32x64xf32>, vector<64x128xf32>, vector<32x128xf32> -> vector<32x128xf32>
    %c1_311 = arith.constant 1 : index
    %c8_312 = arith.constant 8 : index
    %c0_313 = arith.constant 0 : index
    %508 = vector.load %arg14[%c1_311, %c8_312, %c0_313] : memref<2x16x128xf32, #tpu.memory_space<vmem>>, vector<1x1x128xf32>
    %509 = vector.shape_cast %508 : vector<1x1x128xf32> to vector<1x128xf32>
    %510 = vector.broadcast %509 : vector<1x128xf32> to vector<32x128xf32>
    %511 = arith.addf %507, %510 : vector<32x128xf32>
    %512 = arith.mulf %511, %511 : vector<32x128xf32>
    %513 = arith.mulf %511, %512 : vector<32x128xf32>
    %cst_314 = arith.constant 4.471500e-02 : f32
    %514 = vector.broadcast %cst_314 : f32 to vector<32x128xf32>
    %515 = arith.mulf %514, %513 : vector<32x128xf32>
    %516 = arith.addf %511, %515 : vector<32x128xf32>
    %cst_315 = arith.constant 0.797884583 : f32
    %517 = vector.broadcast %cst_315 : f32 to vector<32x128xf32>
    %518 = arith.mulf %517, %516 : vector<32x128xf32>
    %519 = math.tanh %518 : vector<32x128xf32>
    %cst_316 = arith.constant 1.000000e+00 : f32
    %520 = vector.broadcast %cst_316 : f32 to vector<32x128xf32>
    %521 = arith.addf %520, %519 : vector<32x128xf32>
    %cst_317 = arith.constant 5.000000e-01 : f32
    %522 = vector.broadcast %cst_317 : f32 to vector<32x128xf32>
    %523 = arith.mulf %522, %521 : vector<32x128xf32>
    %524 = arith.mulf %511, %523 : vector<32x128xf32>
    %c1_318 = arith.constant 1 : index
    %c0_319 = arith.constant 0 : index
    %c0_320 = arith.constant 0 : index
    %525 = vector.load %arg12[%c1_318, %c0_319, %c0_320] : memref<2x128x64xf32, #tpu.memory_space<vmem>>, vector<1x128x64xf32>
    %526 = vector.shape_cast %525 : vector<1x128x64xf32> to vector<128x64xf32>
    %cst_321 = arith.constant dense<0.000000e+00> : vector<32x64xf32>
    %527 = tpu.matmul %524, %526, %cst_321 {dimension_numbers = #tpu.dot_dimension_numbers<[1], [0], [0], [1], [0, 0, 1, 1], [], []>} : vector<32x128xf32>, vector<128x64xf32>, vector<32x64xf32> -> vector<32x64xf32>
    %528 = arith.addf %478, %527 : vector<32x64xf32>
    %c1_322 = arith.constant 1 : index
    %c7_323 = arith.constant 7 : index
    %c0_324 = arith.constant 0 : index
    %529 = vector.load %arg14[%c1_322, %c7_323, %c0_324] : memref<2x16x128xf32, #tpu.memory_space<vmem>>, vector<1x1x64xf32>
    %530 = vector.shape_cast %529 : vector<1x1x64xf32> to vector<1x64xf32>
    %531 = vector.broadcast %530 : vector<1x64xf32> to vector<32x64xf32>
    %532 = arith.addf %528, %531 : vector<32x64xf32>
    %c0_325 = arith.constant 0 : index
    %c0_326 = arith.constant 0 : index
    %533 = vector.load %arg7[%c0_325, %c0_326] : memref<4x32xf32, #tpu.memory_space<vmem>>, vector<4x32xf32>
    %cst_327 = arith.constant dense<0.000000e+00> : vector<4x64xf32>
    %534 = tpu.matmul %533, %532, %cst_327 {dimension_numbers = #tpu.dot_dimension_numbers<[1], [0], [0], [1], [0, 0, 1, 1], [], []>} : vector<4x32xf32>, vector<32x64xf32>, vector<4x64xf32> -> vector<4x64xf32>
    %c1_328 = arith.constant 1 : index
    %c4_329 = arith.constant 4 : index
    %c0_330 = arith.constant 0 : index
    %535 = vector.load %arg14[%c1_328, %c4_329, %c0_330] : memref<2x16x128xf32, #tpu.memory_space<vmem>>, vector<1x1x64xf32>
    %536 = vector.shape_cast %535 : vector<1x1x64xf32> to vector<1x64xf32>
    %c1_331 = arith.constant 1 : index
    %c5_332 = arith.constant 5 : index
    %c0_333 = arith.constant 0 : index
    %537 = vector.load %arg14[%c1_331, %c5_332, %c0_333] : memref<2x16x128xf32, #tpu.memory_space<vmem>>, vector<1x1x64xf32>
    %538 = vector.shape_cast %537 : vector<1x1x64xf32> to vector<1x64xf32>
    %cst_334 = arith.constant dense<0.000000e+00> : vector<4xf32>
    %539 = vector.multi_reduction <add>, %534, %cst_334 [1] : vector<4x64xf32> to vector<4xf32>
    %540 = vector.shape_cast %539 : vector<4xf32> to vector<4x1xf32>
    %cst_335 = arith.constant 6.400000e+01 : f32
    %541 = vector.broadcast %cst_335 : f32 to vector<4x1xf32>
    %542 = arith.divf %540, %541 : vector<4x1xf32>
    %543 = vector.broadcast %542 : vector<4x1xf32> to vector<4x64xf32>
    %544 = arith.subf %534, %543 : vector<4x64xf32>
    %545 = arith.mulf %544, %544 : vector<4x64xf32>
    %cst_336 = arith.constant dense<0.000000e+00> : vector<4xf32>
    %546 = vector.multi_reduction <add>, %545, %cst_336 [1] : vector<4x64xf32> to vector<4xf32>
    %547 = vector.shape_cast %546 : vector<4xf32> to vector<4x1xf32>
    %cst_337 = arith.constant 6.400000e+01 : f32
    %548 = vector.broadcast %cst_337 : f32 to vector<4x1xf32>
    %549 = arith.divf %547, %548 : vector<4x1xf32>
    %550 = vector.broadcast %542 : vector<4x1xf32> to vector<4x64xf32>
    %551 = arith.subf %534, %550 : vector<4x64xf32>
    %cst_338 = arith.constant 9.99999974E-6 : f32
    %552 = vector.broadcast %cst_338 : f32 to vector<4x1xf32>
    %553 = arith.addf %549, %552 : vector<4x1xf32>
    %554 = math.rsqrt %553 : vector<4x1xf32>
    %555 = vector.broadcast %554 : vector<4x1xf32> to vector<4x64xf32>
    %556 = arith.mulf %551, %555 : vector<4x64xf32>
    %557 = vector.broadcast %536 : vector<1x64xf32> to vector<4x64xf32>
    %558 = arith.mulf %556, %557 : vector<4x64xf32>
    %559 = vector.broadcast %538 : vector<1x64xf32> to vector<4x64xf32>
    %560 = arith.addf %558, %559 : vector<4x64xf32>
    %c1_339 = arith.constant 1 : index
    %c0_340 = arith.constant 0 : index
    %c0_341 = arith.constant 0 : index
    %561 = vector.load %arg13[%c1_339, %c0_340, %c0_341] : memref<2x64x32xf32, #tpu.memory_space<vmem>>, vector<1x64x32xf32>
    %562 = vector.shape_cast %561 : vector<1x64x32xf32> to vector<64x32xf32>
    %cst_342 = arith.constant dense<0.000000e+00> : vector<4x32xf32>
    %563 = tpu.matmul %560, %562, %cst_342 {dimension_numbers = #tpu.dot_dimension_numbers<[1], [0], [0], [1], [0, 0, 1, 1], [], []>} : vector<4x64xf32>, vector<64x32xf32>, vector<4x32xf32> -> vector<4x32xf32>
    %564 = arith.mulf %563, %563 : vector<4x32xf32>
    %cst_343 = arith.constant dense<0.000000e+00> : vector<4xf32>
    %565 = vector.multi_reduction <add>, %564, %cst_343 [1] : vector<4x32xf32> to vector<4xf32>
    %566 = vector.shape_cast %565 : vector<4xf32> to vector<4x1xf32>
    %567 = math.rsqrt %566 : vector<4x1xf32>
    %568 = vector.broadcast %567 : vector<4x1xf32> to vector<4x32xf32>
    %569 = arith.mulf %563, %568 : vector<4x32xf32>
    %cst_344 = arith.constant dense<0.000000e+00> : vector<2x4xf32>
    %570 = tpu.matmul %286, %569, %cst_344 {dimension_numbers = #tpu.dot_dimension_numbers<[1], [1], [0], [0], [0, 0, 1, 0], [], []>} : vector<2x32xf32>, vector<4x32xf32>, vector<2x4xf32> -> vector<2x4xf32>
    %c0_345 = arith.constant 0 : index
    %c0_346 = arith.constant 0 : index
    %571 = memref.load %arg0[%c0_345, %c0_346] : memref<1x1xf32, #tpu.memory_space<smem>>
    %572 = vector.broadcast %571 : f32 to vector<2x4xf32>
    %573 = arith.mulf %572, %570 : vector<2x4xf32>
    %c0_347 = arith.constant 0 : index
    %c0_348 = arith.constant 0 : index
    %574 = vector.load %arg15[%c0_347, %c0_348] : memref<2x4xf32, #tpu.memory_space<vmem>>, vector<2x4xf32>
    tpu.vector_store %arg15[%c0_347, %c0_348], %573 {strides = array<i32>} : memref<2x4xf32, #tpu.memory_space<vmem>>, vector<2x4xf32>,
    return
  }
}

</mosaic_0001>

<bundles_post_ra>
// kernel: tpu_custom_call.1
= control target key start
LH: loop header
LB: loop body
LE: loop exit
PB: predicated region body
PF: predicated region fallthrough
CT: control target
= control target key end

     0   :  { %21 = vsyncpa [#allocation4], 0  ;;  %s11549_s0 = inlined_call_operand.<no memory space> [shape: f32[1,1], index: 0, kind: input, shape index: {}]   ;;  %s11550_s1 = inlined_call_operand.vmem [shape: f32[34,48], index: 1, kind: input, shape index: {}]   ;;  %s11551_s2 = inlined_call_operand.vmem [shape: f32[32,64], index: 2, kind: input, shape index: {}]   ;;  %s11552_s3 = inlined_call_operand.hbm [shape: f32[34,64], index: 3, kind: input, shape index: {}]   ;;  %s11553_s4 = inlined_call_operand.hbm [shape: f32[34,34], index: 4, kind: input, shape index: {}]   ;;  %s11554_s5 = inlined_call_operand.hbm [shape: f32[32,32], index: 5, kind: input, shape index: {}]   ;;  %s11555_s6 = inlined_call_operand.hbm [shape: f32[2,34], index: 6, kind: input, shape index: {}]   ;;  %s11556_s7 = inlined_call_operand.hbm [shape: f32[4,32], index: 7, kind: input, shape index: {}]   ;;  %s11557_s8 = inlined_call_operand.vmem [shape: f32[48,64], index: 8, kind: input, shape index: {}]   ;;  %s11558_s9 = inlined_call_operand.vmem [shape: f32[32,16,64], index: 9, kind: input, shape index: {}]   ;;  %s11559_s10 = inlined_call_operand.vmem [shape: f32[24,1,16], index: 10, kind: input, shape index: {}]   ;;  %s11560_s11 = inlined_call_operand.hbm [shape: f32[2,64,128], index: 11, kind: input, shape index: {}]   ;;  %s11561_s12 = inlined_call_operand.vmem [shape: f32[2,128,64], index: 12, kind: input, shape index: {}]   ;;  %s11562_s13 = inlined_call_operand.vmem [shape: f32[2,64,32], index: 13, kind: input, shape index: {}]   ;;  %s11563_s14 = inlined_call_operand.hbm [shape: f32[2,16,128], index: 14, kind: input, shape index: {}]   ;;  %s11564_s15 = inlined_call_operand.hbm [shape: f32[2,4], index: 15, kind: output, shape index: {}]  }
   0x1   :  { %22 = vsyncpa [#allocation7], 0 }
   0x2   :  { %23 = vsyncpa [#allocation10], 0 }
   0x3   :  { %24 = vsyncpa [#allocation13], 0 }
   0x4   :  { %25 = vsyncpa [#allocation5], 0  ;;  %s9577_s18 = smov [#allocation6]   ;;  %s9578_s20 = smov [#allocation9]  }
   0x5   :  { %s49_s19 = sshll.u32 %s9577_s18, 4  ;;  %s74_s21 = sshll.u32 %s9578_s20, 4  ;;  %s50_s19 = int_to_ptr.vmem [resolvable:$true] %s49_s19  ;;  %s75_s21 = int_to_ptr.vmem [resolvable:$true] %s74_s21 }
   0x6   :  { %s9415_s22 = scalar_lea.vmem %s50_s19, 640  ;;  %p9420_p1 = scmp.lt.s32.totalorder %s50_s19, %s50_s19 }
   0x7   :  { %p9416_p0 = scmp.ne.s32.totalorder %s50_s19, %s9415_s22  ;;  %p9421_p2 = scmp.lt.s32.totalorder %s9415_s22, %s9415_s22 }
   0x9   :  { %p9422_p3 = por %p9421_p2, %p9420_p1 }
   0xb   :  { %p9423_p4 = pnand %p9422_p3, %p9416_p0 }
   0xd   :  { %9426 = shalt.err (!%p9423_p4)
}
   0xe   :  { %s9579_s23 = smov 128   ;;  %s9580_s24 = smov 8  }
   0xf   :  { %55 = dma.hbm_to_vmem [thread:$0]  %s11553_s4, 640, %s50_s19, [#allocation7], %s9579_s23, %s9579_s23, %s9580_s24  }
  0x10   :  { %s9435_s27 = scalar_lea.vmem %s75_s21, 32  ;;  %p9440_p6 = scmp.lt.s32.totalorder %s75_s21, %s75_s21 }
  0x11   :  { %p9436_p5 = scmp.ne.s32.totalorder %s75_s21, %s9435_s27  ;;  %p9441_p7 = scmp.lt.s32.totalorder %s9435_s27, %s9435_s27 }
  0x13   :  { %p9442_p8 = por %p9441_p7, %p9440_p6 }
  0x15   :  { %p9443_p9 = pnand %p9442_p8, %p9436_p5 }
  0x17   :  { %9446 = shalt.err (!%p9443_p9)
}
  0x18   :  { %77 = dma.hbm_to_vmem [thread:$0]  %s11555_s6, 32, %s75_s21, [#allocation10]  }
  0x19   :  { %s9581_s30 = smov [#allocation12]   ;;  %s9582_s17 = smov [#allocation3]  }
  0x1a   :  { %s99_s16 = sshll.u32 %s9581_s30, 4  ;;  %s37_s18 = sshll.u32 %s9582_s17, 4  ;;  %s100_s16 = int_to_ptr.vmem [resolvable:$true] %s99_s16  ;;  %s38_s18 = int_to_ptr.vmem [resolvable:$true] %s37_s18 }
  0x1b   :  { %s9455_s20 = scalar_lea.vmem %s100_s16, 2048  ;;  %p9460_p11 = scmp.lt.s32.totalorder %s100_s16, %s100_s16 }
  0x1c   :  { %p9456_p10 = scmp.ne.s32.totalorder %s100_s16, %s9455_s20  ;;  %p9461_p12 = scmp.lt.s32.totalorder %s9455_s20, %s9455_s20 }
  0x1e   :  { %p9462_p13 = por %p9461_p12, %p9460_p11 }
  0x20   :  { %p9463_p0 = pnand %p9462_p13, %p9456_p10 }
  0x22   :  { %9466 = shalt.err (!%p9463_p0)
}
  0x23   :  { %105 = dma.hbm_to_vmem [thread:$0]  %s11560_s11, 2048, %s100_s16, [#allocation13], %s9579_s23, %s9579_s23, %s9580_s24  }
  0x24   :  { %s9475_s6 = scalar_lea.vmem %s38_s18, 640  ;;  %p9480_p2 = scmp.lt.s32.totalorder %s38_s18, %s38_s18 }
  0x25   :  { %p9476_p1 = scmp.ne.s32.totalorder %s38_s18, %s9475_s6  ;;  %p9481_p3 = scmp.lt.s32.totalorder %s9475_s6, %s9475_s6 }
  0x27   :  { %p9482_p4 = por %p9481_p3, %p9480_p2 }
  0x29   :  { %p9483_p5 = pnand %p9482_p4, %p9476_p1 }
  0x2b   :  { %9486 = shalt.err (!%p9483_p5)
}
  0x2c   :  { %43 = dma.hbm_to_vmem [thread:$0]  %s11552_s3, 640, %s38_s18, [#allocation4], %s9579_s23, %s9579_s23, %s9580_s24  }
  0x2d   :  { %s9583_s25 = smov [#allocation8]   ;;  %s9584_s27 = smov [#allocation11]  }
  0x2e   :  { %s61_s26 = sshll.u32 %s9583_s25, 4  ;;  %s84_s28 = sshll.u32 %s9584_s27, 4  ;;  %s62_s26 = int_to_ptr.vmem [resolvable:$true] %s61_s26  ;;  %s85_s28 = int_to_ptr.vmem [resolvable:$true] %s84_s28 }
  0x2f   :  { %s9495_s11 = scalar_lea.vmem %s62_s26, 512  ;;  %p9500_p7 = scmp.lt.s32.totalorder %s62_s26, %s62_s26 }
  0x30   :  { %p9496_p6 = scmp.ne.s32.totalorder %s62_s26, %s9495_s11  ;;  %p9501_p8 = scmp.lt.s32.totalorder %s9495_s11, %s9495_s11 }
  0x32   :  { %p9502_p9 = por %p9501_p8, %p9500_p7 }
  0x34   :  { %p9503_p10 = pnand %p9502_p9, %p9496_p6 }
  0x36   :  { %9506 = shalt.err (!%p9503_p10)
}
  0x37   :  { %67 = dma.hbm_to_vmem [thread:$0]  %s11554_s5, 512, %s62_s26, [#allocation7], %s9579_s23, %s9579_s23, %s9580_s24  }
  0x38   :  { %s9515_s3 = scalar_lea.vmem %s85_s28, 64  ;;  %p9520_p12 = scmp.lt.s32.totalorder %s85_s28, %s85_s28 }
  0x39   :  { %p9516_p11 = scmp.ne.s32.totalorder %s85_s28, %s9515_s3  ;;  %p9521_p13 = scmp.lt.s32.totalorder %s9515_s3, %s9515_s3 }
  0x3b   :  { %p9522_p0 = por %p9521_p13, %p9520_p12 }
  0x3d   :  { %p9523_p1 = pnand %p9522_p0, %p9516_p11 }
  0x3f   :  { %9526 = shalt.err (!%p9523_p1)
}
  0x40   :  { %87 = dma.hbm_to_vmem [thread:$0]  %s11556_s7, 64, %s85_s28, [#allocation10]  }
  0x41   :  { %s9585_s18 = smov [#allocation14]  }
  0x42   :  { %s115_s20 = sshll.u32 %s9585_s18, 4  ;;  %s116_s20 = int_to_ptr.vmem [resolvable:$true] %s115_s20 }
  0x43   :  { %s9535_s4 = scalar_lea.vmem %s116_s20, 512  ;;  %p9540_p3 = scmp.lt.s32.totalorder %s116_s20, %s116_s20 }
  0x44   :  { %p9536_p2 = scmp.ne.s32.totalorder %s116_s20, %s9535_s4  ;;  %p9541_p4 = scmp.lt.s32.totalorder %s9535_s4, %s9535_s4 }
  0x46   :  { %p9542_p5 = por %p9541_p4, %p9540_p3 }
  0x48   :  { %p9543_p6 = pnand %p9542_p5, %p9536_p2 }
  0x4a   :  { %9546 = shalt.err (!%p9543_p6)
}
  0x4b   :  { %121 = dma.hbm_to_vmem [thread:$0]  %s11563_s14, 512, %s116_s20, [#allocation13], %s9579_s23, %s9579_s23, %s9580_s24  }
  0x4c   :  { %9567 = dma.done.wait [#allocation4], 640  }
  0x4d   :  { %9568 = vsyncadd [#allocation4], 4294966656 }
  0x4e   :  { %9569 = dma.done.wait [#allocation7], 1152  }
  0x4f   :  { %9570 = vsyncadd [#allocation7], 4294966144 }
  0x50   :  { %9571 = dma.done.wait [#allocation10], 96  }
  0x51   :  { %9572 = vsyncadd [#allocation10], 4294967200 }
  0x52   :  { %9573 = dma.done.wait [#allocation13], 2560  }
  0x53   :  { %9574 = vsyncadd [#allocation13], 4294964736  ;;  %v9586_v0 = vmov 0.0   ;;  %vm9587_vm0 = vmmov 0   ;;  %v153_v1 = vld [vmem:[%s11557_s8 + $0x28] sm:$0xff]  ;;  %v152_v2 = vld [vmem:[%s11557_s8 + $0x20] sm:$0xff] }
  0x54   :  { %8172 = vmatprep.subr.mxu0 %v9586_v0  ;;  %8184 = vmatprep.mubr.msk.f32.mxu0 %vm9587_vm0, %v9586_v0  ;;  %v151_v3 = vld [vmem:[%s11557_s8 + $0x18] sm:$0xff]  ;;  %v150_v4 = vld [vmem:[%s11557_s8 + $0x10] sm:$0xff]  ;;  %v149_v5 = vld [vmem:[%s11557_s8 + $0x8] sm:$0xff]  ;;  %vm159_vm1 = vcmask 392192   ;;  %vm272_vm2 = vcmask 523264   ;;  %vm285_vm3 = vcmask 517120  }
  0x55   :  { %8199 = vmatprep.subr.mxu1 %v9586_v0  ;;  %8203 = vmatprep.mubr.msk.f32.mxu1 %vm9587_vm0, %v9586_v0  ;;  %v148_v6 = vld [vmem:[%s11557_s8] sm:$0xff]  ;;  %v144_v8 = vld [vmem:[%s11550_s1 + $0x8] sm:$0xff]  ;;  %v145_v9 = vld [vmem:[%s11550_s1 + $0x10] sm:$0xff]  ;;  %vm895_vm4 = vcmask 1041408   ;;  %vm692_vm5 = vcmask 130048   ;;  %vm823_vm6 = vcmask 277504  }
  0x56   :  { %8173 = vmatpush3.msra.mxu0 %v153_v1  ;;  %v143_v7 = vld [vmem:[%s11550_s1] sm:$0xff]  ;;  %v146_v10 = vld [vmem:[%s11550_s1 + $0x18] sm:$0xff]  ;;  %v155_v16 = vld [vmem:[#allocation3 + $0x8] sm:$0xff]  ;;  %vm836_vm7 = vcmask 271360   ;;  %vm4361_vm8 = vcmask 261120   ;;  %vm7024_vm9 = vcmask 519168  }
  0x57   :  { %8174 = vmatprep.subr.mxu0 %v9586_v0  ;;  %v147_v11 = vld [vmem:[%s11550_s1 + $0x20] sm:$0x3]  ;;  %v156_v21 = vld [vmem:[#allocation3 + $0x10] sm:$0xff]  ;;  %v157_v26 = vld [vmem:[#allocation3 + $0x18] sm:$0xff]  ;;  %vm3841_vm10 = vcmask 254976   ;;  %vm7131_vm11 = vcmask 257024  }
  0x58   :  { %8175 = vmatpush3.msra.mxu0 %v152_v2  ;;  %v154_v12 = vld [vmem:[#allocation3] sm:$0xff]  ;;  %v359_v62 = vld [vmem:[%s11558_s9 + $0x8] sm:$0xff]  ;;  %s9588_s3 = smov [#allocation15]   ;;  %vm7216_vm12 = vcmask 25600  }
  0x59   :  { %8176 = vmatprep.subr.mxu0 %v9586_v0  ;;  %v158_v31 = vld [vmem:[#allocation3 + $0x20] sm:$0x3]  ;;  %v7263_v63 = vld [vmem:[%s11558_s9 + $0x88] sm:$0xff]  ;;  %8200 = vmatpush3.xpose.msk.msra.mxu1 %vm272_vm2, %v359_v62  ;;  %s7224_s16 = sshll.u32 %s9588_s3, 4  ;;  %s7225_s16 = int_to_ptr.vmem [resolvable:$true] %s7224_s16 }
  0x5a   :  { %8177 = vmatpush3.msra.mxu0 %v151_v3  ;;  %8201 = vmatprep.subr.mxu1 %v9586_v0  ;;  %v358_v1 = vld [vmem:[%s11558_s9] sm:$0xff]  ;;  %s9547_s8 = scalar_lea.vmem %s7225_s16, 32  ;;  %p9552_p8 = scmp.lt.s32.totalorder %s7225_s16, %s7225_s16 }
  0x5b   :  { %8178 = vmatprep.subr.mxu0 %v9586_v0  ;;  %v7262_v2 = vld [vmem:[%s11558_s9 + $0x80] sm:$0xff]  ;;  %p9548_p7 = scmp.ne.s32.totalorder %s7225_s16, %s9547_s8  ;;  %p9553_p9 = scmp.lt.s32.totalorder %s9547_s8, %s9547_s8 }
  0x5c   :  { %8179 = vmatpush3.msra.mxu0 %v150_v4 }
  0x5d   :  { %8180 = vmatprep.subr.mxu0 %v9586_v0  ;;  %8202 = vmatpush3.xpose.msk.msra.mxu1 %vm272_vm2, %v358_v1  ;;  %p9554_p10 = por %p9553_p9, %p9552_p8 }
  0x5e   :  { %8181 = vmatpush3.msra.mxu0 %v149_v5  ;;  %8218 = vmatprep.subr.mxu1 %v9586_v0 }
  0x5f   :  { %8182 = vmatprep.subr.mxu0 %v9586_v0  ;;  %p9555_p11 = pnand %p9554_p10, %p9548_p7 }
  0x60   :  { %8183 = vmatpush3.msra.mxu0 %v148_v6 }
  0x61   :  { %8185 = vmatmul.mubr.msk.f32.vlgmr.msra.gmra.mxu0 %vm159_vm1, %v143_v7  ;;  %8237 = vmatprep.subr.mxu0 %v9586_v0 }
  0x62   :  { %8187 = vmatprep.mubr.msk.f32.mxu0 %vm9587_vm0, %v9586_v0  ;;  %8238 = vmatpush3.xpose.msk.msra.mxu0 %vm272_vm2, %v7263_v63  ;;  %v7265_v63 = vld [vmem:[%s11559_s10 + $0x8] ss:$0 sm:$0xff] }
  0x63   :  { %8239 = vmatprep.subr.mxu0 %v9586_v0 }
  0x65   :  { %8188 = vmatmul.mubr.msk.f32.gmra.mxu0 %vm159_vm1, %v144_v8 }
  0x66   :  { %8190 = vmatprep.mubr.msk.f32.mxu0 %vm9587_vm0, %v9586_v0  ;;  %8240 = vmatpush3.xpose.msk.msra.mxu0 %vm272_vm2, %v7262_v2 }
  0x67   :  { %8281 = vmatprep.subr.mxu0 %v9586_v0 }
  0x69   :  { %8191 = vmatmul.mubr.msk.f32.gmra.mxu0 %vm159_vm1, %v145_v9 }
  0x6a   :  { %8193 = vmatprep.mubr.msk.f32.mxu0 %vm9587_vm0, %v9586_v0 }
  0x6d   :  { %8194 = vmatmul.mubr.msk.f32.gmra.mxu0 %vm159_vm1, %v146_v10 }
  0x6e   :  { %8196 = vmatprep.mubr.msk.f32.mxu0 %vm9587_vm0, %v9586_v0 }
  0x71   :  { %8197 = vmatmul.mubr.msk.f32.gmra.mxu0 %vm159_vm1, %v147_v11 }
  0x72   :  { %8241 = vmatprep.mubr.msk.f32.mxu0 %vm9587_vm0, %v9586_v0 }
 0x121   :  { %v241_v13 = vpop.f32.mrf.mxu0 }
 0x122   :  { %v9765_v14 = vadd.f32 %v241_v13, %v154_v12 }
 0x123   :  { %v8186_v15 = vpop.f32.mrf.mxu0 }
 0x124   :  { %v273_v17 = vsel %vm272_vm2, %v9765_v14, 0.0 }
 0x125   :  { %274 = vadd.xlane.f32.xlu0 %v273_v17  ;;  %v246_v18 = vpop.f32.mrf.mxu0 }
 0x126   :  { %v9769_v19 = vadd.f32 %v246_v18, %v155_v16 }
 0x127   :  { %v8189_v20 = vpop.f32.mrf.mxu0 }
 0x128   :  { %v276_v22 = vsel %vm272_vm2, %v9769_v19, 0.0  ;;  %v7241_v20 = vld [vmem:[#allocation14] ss:$0 sm:$0xff] }
 0x129   :  { %277 = vadd.xlane.f32.xlu0 %v276_v22  ;;  %v251_v23 = vpop.f32.mrf.mxu0 }
 0x12a   :  { %v9773_v24 = vadd.f32 %v251_v23, %v156_v21  ;;  %v7242_v23 = vld [vmem:[#allocation14 + $0x1] ss:$0 sm:$0xff] }
 0x12b   :  { %v8192_v25 = vpop.f32.mrf.mxu0 }
 0x12c   :  { %v279_v27 = vsel %vm272_vm2, %v9773_v24, 0.0 }
 0x12d   :  { %280 = vadd.xlane.f32.xlu1 %v279_v27  ;;  %v256_v28 = vpop.f32.mrf.mxu0 }
 0x12e   :  { %v9777_v29 = vadd.f32 %v256_v28, %v157_v26 }
 0x12f   :  { %v8195_v30 = vpop.f32.mrf.mxu0 }
 0x130   :  { %v282_v32 = vsel %vm272_vm2, %v9777_v29, 0.0  ;;  %v7252_v30 = vld [vmem:[%s11558_s9 + $0x48] sm:$0xff] }
 0x131   :  { %283 = vadd.xlane.f32.xlu1 %v282_v32  ;;  %v261_v33 = vpop.f32.mrf.mxu0 }
 0x132   :  { %v9781_v34 = vadd.f32 %v261_v33, %v158_v31 }
 0x133   :  { %v8198_v35 = vpop.f32.mrf.mxu0 }
 0x134   :  { %v286_v36 = vsel %vm285_vm3, %v9781_v34, 0.0 }
 0x135   :  { %287 = vadd.xlane.f32.xlu0 %v286_v36  ;;  %v7251_v36 = vld [vmem:[%s11558_s9 + $0x40] sm:$0xff] }
 0x1ae   :  { %v275_v37 = vpop.xlane.xlu0 %274 }
 0x1af   :  { %v290_v38 = vmul.f32 0.015625, %v275_v37 }
 0x1b1   :  { %v295_v39 = vsub.f32 %v9765_v14, %v290_v38 }
 0x1b2   :  { %v278_v40 = vpop.xlane.xlu0 %277 }
 0x1b3   :  { %v291_v41 = vmul.f32 0.015625, %v278_v40  ;;  %v300_v42 = vmul.f32 %v295_v39, %v295_v39 }
 0x1b5   :  { %v9787_v43 = vsub.f32 %v9769_v19, %v291_v41  ;;  %v305_v44 = vsel %vm272_vm2, %v300_v42, 0.0 }
 0x1b6   :  { %v281_v45 = vpop.xlane.xlu1 %280  ;;  %306 = vadd.xlane.f32.xlu1 %v305_v44 }
 0x1b7   :  { %v292_v46 = vmul.f32 0.015625, %v281_v45  ;;  %v301_v47 = vmul.f32 %v9787_v43, %v9787_v43 }
 0x1b9   :  { %v9793_v48 = vsub.f32 %v9773_v24, %v292_v46  ;;  %v308_v49 = vsel %vm272_vm2, %v301_v47, 0.0 }
 0x1ba   :  { %v284_v50 = vpop.xlane.xlu1 %283  ;;  %309 = vadd.xlane.f32.xlu0 %v308_v49 }
 0x1bb   :  { %v293_v51 = vmul.f32 0.015625, %v284_v50  ;;  %v302_v52 = vmul.f32 %v9793_v48, %v9793_v48 }
 0x1bd   :  { %v9799_v53 = vsub.f32 %v9777_v29, %v293_v51  ;;  %v311_v54 = vsel %vm272_vm2, %v302_v52, 0.0 }
 0x1be   :  { %312 = vadd.xlane.f32.xlu1 %v311_v54  ;;  %v288_v55 = vpop.xlane.xlu0 %287 }
 0x1bf   :  { %v294_v56 = vmul.f32 0.015625, %v288_v55  ;;  %v303_v57 = vmul.f32 %v9799_v53, %v9799_v53 }
 0x1c1   :  { %v9805_v58 = vsub.f32 %v9781_v34, %v294_v56  ;;  %v314_v59 = vsel %vm272_vm2, %v303_v57, 0.0 }
 0x1c2   :  { %315 = vadd.xlane.f32.xlu0 %v314_v59 }
 0x1c3   :  { %v304_v60 = vmul.f32 %v9805_v58, %v9805_v58 }
 0x1c5   :  { %v317_v61 = vsel %vm285_vm3, %v304_v60, 0.0 }
 0x1c6   :  { %318 = vadd.xlane.f32.xlu1 %v317_v61 }
 0x23f   :  { %v307_v3 = vpop.xlane.xlu1 %306 }
 0x240   :  { %v320_v4 = vmul.f32 0.015625, %v307_v3 }
 0x242   :  { %v325_v5 = vadd.f32 1e-05, %v320_v4 }
 0x243   :  { %v310_v6 = vpop.xlane.xlu0 %309 }
 0x244   :  { %9192 = vrsqrt.f32 %v325_v5  ;;  %v321_v7 = vmul.f32 0.015625, %v310_v6 }
 0x246   :  { %v326_v8 = vadd.f32 1e-05, %v321_v7 }
 0x247   :  { %v313_v9 = vpop.xlane.xlu1 %312 }
 0x248   :  { %9194 = vrsqrt.f32 %v326_v8  ;;  %v322_v10 = vmul.f32 0.015625, %v313_v9 }
 0x24a   :  { %v327_v11 = vadd.f32 1e-05, %v322_v10 }
 0x24b   :  { %v316_v12 = vpop.xlane.xlu0 %315 }
 0x24c   :  { %9196 = vrsqrt.f32 %v327_v11  ;;  %v323_v13 = vmul.f32 0.015625, %v316_v12 }
 0x24e   :  { %v328_v15 = vadd.f32 1e-05, %v323_v13 }
 0x24f   :  { %v319_v16 = vpop.xlane.xlu1 %318 }
 0x250   :  { %9198 = vrsqrt.f32 %v328_v15  ;;  %v324_v17 = vmul.f32 0.015625, %v319_v16 }
 0x251   :  { %v9193_v18 = vpop.eup %9192 }
 0x252   :  { %v335_v21 = vmul.f32 %v9193_v18, %v295_v39  ;;  %v329_v22 = vadd.f32 1e-05, %v324_v17 }
 0x254   :  { %v344_v25 = vmul.f32 %v7241_v20, %v335_v21  ;;  %9200 = vrsqrt.f32 %v329_v22 }
 0x255   :  { %v9195_v26 = vpop.eup %9194 }
 0x256   :  { %v9831_v27 = vadd.f32 %v7242_v23, %v344_v25  ;;  %v336_v28 = vmul.f32 %v9195_v26, %v9787_v43 }
 0x258   :  { %v345_v31 = vmul.f32 %v7241_v20, %v336_v28  ;;  %8204 = vmatmul.mubr.msk.f32.vlgmr.msra.gmra.mxu1 %vm272_vm2, %v9831_v27  ;;  %8242 = vmatmul.mubr.msk.f32.vlgmr.msra.gmra.mxu0 %vm272_vm2, %v9831_v27 }
 0x259   :  { %v9197_v32 = vpop.eup %9196  ;;  %8206 = vmatprep.mubr.msk.f32.mxu1 %vm9587_vm0, %v9586_v0  ;;  %8244 = vmatprep.mubr.msk.f32.mxu0 %vm9587_vm0, %v9586_v0 }
 0x25a   :  { %v9845_v33 = vadd.f32 %v7242_v23, %v345_v31  ;;  %v337_v35 = vmul.f32 %v9197_v32, %v9793_v48  ;;  %8219 = vmatpush3.xpose.msk.msra.mxu1 %vm272_vm2, %v7252_v30  ;;  %v7243_v30 = vld [vmem:[%s11559_s10] ss:$0 sm:$0xff] }
 0x25b   :  { %8220 = vmatprep.subr.mxu1 %v9586_v0 }
 0x25c   :  { %v346_v37 = vmul.f32 %v7241_v20, %v337_v35  ;;  %8207 = vmatmul.mubr.msk.f32.gmra.mxu1 %vm272_vm2, %v9845_v33  ;;  %8245 = vmatmul.mubr.msk.f32.gmra.mxu0 %vm272_vm2, %v9845_v33  ;;  %v7292_v35 = vld [vmem:[%s11558_s9 + $0x18] sm:$0xff] }
 0x25d   :  { %v9199_v38 = vpop.eup %9198  ;;  %8209 = vmatprep.mubr.msk.f32.mxu1 %vm9587_vm0, %v9586_v0  ;;  %8247 = vmatprep.mubr.msk.f32.mxu0 %vm9587_vm0, %v9586_v0 }
 0x25e   :  { %v9861_v39 = vadd.f32 %v7242_v23, %v346_v37  ;;  %v338_v40 = vmul.f32 %v9199_v38, %v9799_v53  ;;  %8221 = vmatpush3.xpose.msk.msra.mxu1 %vm272_vm2, %v7251_v36  ;;  %v7291_v37 = vld [vmem:[%s11558_s9 + $0x10] sm:$0xff] }
 0x25f   :  { %8256 = vmatprep.subr.mxu1 %v9586_v0 }
 0x260   :  { %v347_v41 = vmul.f32 %v7241_v20, %v338_v40  ;;  %8210 = vmatmul.mubr.msk.f32.gmra.mxu1 %vm272_vm2, %v9861_v39  ;;  %8248 = vmatmul.mubr.msk.f32.gmra.mxu0 %vm272_vm2, %v9861_v39 }
 0x261   :  { %v9201_v42 = vpop.eup %9200  ;;  %8212 = vmatprep.mubr.msk.f32.mxu1 %vm9587_vm0, %v9586_v0  ;;  %8250 = vmatprep.mubr.msk.f32.mxu0 %vm9587_vm0, %v9586_v0 }
 0x262   :  { %v9874_v43 = vadd.f32 %v7242_v23, %v347_v41  ;;  %v339_v44 = vmul.f32 %v9201_v42, %v9805_v58  ;;  %v7314_v42 = vld [vmem:[%s11558_s9 + $0x98] sm:$0xff] }
 0x264   :  { %v348_v45 = vmul.f32 %v7241_v20, %v339_v44  ;;  %8213 = vmatmul.mubr.msk.f32.gmra.mxu1 %vm272_vm2, %v9874_v43  ;;  %8251 = vmatmul.mubr.msk.f32.gmra.mxu0 %vm272_vm2, %v9874_v43  ;;  %v7254_v20 = vld [vmem:[%s11559_s10 + $0x4] ss:$0 sm:$0xff]  ;;  %v7313_v44 = vld [vmem:[%s11558_s9 + $0x90] sm:$0xff] }
 0x265   :  { %8215 = vmatprep.mubr.msk.f32.mxu1 %vm9587_vm0, %v9586_v0  ;;  %8253 = vmatprep.mubr.msk.f32.mxu0 %vm9587_vm0, %v9586_v0 }
 0x266   :  { %v9885_v46 = vadd.f32 %v7242_v23, %v348_v45 }
 0x268   :  { %8216 = vmatmul.mubr.msk.f32.gmra.mxu1 %vm272_vm2, %v9885_v46  ;;  %8254 = vmatmul.mubr.msk.f32.gmra.mxu0 %vm272_vm2, %v9885_v46 }
 0x269   :  { %8222 = vmatprep.mubr.msk.f32.mxu1 %vm9587_vm0, %v9586_v0  ;;  %8291 = vmatprep.mubr.msk.f32.mxu0 %vm9587_vm0, %v9586_v0 }
 0x26c   :  { %8223 = vmatmul.mubr.msk.f32.vlgmr.msra.gmra.mxu1 %vm272_vm2, %v9831_v27 }
 0x26d   :  { %8225 = vmatprep.mubr.msk.f32.mxu1 %vm9587_vm0, %v9586_v0 }
 0x270   :  { %8226 = vmatmul.mubr.msk.f32.gmra.mxu1 %vm272_vm2, %v9845_v33 }
 0x271   :  { %8228 = vmatprep.mubr.msk.f32.mxu1 %vm9587_vm0, %v9586_v0 }
 0x274   :  { %8229 = vmatmul.mubr.msk.f32.gmra.mxu1 %vm272_vm2, %v9861_v39 }
 0x275   :  { %8231 = vmatprep.mubr.msk.f32.mxu1 %vm9587_vm0, %v9586_v0 }
 0x278   :  { %8232 = vmatmul.mubr.msk.f32.gmra.mxu1 %vm272_vm2, %v9874_v43 }
 0x279   :  { %8234 = vmatprep.mubr.msk.f32.mxu1 %vm9587_vm0, %v9586_v0 }
 0x27c   :  { %8235 = vmatmul.mubr.msk.f32.gmra.mxu1 %vm272_vm2, %v9885_v46 }
 0x27d   :  { %8266 = vmatprep.mubr.msk.f32.mxu1 %vm9587_vm0, %v9586_v0 }
 0x318   :  { %v9915_v47 = vpop.f32.mrf.mxu1  ;;  %v668_v48 = vpop.f32.mrf.mxu0 }
 0x319   :  { %v669_v12 = vadd.f32 %v7265_v63, %v668_v48  ;;  %v455_v32 = vadd.f32 %v7243_v30, %v9915_v47  ;;  %v10030_v47 = vld [vmem:[#allocation6] sm:$0xff] }
 0x31a   :  { %v8205_v49 = vpop.f32.mrf.mxu1  ;;  %v8243_v50 = vpop.f32.mrf.mxu0 }
 0x31c   :  { %v9917_v51 = vpop.f32.mrf.mxu1  ;;  %v673_v52 = vpop.f32.mrf.mxu0 }
 0x31d   :  { %v674_v10 = vadd.f32 %v7265_v63, %v673_v52  ;;  %v460_v36 = vadd.f32 %v7243_v30, %v9917_v51  ;;  %v10035_v52 = vld [vmem:[#allocation6 + $0x8] sm:$0xff] }
 0x31e   :  { %v8208_v53 = vpop.f32.mrf.mxu1  ;;  %v8246_v54 = vpop.f32.mrf.mxu0 }
 0x320   :  { %v9919_v55 = vpop.f32.mrf.mxu1  ;;  %v678_v56 = vpop.f32.mrf.mxu0 }
 0x321   :  { %v679_v8 = vadd.f32 %v7265_v63, %v678_v56  ;;  %v465_v38 = vadd.f32 %v7243_v30, %v9919_v55 }
 0x322   :  { %v8211_v57 = vpop.f32.mrf.mxu1  ;;  %v8249_v58 = vpop.f32.mrf.mxu0 }
 0x323   :  { %v10042_v58 = vld [vmem:[#allocation6 + $0x10] sm:$0xff] }
 0x324   :  { %v9921_v59 = vpop.f32.mrf.mxu1  ;;  %v683_v60 = vpop.f32.mrf.mxu0 }
 0x325   :  { %v684_v6 = vadd.f32 %v7265_v63, %v683_v60  ;;  %v470_v40 = vadd.f32 %v7243_v30, %v9921_v59 }
 0x326   :  { %v8214_v61 = vpop.f32.mrf.mxu1  ;;  %v8252_v62 = vpop.f32.mrf.mxu0 }
 0x328   :  { %v9926_v1 = vpop.f32.mrf.mxu1  ;;  %v688_v2 = vpop.f32.mrf.mxu0 }
 0x329   :  { %v689_v3 = vadd.f32 %v7265_v63, %v688_v2  ;;  %v475_v41 = vadd.f32 %v7243_v30, %v9926_v1  ;;  %v10049_v1 = vld [vmem:[#allocation6 + $0x18] sm:$0xff] }
 0x32a   :  { %v8217_v4 = vpop.f32.mrf.mxu1  ;;  %v8255_v5 = vpop.f32.mrf.mxu0 }
 0x32b   :  { %8282 = vmatpush3.msk.msra.mxu0 %vm895_vm4, %v689_v3 }
 0x32c   :  { %v561_v7 = vpop.f32.mrf.mxu1  ;;  %8283 = vmatprep.subr.mxu0 %v9586_v0 }
 0x32d   :  { %8284 = vmatpush3.msra.mxu0 %v684_v6  ;;  %v562_v31 = vadd.f32 %v7254_v20, %v561_v7  ;;  %v10054_v7 = vld [vmem:[#allocation6 + $0x20] sm:$0x3] }
 0x32e   :  { %v8224_v9 = vpop.f32.mrf.mxu1  ;;  %8285 = vmatprep.subr.mxu0 %v9586_v0 }
 0x32f   :  { %8286 = vmatpush3.msra.mxu0 %v679_v8 }
 0x330   :  { %v566_v11 = vpop.f32.mrf.mxu1  ;;  %8287 = vmatprep.subr.mxu0 %v9586_v0 }
 0x331   :  { %8288 = vmatpush3.msra.mxu0 %v674_v10  ;;  %v567_v28 = vadd.f32 %v7254_v20, %v566_v11 }
 0x332   :  { %v8227_v13 = vpop.f32.mrf.mxu1  ;;  %8289 = vmatprep.subr.mxu0 %v9586_v0 }
 0x333   :  { %8290 = vmatpush3.msra.mxu0 %v669_v12 }
 0x334   :  { %v571_v15 = vpop.f32.mrf.mxu1  ;;  %8325 = vmatprep.subr.mxu0 %v9586_v0 }
 0x335   :  { %v572_v26 = vadd.f32 %v7254_v20, %v571_v15 }
 0x336   :  { %v8230_v16 = vpop.f32.mrf.mxu1 }
 0x338   :  { %v576_v17 = vpop.f32.mrf.mxu1 }
 0x339   :  { %v577_v25 = vadd.f32 %v7254_v20, %v576_v17 }
 0x33a   :  { %v8233_v18 = vpop.f32.mrf.mxu1 }
 0x33c   :  { %v581_v21 = vpop.f32.mrf.mxu1 }
 0x33d   :  { %v582_v22 = vadd.f32 %v7254_v20, %v581_v21 }
 0x33e   :  { %v8236_v23 = vpop.f32.mrf.mxu1 }
 0x33f   :  { %8257 = vmatpush3.xpose.msk.msra.mxu1 %vm692_vm5, %v582_v22 }
 0x340   :  { %8258 = vmatprep.subr.mxu1 %v9586_v0 }
 0x343   :  { %8259 = vmatpush3.xpose.msk.msra.mxu1 %vm692_vm5, %v577_v25 }
 0x344   :  { %8260 = vmatprep.subr.mxu1 %v9586_v0 }
 0x347   :  { %8261 = vmatpush3.xpose.msk.msra.mxu1 %vm692_vm5, %v572_v26 }
 0x348   :  { %8262 = vmatprep.subr.mxu1 %v9586_v0 }
 0x34b   :  { %8263 = vmatpush3.xpose.msk.msra.mxu1 %vm692_vm5, %v567_v28 }
 0x34c   :  { %8264 = vmatprep.subr.mxu1 %v9586_v0 }
 0x34f   :  { %8265 = vmatpush3.xpose.msk.msra.mxu1 %vm692_vm5, %v562_v31 }
 0x350   :  { %8306 = vmatprep.subr.mxu1 %v9586_v0 }
 0x352   :  { %8267 = vmatmul.mubr.msk.f32.vlgmr.msra.gmra.mxu1 %vm692_vm5, %v455_v32 }
 0x353   :  { %8269 = vmatprep.mubr.msk.f32.mxu1 %vm9587_vm0, %v9586_v0  ;;  %8307 = vmatpush3.xpose.msk.msra.mxu1 %vm272_vm2, %v7292_v35 }
 0x354   :  { %8308 = vmatprep.subr.mxu1 %v9586_v0 }
 0x356   :  { %8270 = vmatmul.mubr.msk.f32.gmra.mxu1 %vm692_vm5, %v460_v36 }
 0x357   :  { %8272 = vmatprep.mubr.msk.f32.mxu1 %vm9587_vm0, %v9586_v0  ;;  %8309 = vmatpush3.xpose.msk.msra.mxu1 %vm272_vm2, %v7291_v37 }
 0x358   :  { %8344 = vmatprep.subr.mxu1 %v9586_v0 }
 0x35a   :  { %8273 = vmatmul.mubr.msk.f32.gmra.mxu1 %vm692_vm5, %v465_v38  ;;  %v7316_v38 = vld [vmem:[%s11559_s10 + $0x9] ss:$0 sm:$0xff] }
 0x35b   :  { %8275 = vmatprep.mubr.msk.f32.mxu1 %vm9587_vm0, %v9586_v0 }
 0x35e   :  { %8276 = vmatmul.mubr.msk.f32.gmra.mxu1 %vm692_vm5, %v470_v40 }
 0x35f   :  { %8278 = vmatprep.mubr.msk.f32.mxu1 %vm9587_vm0, %v9586_v0 }
 0x362   :  { %8279 = vmatmul.mubr.msk.f32.gmra.mxu1 %vm692_vm5, %v475_v41 }
 0x363   :  { %8310 = vmatprep.mubr.msk.f32.mxu1 %vm9587_vm0, %v9586_v0 }
 0x366   :  { %8311 = vmatmul.mubr.msk.f32.vlgmr.msra.gmra.mxu1 %vm272_vm2, %v9831_v27 }
 0x367   :  { %8313 = vmatprep.mubr.msk.f32.mxu1 %vm9587_vm0, %v9586_v0  ;;  %8345 = vmatpush3.xpose.msk.msra.mxu1 %vm272_vm2, %v7314_v42 }
 0x368   :  { %8346 = vmatprep.subr.mxu1 %v9586_v0 }
 0x36a   :  { %8314 = vmatmul.mubr.msk.f32.gmra.mxu1 %vm272_vm2, %v9845_v33 }
 0x36b   :  { %8316 = vmatprep.mubr.msk.f32.mxu1 %vm9587_vm0, %v9586_v0  ;;  %8347 = vmatpush3.xpose.msk.msra.mxu1 %vm272_vm2, %v7313_v44 }
 0x36c   :  { %8388 = vmatprep.subr.mxu1 %v9586_v0 }
 0x36e   :  { %8317 = vmatmul.mubr.msk.f32.gmra.mxu1 %vm272_vm2, %v9861_v39 }
 0x36f   :  { %8319 = vmatprep.mubr.msk.f32.mxu1 %vm9587_vm0, %v9586_v0 }
 0x372   :  { %8320 = vmatmul.mubr.msk.f32.gmra.mxu1 %vm272_vm2, %v9874_v43 }
 0x373   :  { %8322 = vmatprep.mubr.msk.f32.mxu1 %vm9587_vm0, %v9586_v0 }
 0x376   :  { %8323 = vmatmul.mubr.msk.f32.gmra.mxu1 %vm272_vm2, %v9885_v46 }
 0x377   :  { %8348 = vmatprep.mubr.msk.f32.mxu1 %vm9587_vm0, %v9586_v0 }
 0x37a   :  { %8349 = vmatmul.mubr.msk.f32.vlgmr.msra.gmra.mxu1 %vm272_vm2, %v9831_v27 }
 0x37b   :  { %8351 = vmatprep.mubr.msk.f32.mxu1 %vm9587_vm0, %v9586_v0 }
 0x37e   :  { %8352 = vmatmul.mubr.msk.f32.gmra.mxu1 %vm272_vm2, %v9845_v33 }
 0x37f   :  { %8354 = vmatprep.mubr.msk.f32.mxu1 %vm9587_vm0, %v9586_v0 }
 0x382   :  { %8355 = vmatmul.mubr.msk.f32.gmra.mxu1 %vm272_vm2, %v9861_v39 }
 0x383   :  { %8357 = vmatprep.mubr.msk.f32.mxu1 %vm9587_vm0, %v9586_v0 }
 0x386   :  { %8358 = vmatmul.mubr.msk.f32.gmra.mxu1 %vm272_vm2, %v9874_v43 }
 0x387   :  { %8360 = vmatprep.mubr.msk.f32.mxu1 %vm9587_vm0, %v9586_v0 }
 0x38a   :  { %8361 = vmatmul.mubr.msk.f32.gmra.mxu1 %vm272_vm2, %v9885_v46 }
 0x38b   :  { %8398 = vmatprep.mubr.msk.f32.mxu1 %vm9587_vm0, %v9586_v0 }
 0x412   :  { %v789_v45 = vpop.f32.mrf.mxu1 }
 0x413   :  { %v813_v48 = vmul.f32 0.25, %v789_v45 }
 0x414   :  { %v8268_v49 = vpop.f32.mrf.mxu1 }
 0x415   :  { %v10033_v50 = vadd.f32 %v813_v48, %v10030_v47 }
 0x416   :  { %v794_v51 = vpop.f32.mrf.mxu1 }
 0x417   :  { %v814_v53 = vmul.f32 0.25, %v794_v51  ;;  %v824_v54 = vsel %vm823_vm6, %v10033_v50, -inf }
 0x418   :  { %825 = vmax.xlane.f32.xlu0 %v824_v54  ;;  %v8271_v55 = vpop.f32.mrf.mxu1 }
 0x419   :  { %v10040_v56 = vadd.f32 %v814_v53, %v10035_v52 }
 0x41a   :  { %v799_v57 = vpop.f32.mrf.mxu1 }
 0x41b   :  { %v815_v59 = vmul.f32 0.25, %v799_v57  ;;  %v827_v60 = vsel %vm823_vm6, %v10040_v56, -inf }
 0x41c   :  { %828 = vmax.xlane.f32.xlu1 %v827_v60  ;;  %v8274_v61 = vpop.f32.mrf.mxu1 }
 0x41d   :  { %v10047_v62 = vadd.f32 %v815_v59, %v10042_v58 }
 0x41e   :  { %v804_v63 = vpop.f32.mrf.mxu1 }
 0x41f   :  { %v816_v2 = vmul.f32 0.25, %v804_v63  ;;  %v830_v3 = vsel %vm823_vm6, %v10047_v62, -inf }
 0x420   :  { %831 = vmax.xlane.f32.xlu0 %v830_v3  ;;  %v8277_v4 = vpop.f32.mrf.mxu1 }
 0x421   :  { %v821_v5 = vadd.f32 %v816_v2, %v10049_v1 }
 0x422   :  { %v809_v6 = vpop.f32.mrf.mxu1 }
 0x423   :  { %v817_v8 = vmul.f32 0.25, %v809_v6  ;;  %v833_v9 = vsel %vm823_vm6, %v821_v5, -inf }
 0x424   :  { %834 = vmax.xlane.f32.xlu1 %v833_v9  ;;  %v8280_v10 = vpop.f32.mrf.mxu1 }
 0x425   :  { %v822_v11 = vadd.f32 %v817_v8, %v10054_v7 }
 0x426   :  { %v10058_v12 = vpop.f32.mrf.mxu1 }
 0x427   :  { %v837_v13 = vsel %vm836_vm7, %v822_v11, -inf }
 0x428   :  { %838 = vmax.xlane.f32.xlu0 %v837_v13  ;;  %v8312_v15 = vpop.f32.mrf.mxu1 }
 0x42a   :  { %v10061_v16 = vpop.f32.mrf.mxu1 }
 0x42c   :  { %v8315_v17 = vpop.f32.mrf.mxu1 }
 0x42e   :  { %v10063_v18 = vpop.f32.mrf.mxu1 }
 0x430   :  { %v8318_v20 = vpop.f32.mrf.mxu1 }
 0x432   :  { %v10065_v21 = vpop.f32.mrf.mxu1 }
 0x434   :  { %v8321_v22 = vpop.f32.mrf.mxu1 }
 0x436   :  { %v10067_v23 = vpop.f32.mrf.mxu1 }
 0x438   :  { %v8324_v25 = vpop.f32.mrf.mxu1 }
 0x43a   :  { %v1289_v26 = vpop.f32.mrf.mxu1 }
 0x43b   :  { %v1290_v49 = vadd.f32 %v7316_v38, %v1289_v26 }
 0x43c   :  { %v8350_v28 = vpop.f32.mrf.mxu1 }
 0x43e   :  { %v1294_v30 = vpop.f32.mrf.mxu1 }
 0x43f   :  { %v1295_v48 = vadd.f32 %v7316_v38, %v1294_v30 }
 0x440   :  { %v8353_v31 = vpop.f32.mrf.mxu1 }
 0x442   :  { %v1299_v32 = vpop.f32.mrf.mxu1 }
 0x443   :  { %v1300_v45 = vadd.f32 %v7316_v38, %v1299_v32  ;;  %v7303_v32 = vld [vmem:[%s11558_s9 + $0x58] sm:$0xff] }
 0x444   :  { %v8356_v35 = vpop.f32.mrf.mxu1 }
 0x446   :  { %v1304_v36 = vpop.f32.mrf.mxu1 }
 0x447   :  { %v1305_v44 = vadd.f32 %v7316_v38, %v1304_v36 }
 0x448   :  { %v8359_v37 = vpop.f32.mrf.mxu1 }
 0x44a   :  { %v1309_v40 = vpop.f32.mrf.mxu1 }
 0x44b   :  { %v1310_v41 = vadd.f32 %v7316_v38, %v1309_v40  ;;  %v7302_v38 = vld [vmem:[%s11558_s9 + $0x50] sm:$0xff] }
 0x44c   :  { %v8362_v42 = vpop.f32.mrf.mxu1 }
 0x44d   :  { %8389 = vmatpush3.msk.msra.mxu1 %vm895_vm4, %v1310_v41 }
 0x44e   :  { %8390 = vmatprep.subr.mxu1 %v9586_v0 }
 0x44f   :  { %8391 = vmatpush3.msra.mxu1 %v1305_v44 }
 0x450   :  { %8392 = vmatprep.subr.mxu1 %v9586_v0 }
 0x451   :  { %8393 = vmatpush3.msra.mxu1 %v1300_v45 }
 0x452   :  { %8394 = vmatprep.subr.mxu1 %v9586_v0 }
 0x453   :  { %8395 = vmatpush3.msra.mxu1 %v1295_v48 }
 0x454   :  { %8396 = vmatprep.subr.mxu1 %v9586_v0 }
 0x455   :  { %8397 = vmatpush3.msra.mxu1 %v1290_v49 }
 0x456   :  { %8432 = vmatprep.subr.mxu1 %v9586_v0 }
 0x4a1   :  { %v826_v51 = vpop.xlane.xlu0 %825 }
 0x4a2   :  { %v840_v53 = vsub.f32 %v10033_v50, %v826_v51 }
 0x4a4   :  { %v845_v54 = vmul.f32 1.442695, %v840_v53 }
 0x4a5   :  { %v829_v55 = vpop.xlane.xlu1 %828 }
 0x4a6   :  { %9202 = vpow2.f32 %v845_v54  ;;  %v841_v57 = vsub.f32 %v10040_v56, %v829_v55 }
 0x4a8   :  { %v847_v59 = vmul.f32 1.442695, %v841_v57 }
 0x4a9   :  { %v832_v60 = vpop.xlane.xlu0 %831 }
 0x4aa   :  { %9204 = vpow2.f32 %v847_v59  ;;  %v842_v61 = vsub.f32 %v10047_v62, %v832_v60 }
 0x4ac   :  { %v849_v63 = vmul.f32 1.442695, %v842_v61 }
 0x4ad   :  { %v835_v2 = vpop.xlane.xlu1 %834 }
 0x4ae   :  { %9206 = vpow2.f32 %v849_v63  ;;  %v843_v3 = vsub.f32 %v821_v5, %v835_v2 }
 0x4b0   :  { %v851_v4 = vmul.f32 1.442695, %v843_v3 }
 0x4b1   :  { %v839_v6 = vpop.xlane.xlu0 %838 }
 0x4b2   :  { %9208 = vpow2.f32 %v851_v4  ;;  %v844_v8 = vsub.f32 %v822_v11, %v839_v6 }
 0x4b3   :  { %v9203_v9 = vpop.eup %9202 }
 0x4b4   :  { %v853_v50 = vmul.f32 1.442695, %v844_v8  ;;  %v855_v10 = vsel %vm823_vm6, %v9203_v9, 0.0 }
 0x4b5   :  { %856 = vadd.xlane.f32.xlu1 %v855_v10 }
 0x4b6   :  { %9210 = vpow2.f32 %v853_v50 }
 0x4b7   :  { %v9205_v56 = vpop.eup %9204 }
 0x4b8   :  { %v858_v13 = vsel %vm823_vm6, %v9205_v56, 0.0 }
 0x4b9   :  { %859 = vadd.xlane.f32.xlu0 %v858_v13 }
 0x4bb   :  { %v9207_v15 = vpop.eup %9206 }
 0x4bc   :  { %v861_v62 = vsel %vm823_vm6, %v9207_v15, 0.0 }
 0x4bd   :  { %862 = vadd.xlane.f32.xlu1 %v861_v62 }
 0x4bf   :  { %v9209_v17 = vpop.eup %9208 }
 0x4c0   :  { %v864_v5 = vsel %vm823_vm6, %v9209_v17, 0.0 }
 0x4c1   :  { %865 = vadd.xlane.f32.xlu0 %v864_v5 }
 0x4c3   :  { %v9211_v20 = vpop.eup %9210 }
 0x4c4   :  { %v867_v11 = vsel %vm836_vm7, %v9211_v20, 0.0 }
 0x4c5   :  { %868 = vadd.xlane.f32.xlu1 %v867_v11  ;;  %v7294_v11 = vld [vmem:[%s11559_s10 + $0x1] ss:$0 sm:$0xff] }
 0x53e   :  { %v857_v22 = vpop.xlane.xlu1 %856 }
 0x53f   :  { %9212 = vrcp.f32 %v857_v22 }
 0x542   :  { %v860_v25 = vpop.xlane.xlu0 %859 }
 0x543   :  { %9214 = vrcp.f32 %v860_v25  ;;  %v1076_v25 = vadd.f32 %v7294_v11, %v10058_v12  ;;  %v1091_v12 = vadd.f32 %v7294_v11, %v10065_v21 }
 0x546   :  { %v863_v26 = vpop.xlane.xlu1 %862 }
 0x547   :  { %9216 = vrcp.f32 %v863_v26  ;;  %v1081_v26 = vadd.f32 %v7294_v11, %v10061_v16  ;;  %v1096_v16 = vadd.f32 %v7294_v11, %v10067_v23 }
 0x54a   :  { %v866_v28 = vpop.xlane.xlu0 %865 }
 0x54b   :  { %9218 = vrcp.f32 %v866_v28  ;;  %v1086_v28 = vadd.f32 %v7294_v11, %v10063_v18 }
 0x54c   :  { %v9213_v30 = vpop.eup %9212 }
 0x54d   :  { %v875_v31 = vmul.f32 %v9213_v30, %v9203_v9 }
 0x54e   :  { %v869_v35 = vpop.xlane.xlu1 %868 }
 0x54f   :  { %9220 = vrcp.f32 %v869_v35  ;;  %8292 = vmatmul.mubr.msk.f32.vlgmr.msra.gmra.mxu0 %vm823_vm6, %v875_v31 }
 0x550   :  { %v9215_v36 = vpop.eup %9214  ;;  %8294 = vmatprep.mubr.msk.f32.mxu0 %vm9587_vm0, %v9586_v0  ;;  %8326 = vmatpush3.xpose.msk.msra.mxu0 %vm272_vm2, %v7303_v32 }
 0x551   :  { %v876_v37 = vmul.f32 %v9215_v36, %v9205_v56  ;;  %8327 = vmatprep.subr.mxu0 %v9586_v0  ;;  %v7305_v56 = vld [vmem:[%s11559_s10 + $0x5] ss:$0 sm:$0xff] }
 0x553   :  { %8295 = vmatmul.mubr.msk.f32.gmra.mxu0 %vm823_vm6, %v876_v37 }
 0x554   :  { %v9217_v40 = vpop.eup %9216  ;;  %8297 = vmatprep.mubr.msk.f32.mxu0 %vm9587_vm0, %v9586_v0  ;;  %8328 = vmatpush3.xpose.msk.msra.mxu0 %vm272_vm2, %v7302_v38 }
 0x555   :  { %v877_v41 = vmul.f32 %v9217_v40, %v9207_v15  ;;  %8363 = vmatprep.subr.mxu0 %v9586_v0 }
 0x557   :  { %8298 = vmatmul.mubr.msk.f32.gmra.mxu0 %vm823_vm6, %v877_v41 }
 0x558   :  { %v9219_v42 = vpop.eup %9218  ;;  %8300 = vmatprep.mubr.msk.f32.mxu0 %vm9587_vm0, %v9586_v0 }
 0x559   :  { %v878_v44 = vmul.f32 %v9219_v42, %v9209_v17 }
 0x55b   :  { %8301 = vmatmul.mubr.msk.f32.gmra.mxu0 %vm823_vm6, %v878_v44 }
 0x55c   :  { %v9221_v45 = vpop.eup %9220  ;;  %8303 = vmatprep.mubr.msk.f32.mxu0 %vm9587_vm0, %v9586_v0 }
 0x55d   :  { %v879_v48 = vmul.f32 %v9221_v45, %v9211_v20 }
 0x55f   :  { %8304 = vmatmul.mubr.msk.f32.gmra.mxu0 %vm823_vm6, %v879_v48 }
 0x560   :  { %8329 = vmatprep.mubr.msk.f32.mxu0 %vm9587_vm0, %v9586_v0 }
 0x563   :  { %8330 = vmatmul.mubr.msk.f32.vlgmr.msra.gmra.mxu0 %vm272_vm2, %v9831_v27 }
 0x564   :  { %8332 = vmatprep.mubr.msk.f32.mxu0 %vm9587_vm0, %v9586_v0 }
 0x567   :  { %8333 = vmatmul.mubr.msk.f32.gmra.mxu0 %vm272_vm2, %v9845_v33 }
 0x568   :  { %8335 = vmatprep.mubr.msk.f32.mxu0 %vm9587_vm0, %v9586_v0 }
 0x56b   :  { %8336 = vmatmul.mubr.msk.f32.gmra.mxu0 %vm272_vm2, %v9861_v39 }
 0x56c   :  { %8338 = vmatprep.mubr.msk.f32.mxu0 %vm9587_vm0, %v9586_v0 }
 0x56f   :  { %8339 = vmatmul.mubr.msk.f32.gmra.mxu0 %vm272_vm2, %v9874_v43 }
 0x570   :  { %8341 = vmatprep.mubr.msk.f32.mxu0 %vm9587_vm0, %v9586_v0 }
 0x573   :  { %8342 = vmatmul.mubr.msk.f32.gmra.mxu0 %vm272_vm2, %v9885_v46 }
 0x574   :  { %8373 = vmatprep.mubr.msk.f32.mxu0 %vm9587_vm0, %v9586_v0 }
 0x60f   :  { %v10131_v49 = vpop.f32.mrf.mxu0 }
 0x611   :  { %v8293_v51 = vpop.f32.mrf.mxu0 }
 0x613   :  { %v10133_v53 = vpop.f32.mrf.mxu0 }
 0x615   :  { %v8296_v54 = vpop.f32.mrf.mxu0 }
 0x617   :  { %v10135_v55 = vpop.f32.mrf.mxu0 }
 0x619   :  { %v8299_v57 = vpop.f32.mrf.mxu0 }
 0x61b   :  { %v10137_v59 = vpop.f32.mrf.mxu0 }
 0x61d   :  { %v8302_v60 = vpop.f32.mrf.mxu0 }
 0x61f   :  { %v10139_v61 = vpop.f32.mrf.mxu0 }
 0x621   :  { %v8305_v63 = vpop.f32.mrf.mxu0 }
 0x623   :  { %v1182_v2 = vpop.f32.mrf.mxu0 }
 0x624   :  { %v1183_v22 = vadd.f32 %v7305_v56, %v1182_v2 }
 0x625   :  { %v8331_v3 = vpop.f32.mrf.mxu0 }
 0x627   :  { %v1187_v4 = vpop.f32.mrf.mxu0 }
 0x628   :  { %v1188_v20 = vadd.f32 %v7305_v56, %v1187_v4 }
 0x629   :  { %v8334_v6 = vpop.f32.mrf.mxu0 }
 0x62b   :  { %v1192_v8 = vpop.f32.mrf.mxu0 }
 0x62c   :  { %v1193_v5 = vadd.f32 %v7305_v56, %v1192_v8 }
 0x62d   :  { %v8337_v9 = vpop.f32.mrf.mxu0 }
 0x62f   :  { %v1197_v50 = vpop.f32.mrf.mxu0 }
 0x630   :  { %v1198_v17 = vadd.f32 %v7305_v56, %v1197_v50 }
 0x631   :  { %v8340_v10 = vpop.f32.mrf.mxu0 }
 0x633   :  { %v1202_v13 = vpop.f32.mrf.mxu0 }
 0x634   :  { %v1203_v15 = vadd.f32 %v7305_v56, %v1202_v13 }
 0x635   :  { %v8343_v62 = vpop.f32.mrf.mxu0 }
 0x636   :  { %8364 = vmatpush3.xpose.msk.msra.mxu0 %vm692_vm5, %v1203_v15 }
 0x637   :  { %8365 = vmatprep.subr.mxu0 %v9586_v0 }
 0x63a   :  { %8366 = vmatpush3.xpose.msk.msra.mxu0 %vm692_vm5, %v1198_v17 }
 0x63b   :  { %8367 = vmatprep.subr.mxu0 %v9586_v0 }
 0x63e   :  { %8368 = vmatpush3.xpose.msk.msra.mxu0 %vm692_vm5, %v1193_v5 }
 0x63f   :  { %8369 = vmatprep.subr.mxu0 %v9586_v0 }
 0x642   :  { %8370 = vmatpush3.xpose.msk.msra.mxu0 %vm692_vm5, %v1188_v20 }
 0x643   :  { %8371 = vmatprep.subr.mxu0 %v9586_v0 }
 0x646   :  { %8372 = vmatpush3.xpose.msk.msra.mxu0 %vm692_vm5, %v1183_v22 }
 0x647   :  { %8413 = vmatprep.subr.mxu0 %v9586_v0 }
 0x649   :  { %8374 = vmatmul.mubr.msk.f32.vlgmr.msra.gmra.mxu0 %vm692_vm5, %v1076_v25 }
 0x64a   :  { %8376 = vmatprep.mubr.msk.f32.mxu0 %vm9587_vm0, %v9586_v0 }
 0x64d   :  { %8377 = vmatmul.mubr.msk.f32.gmra.mxu0 %vm692_vm5, %v1081_v26 }
 0x64e   :  { %8379 = vmatprep.mubr.msk.f32.mxu0 %vm9587_vm0, %v9586_v0 }
 0x651   :  { %8380 = vmatmul.mubr.msk.f32.gmra.mxu0 %vm692_vm5, %v1086_v28 }
 0x652   :  { %8382 = vmatprep.mubr.msk.f32.mxu0 %vm9587_vm0, %v9586_v0 }
 0x655   :  { %8383 = vmatmul.mubr.msk.f32.gmra.mxu0 %vm692_vm5, %v1091_v12 }
 0x656   :  { %8385 = vmatprep.mubr.msk.f32.mxu0 %vm9587_vm0, %v9586_v0 }
 0x659   :  { %8386 = vmatmul.mubr.msk.f32.gmra.mxu0 %vm692_vm5, %v1096_v16 }
 0x65a   :  { %8417 = vmatprep.mubr.msk.f32.mxu0 %vm9587_vm0, %v9586_v0 }
 0x709   :  { %v1409_v18 = vpop.f32.mrf.mxu0 }
 0x70a   :  { %v1433_v30 = vmul.f32 0.25, %v1409_v18 }
 0x70b   :  { %v8375_v31 = vpop.f32.mrf.mxu0 }
 0x70c   :  { %v1438_v32 = vadd.f32 %v1433_v30, %v10030_v47 }
 0x70d   :  { %v1414_v35 = vpop.f32.mrf.mxu0 }
 0x70e   :  { %v1434_v36 = vmul.f32 0.25, %v1414_v35  ;;  %v1443_v21 = vsel %vm823_vm6, %v1438_v32, -inf }
 0x70f   :  { %1444 = vmax.xlane.f32.xlu0 %v1443_v21  ;;  %v8378_v37 = vpop.f32.mrf.mxu0 }
 0x710   :  { %v1439_v38 = vadd.f32 %v1434_v36, %v10035_v52  ;;  %v7341_v37 = vld [vmem:[%s11558_s9 + $0xd8] sm:$0xff] }
 0x711   :  { %v1419_v40 = vpop.f32.mrf.mxu0  ;;  %8414 = vmatpush3.msra.mxu0 %v7341_v37 }
 0x712   :  { %v1435_v23 = vmul.f32 0.25, %v1419_v40  ;;  %v1446_v41 = vsel %vm823_vm6, %v1439_v38, -inf  ;;  %8415 = vmatprep.subr.mxu0 %v9586_v0 }
 0x713   :  { %1447 = vmax.xlane.f32.xlu1 %v1446_v41  ;;  %v8381_v42 = vpop.f32.mrf.mxu0 }
 0x714   :  { %v1440_v44 = vadd.f32 %v1435_v23, %v10042_v58 }
 0x715   :  { %v1424_v45 = vpop.f32.mrf.mxu0 }
 0x716   :  { %v1436_v48 = vmul.f32 0.25, %v1424_v45  ;;  %v1449_v51 = vsel %vm823_vm6, %v1440_v44, -inf  ;;  %v7290_v45 = vld [vmem:[%s11558_s9 + $0xc8] sm:$0xff] }
 0x717   :  { %1450 = vmax.xlane.f32.xlu0 %v1449_v51  ;;  %v8384_v54 = vpop.f32.mrf.mxu0  ;;  %v7289_v51 = vld [vmem:[%s11558_s9 + $0xc0] sm:$0xff] }
 0x718   :  { %v1441_v57 = vadd.f32 %v1436_v48, %v10049_v1 }
 0x719   :  { %v1429_v60 = vpop.f32.mrf.mxu0 }
 0x71a   :  { %v1437_v63 = vmul.f32 0.25, %v1429_v60  ;;  %v1452_v2 = vsel %vm823_vm6, %v1441_v57, -inf }
 0x71b   :  { %1453 = vmax.xlane.f32.xlu1 %v1452_v2  ;;  %v8387_v3 = vpop.f32.mrf.mxu0 }
 0x71c   :  { %v1442_v4 = vadd.f32 %v1437_v63, %v10054_v7 }
 0x71e   :  { %v1455_v6 = vsel %vm836_vm7, %v1442_v4, -inf }
 0x71f   :  { %1456 = vmax.xlane.f32.xlu0 %v1455_v6 }
 0x798   :  { %v1445_v8 = vpop.xlane.xlu0 %1444 }
 0x799   :  { %v1458_v9 = vsub.f32 %v1438_v32, %v1445_v8  ;;  %v7364_v8 = vld [vmem:[%s11558_s9 + $0x68] sm:$0xff] }
 0x79b   :  { %v1463_v50 = vmul.f32 1.442695, %v1458_v9  ;;  %v7363_v9 = vld [vmem:[%s11558_s9 + $0x60] sm:$0xff] }
 0x79c   :  { %v1448_v10 = vpop.xlane.xlu1 %1447 }
 0x79d   :  { %9222 = vpow2.f32 %v1463_v50  ;;  %v1459_v56 = vsub.f32 %v1439_v38, %v1448_v10 }
 0x79f   :  { %v1465_v13 = vmul.f32 1.442695, %v1459_v56 }
 0x7a0   :  { %v1451_v15 = vpop.xlane.xlu0 %1450 }
 0x7a1   :  { %9224 = vpow2.f32 %v1465_v13  ;;  %v1460_v62 = vsub.f32 %v1440_v44, %v1451_v15 }
 0x7a3   :  { %v1467_v17 = vmul.f32 1.442695, %v1460_v62 }
 0x7a4   :  { %v1454_v5 = vpop.xlane.xlu1 %1453 }
 0x7a5   :  { %9226 = vpow2.f32 %v1467_v17  ;;  %v1461_v20 = vsub.f32 %v1441_v57, %v1454_v5 }
 0x7a7   :  { %v1469_v11 = vmul.f32 1.442695, %v1461_v20  ;;  %v7375_v20 = vld [vmem:[%s11558_s9 + $0xa8] sm:$0xff] }
 0x7a8   :  { %v1457_v22 = vpop.xlane.xlu0 %1456 }
 0x7a9   :  { %9228 = vpow2.f32 %v1469_v11  ;;  %v1462_v25 = vsub.f32 %v1442_v4, %v1457_v22 }
 0x7aa   :  { %v9223_v26 = vpop.eup %9222 }
 0x7ab   :  { %v1471_v28 = vmul.f32 1.442695, %v1462_v25  ;;  %v1473_v12 = vsel %vm823_vm6, %v9223_v26, 0.0  ;;  %v7374_v25 = vld [vmem:[%s11558_s9 + $0xa0] sm:$0xff] }
 0x7ac   :  { %1474 = vadd.xlane.f32.xlu1 %v1473_v12 }
 0x7ad   :  { %9230 = vpow2.f32 %v1471_v28 }
 0x7ae   :  { %v9225_v16 = vpop.eup %9224 }
 0x7af   :  { %v1476_v18 = vsel %vm823_vm6, %v9225_v16, 0.0 }
 0x7b0   :  { %1477 = vadd.xlane.f32.xlu0 %v1476_v18 }
 0x7b2   :  { %v9227_v30 = vpop.eup %9226 }
 0x7b3   :  { %v1479_v31 = vsel %vm823_vm6, %v9227_v30, 0.0 }
 0x7b4   :  { %1480 = vadd.xlane.f32.xlu1 %v1479_v31 }
 0x7b6   :  { %v9229_v32 = vpop.eup %9228 }
 0x7b7   :  { %v1482_v35 = vsel %vm823_vm6, %v9229_v32, 0.0 }
 0x7b8   :  { %1483 = vadd.xlane.f32.xlu0 %v1482_v35 }
 0x7ba   :  { %v9231_v36 = vpop.eup %9230 }
 0x7bb   :  { %v1485_v21 = vsel %vm836_vm7, %v9231_v36, 0.0 }
 0x7bc   :  { %1486 = vadd.xlane.f32.xlu1 %v1485_v21 }
 0x835   :  { %v1475_v38 = vpop.xlane.xlu1 %1474 }
 0x836   :  { %9232 = vrcp.f32 %v1475_v38 }
 0x839   :  { %v1478_v40 = vpop.xlane.xlu0 %1477 }
 0x83a   :  { %9234 = vrcp.f32 %v1478_v40 }
 0x83d   :  { %v1481_v23 = vpop.xlane.xlu1 %1480 }
 0x83e   :  { %9236 = vrcp.f32 %v1481_v23 }
 0x841   :  { %v1484_v41 = vpop.xlane.xlu0 %1483 }
 0x842   :  { %9238 = vrcp.f32 %v1484_v41 }
 0x843   :  { %v9233_v42 = vpop.eup %9232 }
 0x844   :  { %v1493_v44 = vmul.f32 %v9233_v42, %v9223_v26  ;;  %v7366_v42 = vld [vmem:[%s11559_s10 + $0x6] ss:$0 sm:$0xff] }
 0x845   :  { %v1487_v48 = vpop.xlane.xlu1 %1486 }
 0x846   :  { %9240 = vrcp.f32 %v1487_v48  ;;  %8399 = vmatmul.mubr.msk.f32.vlgmr.msra.gmra.mxu1 %vm823_vm6, %v1493_v44 }
 0x847   :  { %v9235_v54 = vpop.eup %9234  ;;  %8401 = vmatprep.mubr.msk.f32.mxu1 %vm9587_vm0, %v9586_v0  ;;  %8433 = vmatpush3.msra.mxu1 %v7290_v45 }
 0x848   :  { %v1494_v57 = vmul.f32 %v9235_v54, %v9225_v16  ;;  %8434 = vmatprep.subr.mxu1 %v9586_v0 }
 0x849   :  { %8435 = vmatpush3.msra.mxu1 %v7289_v51 }
 0x84a   :  { %8402 = vmatmul.mubr.msk.f32.gmra.mxu1 %vm823_vm6, %v1494_v57  ;;  %8470 = vmatprep.subr.mxu1 %v9586_v0 }
 0x84b   :  { %v9237_v60 = vpop.eup %9236  ;;  %8404 = vmatprep.mubr.msk.f32.mxu1 %vm9587_vm0, %v9586_v0 }
 0x84c   :  { %v1495_v63 = vmul.f32 %v9237_v60, %v9227_v30 }
 0x84e   :  { %8405 = vmatmul.mubr.msk.f32.gmra.mxu1 %vm823_vm6, %v1495_v63 }
 0x84f   :  { %v9239_v2 = vpop.eup %9238  ;;  %8407 = vmatprep.mubr.msk.f32.mxu1 %vm9587_vm0, %v9586_v0 }
 0x850   :  { %v1496_v3 = vmul.f32 %v9239_v2, %v9229_v32 }
 0x852   :  { %8408 = vmatmul.mubr.msk.f32.gmra.mxu1 %vm823_vm6, %v1496_v3 }
 0x853   :  { %v9241_v4 = vpop.eup %9240  ;;  %8410 = vmatprep.mubr.msk.f32.mxu1 %vm9587_vm0, %v9586_v0 }
 0x854   :  { %v1497_v6 = vmul.f32 %v9241_v4, %v9231_v36 }
 0x856   :  { %8411 = vmatmul.mubr.msk.f32.gmra.mxu1 %vm823_vm6, %v1497_v6 }
 0x857   :  { %8436 = vmatprep.mubr.msk.f32.mxu1 %vm9587_vm0, %v9586_v0 }
 0x85a   :  { %8437 = vmatmul.mubr.msk.f32.vlgmr.msra.gmra.mxu1 %vm692_vm5, %v10131_v49  ;;  %v7340_v49 = vld [vmem:[%s11558_s9 + $0xd0] sm:$0xff] }
 0x85b   :  { %8439 = vmatprep.mubr.msk.f32.mxu1 %vm9587_vm0, %v9586_v0  ;;  %8471 = vmatpush3.xpose.msk.msra.mxu1 %vm272_vm2, %v7364_v8 }
 0x85c   :  { %8472 = vmatprep.subr.mxu1 %v9586_v0  ;;  %8416 = vmatpush3.msra.mxu0 %v7340_v49 }
 0x85d   :  { %8451 = vmatprep.subr.mxu0 %v9586_v0 }
 0x85e   :  { %8440 = vmatmul.mubr.msk.f32.gmra.mxu1 %vm692_vm5, %v10133_v53  ;;  %v7353_v53 = vld [vmem:[%s11558_s9 + $0x28] sm:$0xff] }
 0x85f   :  { %8442 = vmatprep.mubr.msk.f32.mxu1 %vm9587_vm0, %v9586_v0  ;;  %8473 = vmatpush3.xpose.msk.msra.mxu1 %vm272_vm2, %v7363_v9 }
 0x860   :  { %8508 = vmatprep.subr.mxu1 %v9586_v0 }
 0x862   :  { %8443 = vmatmul.mubr.msk.f32.gmra.mxu1 %vm692_vm5, %v10135_v55 }
 0x863   :  { %8445 = vmatprep.mubr.msk.f32.mxu1 %vm9587_vm0, %v9586_v0 }
 0x866   :  { %8446 = vmatmul.mubr.msk.f32.gmra.mxu1 %vm692_vm5, %v10137_v59 }
 0x867   :  { %8448 = vmatprep.mubr.msk.f32.mxu1 %vm9587_vm0, %v9586_v0 }
 0x86a   :  { %8449 = vmatmul.mubr.msk.f32.gmra.mxu1 %vm692_vm5, %v10139_v61  ;;  %v7352_v61 = vld [vmem:[%s11558_s9 + $0x20] sm:$0xff] }
 0x86b   :  { %8474 = vmatprep.mubr.msk.f32.mxu1 %vm9587_vm0, %v9586_v0 }
 0x86e   :  { %8475 = vmatmul.mubr.msk.f32.vlgmr.msra.gmra.mxu1 %vm272_vm2, %v9831_v27 }
 0x86f   :  { %8477 = vmatprep.mubr.msk.f32.mxu1 %vm9587_vm0, %v9586_v0 }
 0x872   :  { %8478 = vmatmul.mubr.msk.f32.gmra.mxu1 %vm272_vm2, %v9845_v33 }
 0x873   :  { %8480 = vmatprep.mubr.msk.f32.mxu1 %vm9587_vm0, %v9586_v0 }
 0x876   :  { %8481 = vmatmul.mubr.msk.f32.gmra.mxu1 %vm272_vm2, %v9861_v39 }
 0x877   :  { %8483 = vmatprep.mubr.msk.f32.mxu1 %vm9587_vm0, %v9586_v0 }
 0x87a   :  { %8484 = vmatmul.mubr.msk.f32.gmra.mxu1 %vm272_vm2, %v9874_v43 }
 0x87b   :  { %8486 = vmatprep.mubr.msk.f32.mxu1 %vm9587_vm0, %v9586_v0 }
 0x87e   :  { %8487 = vmatmul.mubr.msk.f32.gmra.mxu1 %vm272_vm2, %v9885_v46 }
 0x87f   :  { %8518 = vmatprep.mubr.msk.f32.mxu1 %vm9587_vm0, %v9586_v0 }
 0x906   :  { %v1582_v55 = vpop.f32.mrf.mxu1 }
 0x907   :  { %8418 = vmatmul.mubr.msk.f32.vlgmr.msra.gmra.mxu0 %vm692_vm5, %v1582_v55 }
 0x908   :  { %v8400_v59 = vpop.f32.mrf.mxu1  ;;  %8420 = vmatprep.mubr.msk.f32.mxu0 %vm9587_vm0, %v9586_v0  ;;  %8452 = vmatpush3.xpose.msk.msra.mxu0 %vm272_vm2, %v7353_v53 }
 0x909   :  { %8453 = vmatprep.subr.mxu0 %v9586_v0  ;;  %v7355_v59 = vld [vmem:[%s11559_s10 + $0x2] ss:$0 sm:$0xff] }
 0x90a   :  { %v1587_v50 = vpop.f32.mrf.mxu1 }
 0x90b   :  { %8421 = vmatmul.mubr.msk.f32.gmra.mxu0 %vm692_vm5, %v1587_v50 }
 0x90c   :  { %v8403_v10 = vpop.f32.mrf.mxu1  ;;  %8423 = vmatprep.mubr.msk.f32.mxu0 %vm9587_vm0, %v9586_v0  ;;  %8454 = vmatpush3.xpose.msk.msra.mxu0 %vm272_vm2, %v7352_v61 }
 0x90d   :  { %8489 = vmatprep.subr.mxu0 %v9586_v0 }
 0x90e   :  { %v1592_v56 = vpop.f32.mrf.mxu1 }
 0x90f   :  { %8424 = vmatmul.mubr.msk.f32.gmra.mxu0 %vm692_vm5, %v1592_v56 }
 0x910   :  { %v8406_v13 = vpop.f32.mrf.mxu1  ;;  %8426 = vmatprep.mubr.msk.f32.mxu0 %vm9587_vm0, %v9586_v0 }
 0x912   :  { %v1597_v15 = vpop.f32.mrf.mxu1 }
 0x913   :  { %8427 = vmatmul.mubr.msk.f32.gmra.mxu0 %vm692_vm5, %v1597_v15 }
 0x914   :  { %v8409_v62 = vpop.f32.mrf.mxu1  ;;  %8429 = vmatprep.mubr.msk.f32.mxu0 %vm9587_vm0, %v9586_v0 }
 0x916   :  { %v1602_v17 = vpop.f32.mrf.mxu1 }
 0x917   :  { %8430 = vmatmul.mubr.msk.f32.gmra.mxu0 %vm692_vm5, %v1602_v17 }
 0x918   :  { %v8412_v5 = vpop.f32.mrf.mxu1  ;;  %8455 = vmatprep.mubr.msk.f32.mxu0 %vm9587_vm0, %v9586_v0 }
 0x91a   :  { %v10301_v11 = vpop.f32.mrf.mxu1 }
 0x91b   :  { %8456 = vmatmul.mubr.msk.f32.vlgmr.msra.gmra.mxu0 %vm272_vm2, %v9831_v27 }
 0x91c   :  { %v8438_v22 = vpop.f32.mrf.mxu1  ;;  %8458 = vmatprep.mubr.msk.f32.mxu0 %vm9587_vm0, %v9586_v0  ;;  %8490 = vmatpush3.xpose.msk.msra.mxu0 %vm272_vm2, %v7375_v20 }
 0x91d   :  { %8491 = vmatprep.subr.mxu0 %v9586_v0 }
 0x91e   :  { %v10312_v26 = vpop.f32.mrf.mxu1 }
 0x91f   :  { %8459 = vmatmul.mubr.msk.f32.gmra.mxu0 %vm272_vm2, %v9845_v33 }
 0x920   :  { %v8441_v28 = vpop.f32.mrf.mxu1  ;;  %8461 = vmatprep.mubr.msk.f32.mxu0 %vm9587_vm0, %v9586_v0  ;;  %8492 = vmatpush3.xpose.msk.msra.mxu0 %vm272_vm2, %v7374_v25 }
 0x921   :  { %8533 = vmatprep.subr.mxu0 %v9586_v0 }
 0x922   :  { %v10320_v12 = vpop.f32.mrf.mxu1 }
 0x923   :  { %8462 = vmatmul.mubr.msk.f32.gmra.mxu0 %vm272_vm2, %v9861_v39 }
 0x924   :  { %v8444_v16 = vpop.f32.mrf.mxu1  ;;  %8464 = vmatprep.mubr.msk.f32.mxu0 %vm9587_vm0, %v9586_v0 }
 0x926   :  { %v10326_v18 = vpop.f32.mrf.mxu1 }
 0x927   :  { %8465 = vmatmul.mubr.msk.f32.gmra.mxu0 %vm272_vm2, %v9874_v43 }
 0x928   :  { %v8447_v30 = vpop.f32.mrf.mxu1  ;;  %8467 = vmatprep.mubr.msk.f32.mxu0 %vm9587_vm0, %v9586_v0 }
 0x92a   :  { %v10332_v31 = vpop.f32.mrf.mxu1 }
 0x92b   :  { %8468 = vmatmul.mubr.msk.f32.gmra.mxu0 %vm272_vm2, %v9885_v46 }
 0x92c   :  { %v8450_v32 = vpop.f32.mrf.mxu1  ;;  %8493 = vmatprep.mubr.msk.f32.mxu0 %vm9587_vm0, %v9586_v0 }
 0x92e   :  { %v2009_v35 = vpop.f32.mrf.mxu1 }
 0x92f   :  { %8494 = vmatmul.mubr.msk.f32.vlgmr.msra.gmra.mxu0 %vm272_vm2, %v9831_v27  ;;  %v2010_v60 = vadd.f32 %v7366_v42, %v2009_v35 }
 0x930   :  { %v8476_v36 = vpop.f32.mrf.mxu1  ;;  %8496 = vmatprep.mubr.msk.f32.mxu0 %vm9587_vm0, %v9586_v0 }
 0x932   :  { %v2014_v21 = vpop.f32.mrf.mxu1 }
 0x933   :  { %8497 = vmatmul.mubr.msk.f32.gmra.mxu0 %vm272_vm2, %v9845_v33  ;;  %v2015_v57 = vadd.f32 %v7366_v42, %v2014_v21 }
 0x934   :  { %v8479_v37 = vpop.f32.mrf.mxu1  ;;  %8499 = vmatprep.mubr.msk.f32.mxu0 %vm9587_vm0, %v9586_v0 }
 0x936   :  { %v2019_v38 = vpop.f32.mrf.mxu1 }
 0x937   :  { %8500 = vmatmul.mubr.msk.f32.gmra.mxu0 %vm272_vm2, %v9861_v39  ;;  %v2020_v54 = vadd.f32 %v7366_v42, %v2019_v38 }
 0x938   :  { %v8482_v40 = vpop.f32.mrf.mxu1  ;;  %8502 = vmatprep.mubr.msk.f32.mxu0 %vm9587_vm0, %v9586_v0 }
 0x93a   :  { %v2024_v23 = vpop.f32.mrf.mxu1 }
 0x93b   :  { %8503 = vmatmul.mubr.msk.f32.gmra.mxu0 %vm272_vm2, %v9874_v43  ;;  %v2025_v51 = vadd.f32 %v7366_v42, %v2024_v23 }
 0x93c   :  { %v8485_v41 = vpop.f32.mrf.mxu1  ;;  %8505 = vmatprep.mubr.msk.f32.mxu0 %vm9587_vm0, %v9586_v0 }
 0x93d   :  { %v7377_v41 = vld [vmem:[%s11559_s10 + $0xa] ss:$0 sm:$0xff] }
 0x93e   :  { %v2029_v44 = vpop.f32.mrf.mxu1 }
 0x93f   :  { %v2030_v45 = vadd.f32 %v7366_v42, %v2029_v44  ;;  %8506 = vmatmul.mubr.msk.f32.gmra.mxu0 %vm272_vm2, %v9885_v46 }
 0x940   :  { %v8488_v48 = vpop.f32.mrf.mxu1  ;;  %8543 = vmatprep.mubr.msk.f32.mxu0 %vm9587_vm0, %v9586_v0 }
 0x941   :  { %8509 = vmatpush3.xpose.msk.msra.mxu1 %vm692_vm5, %v2030_v45 }
 0x942   :  { %8510 = vmatprep.subr.mxu1 %v9586_v0 }
 0x945   :  { %8511 = vmatpush3.xpose.msk.msra.mxu1 %vm692_vm5, %v2025_v51 }
 0x946   :  { %8512 = vmatprep.subr.mxu1 %v9586_v0 }
 0x949   :  { %8513 = vmatpush3.xpose.msk.msra.mxu1 %vm692_vm5, %v2020_v54 }
 0x94a   :  { %8514 = vmatprep.subr.mxu1 %v9586_v0 }
 0x94d   :  { %8515 = vmatpush3.xpose.msk.msra.mxu1 %vm692_vm5, %v2015_v57 }
 0x94e   :  { %8516 = vmatprep.subr.mxu1 %v9586_v0 }
 0x951   :  { %8517 = vmatpush3.xpose.msk.msra.mxu1 %vm692_vm5, %v2010_v60 }
 0x952   :  { %8558 = vmatprep.subr.mxu1 %v9586_v0 }
 0x9c7   :  { %v10371_v63 = vpop.f32.mrf.mxu0 }
 0x9c9   :  { %v8419_v2 = vpop.f32.mrf.mxu0 }
 0x9cb   :  { %v10373_v3 = vpop.f32.mrf.mxu0 }
 0x9cd   :  { %v8422_v4 = vpop.f32.mrf.mxu0 }
 0x9cf   :  { %v10375_v6 = vpop.f32.mrf.mxu0 }
 0x9d1   :  { %v8425_v8 = vpop.f32.mrf.mxu0 }
 0x9d3   :  { %v10377_v9 = vpop.f32.mrf.mxu0 }
 0x9d5   :  { %v8428_v49 = vpop.f32.mrf.mxu0 }
 0x9d7   :  { %v10379_v53 = vpop.f32.mrf.mxu0 }
 0x9d9   :  { %v8431_v55 = vpop.f32.mrf.mxu0 }
 0x9db   :  { %v1902_v61 = vpop.f32.mrf.mxu0 }
 0x9dc   :  { %v1903_v50 = vadd.f32 %v7355_v59, %v1902_v61 }
 0x9dd   :  { %v8457_v10 = vpop.f32.mrf.mxu0 }
 0x9de   :  { %8519 = vmatmul.mubr.msk.f32.vlgmr.msra.gmra.mxu1 %vm692_vm5, %v1903_v50 }
 0x9df   :  { %v1907_v56 = vpop.f32.mrf.mxu0  ;;  %8521 = vmatprep.mubr.msk.f32.mxu1 %vm9587_vm0, %v9586_v0 }
 0x9e0   :  { %v1908_v13 = vadd.f32 %v7355_v59, %v1907_v56 }
 0x9e1   :  { %v8460_v15 = vpop.f32.mrf.mxu0 }
 0x9e2   :  { %8522 = vmatmul.mubr.msk.f32.gmra.mxu1 %vm692_vm5, %v1908_v13 }
 0x9e3   :  { %v1912_v62 = vpop.f32.mrf.mxu0  ;;  %8524 = vmatprep.mubr.msk.f32.mxu1 %vm9587_vm0, %v9586_v0 }
 0x9e4   :  { %v1913_v17 = vadd.f32 %v7355_v59, %v1912_v62 }
 0x9e5   :  { %v8463_v5 = vpop.f32.mrf.mxu0 }
 0x9e6   :  { %8525 = vmatmul.mubr.msk.f32.gmra.mxu1 %vm692_vm5, %v1913_v17 }
 0x9e7   :  { %v1917_v20 = vpop.f32.mrf.mxu0  ;;  %8527 = vmatprep.mubr.msk.f32.mxu1 %vm9587_vm0, %v9586_v0 }
 0x9e8   :  { %v1918_v22 = vadd.f32 %v7355_v59, %v1917_v20 }
 0x9e9   :  { %v8466_v25 = vpop.f32.mrf.mxu0 }
 0x9ea   :  { %8528 = vmatmul.mubr.msk.f32.gmra.mxu1 %vm692_vm5, %v1918_v22 }
 0x9eb   :  { %v1922_v28 = vpop.f32.mrf.mxu0  ;;  %8530 = vmatprep.mubr.msk.f32.mxu1 %vm9587_vm0, %v9586_v0 }
 0x9ec   :  { %v1923_v16 = vadd.f32 %v7355_v59, %v1922_v28 }
 0x9ed   :  { %v8469_v30 = vpop.f32.mrf.mxu0 }
 0x9ee   :  { %8531 = vmatmul.mubr.msk.f32.gmra.mxu1 %vm692_vm5, %v1923_v16 }
 0x9ef   :  { %v2116_v32 = vpop.f32.mrf.mxu0  ;;  %8562 = vmatprep.mubr.msk.f32.mxu1 %vm9587_vm0, %v9586_v0 }
 0x9f0   :  { %v2117_v57 = vadd.f32 %v7377_v41, %v2116_v32 }
 0x9f1   :  { %v8495_v35 = vpop.f32.mrf.mxu0 }
 0x9f3   :  { %v2121_v36 = vpop.f32.mrf.mxu0 }
 0x9f4   :  { %v2122_v54 = vadd.f32 %v7377_v41, %v2121_v36 }
 0x9f5   :  { %v8498_v21 = vpop.f32.mrf.mxu0 }
 0x9f7   :  { %v2126_v37 = vpop.f32.mrf.mxu0 }
 0x9f8   :  { %v2127_v51 = vadd.f32 %v7377_v41, %v2126_v37 }
 0x9f9   :  { %v8501_v38 = vpop.f32.mrf.mxu0 }
 0x9fb   :  { %v2131_v40 = vpop.f32.mrf.mxu0 }
 0x9fc   :  { %v2132_v48 = vadd.f32 %v7377_v41, %v2131_v40 }
 0x9fd   :  { %v8504_v23 = vpop.f32.mrf.mxu0 }
 0x9ff   :  { %v2136_v42 = vpop.f32.mrf.mxu0 }
 0xa00   :  { %v2137_v44 = vadd.f32 %v7377_v41, %v2136_v42 }
 0xa01   :  { %v8507_v45 = vpop.f32.mrf.mxu0 }
 0xa02   :  { %8534 = vmatpush3.msk.msra.mxu0 %vm895_vm4, %v2137_v44 }
 0xa03   :  { %8535 = vmatprep.subr.mxu0 %v9586_v0 }
 0xa04   :  { %8536 = vmatpush3.msra.mxu0 %v2132_v48 }
 0xa05   :  { %8537 = vmatprep.subr.mxu0 %v9586_v0 }
 0xa06   :  { %8538 = vmatpush3.msra.mxu0 %v2127_v51 }
 0xa07   :  { %8539 = vmatprep.subr.mxu0 %v9586_v0 }
 0xa08   :  { %8540 = vmatpush3.msra.mxu0 %v2122_v54 }
 0xa09   :  { %8541 = vmatprep.subr.mxu0 %v9586_v0 }
 0xa0a   :  { %8542 = vmatpush3.msra.mxu0 %v2117_v57 }
 0xa0b   :  { %8577 = vmatprep.subr.mxu0 %v9586_v0 }
 0xa9e   :  { %v2236_v60 = vpop.f32.mrf.mxu1 }
 0xa9f   :  { %v2260_v2 = vmul.f32 0.25, %v2236_v60 }
 0xaa0   :  { %v8520_v4 = vpop.f32.mrf.mxu1 }
 0xaa1   :  { %v2265_v8 = vadd.f32 %v2260_v2, %v10030_v47 }
 0xaa2   :  { %v2241_v49 = vpop.f32.mrf.mxu1 }
 0xaa3   :  { %v2261_v55 = vmul.f32 0.25, %v2241_v49  ;;  %v2270_v59 = vsel %vm823_vm6, %v2265_v8, -inf }
 0xaa4   :  { %2271 = vmax.xlane.f32.xlu0 %v2270_v59  ;;  %v8523_v61 = vpop.f32.mrf.mxu1 }
 0xaa5   :  { %v2266_v50 = vadd.f32 %v2261_v55, %v10035_v52  ;;  %v7402_v61 = vld [vmem:[%s11558_s9 + $0xe8] sm:$0xff] }
 0xaa6   :  { %v2246_v10 = vpop.f32.mrf.mxu1  ;;  %8559 = vmatpush3.msra.mxu1 %v7402_v61 }
 0xaa7   :  { %v2262_v56 = vmul.f32 0.25, %v2246_v10  ;;  %v2273_v13 = vsel %vm823_vm6, %v2266_v50, -inf  ;;  %8560 = vmatprep.subr.mxu1 %v9586_v0 }
 0xaa8   :  { %2274 = vmax.xlane.f32.xlu1 %v2273_v13  ;;  %v8526_v15 = vpop.f32.mrf.mxu1 }
 0xaa9   :  { %v2267_v62 = vadd.f32 %v2262_v56, %v10042_v58 }
 0xaaa   :  { %v2251_v17 = vpop.f32.mrf.mxu1 }
 0xaab   :  { %v2263_v5 = vmul.f32 0.25, %v2251_v17  ;;  %v2276_v47 = vsel %vm823_vm6, %v2267_v62, -inf  ;;  %v7409_v17 = vld [vmem:[%s11558_s9 + $0x38] sm:$0xff] }
 0xaac   :  { %2277 = vmax.xlane.f32.xlu0 %v2276_v47  ;;  %v8529_v20 = vpop.f32.mrf.mxu1 }
 0xaad   :  { %v2268_v22 = vadd.f32 %v2263_v5, %v10049_v1 }
 0xaae   :  { %v2256_v25 = vpop.f32.mrf.mxu1 }
 0xaaf   :  { %v2264_v28 = vmul.f32 0.25, %v2256_v25  ;;  %v2279_v52 = vsel %vm823_vm6, %v2268_v22, -inf }
 0xab0   :  { %2280 = vmax.xlane.f32.xlu1 %v2279_v52  ;;  %v8532_v16 = vpop.f32.mrf.mxu1 }
 0xab1   :  { %v2269_v30 = vadd.f32 %v2264_v28, %v10054_v7 }
 0xab3   :  { %v2282_v32 = vsel %vm836_vm7, %v2269_v30, -inf }
 0xab4   :  { %2283 = vmax.xlane.f32.xlu0 %v2282_v32 }
 0xb2d   :  { %v2272_v58 = vpop.xlane.xlu0 %2271 }
 0xb2e   :  { %v2285_v35 = vsub.f32 %v2265_v8, %v2272_v58  ;;  %v7431_v58 = vld [vmem:[%s11558_s9 + $0xb8] sm:$0xff] }
 0xb30   :  { %v2290_v36 = vmul.f32 1.442695, %v2285_v35  ;;  %v7430_v35 = vld [vmem:[%s11558_s9 + $0xb0] sm:$0xff] }
 0xb31   :  { %v2275_v21 = vpop.xlane.xlu1 %2274 }
 0xb32   :  { %9242 = vpow2.f32 %v2290_v36  ;;  %v2286_v37 = vsub.f32 %v2266_v50, %v2275_v21  ;;  %v7401_v36 = vld [vmem:[%s11558_s9 + $0xe0] sm:$0xff]  ;;  %v7420_v21 = vld [vmem:[%s11558_s9 + $0x78] sm:$0xff] }
 0xb33   :  { %8561 = vmatpush3.msra.mxu1 %v7401_v36 }
 0xb34   :  { %v2292_v38 = vmul.f32 1.442695, %v2286_v37  ;;  %8596 = vmatprep.subr.mxu1 %v9586_v0 }
 0xb35   :  { %v2278_v40 = vpop.xlane.xlu0 %2277 }
 0xb36   :  { %9244 = vpow2.f32 %v2292_v38  ;;  %v2287_v1 = vsub.f32 %v2267_v62, %v2278_v40  ;;  %v7419_v40 = vld [vmem:[%s11558_s9 + $0x70] sm:$0xff] }
 0xb38   :  { %v2294_v23 = vmul.f32 1.442695, %v2287_v1 }
 0xb39   :  { %v2281_v41 = vpop.xlane.xlu1 %2280 }
 0xb3a   :  { %9246 = vpow2.f32 %v2294_v23  ;;  %v2288_v42 = vsub.f32 %v2268_v22, %v2281_v41  ;;  %v7408_v22 = vld [vmem:[%s11558_s9 + $0x30] sm:$0xff] }
 0xb3c   :  { %v2296_v44 = vmul.f32 1.442695, %v2288_v42 }
 0xb3d   :  { %v2284_v45 = vpop.xlane.xlu0 %2283 }
 0xb3e   :  { %9248 = vpow2.f32 %v2296_v44  ;;  %v2289_v7 = vsub.f32 %v2269_v30, %v2284_v45 }
 0xb3f   :  { %v9243_v48 = vpop.eup %9242 }
 0xb40   :  { %v2298_v51 = vmul.f32 1.442695, %v2289_v7  ;;  %v2300_v54 = vsel %vm823_vm6, %v9243_v48, 0.0 }
 0xb41   :  { %2301 = vadd.xlane.f32.xlu1 %v2300_v54 }
 0xb42   :  { %9250 = vpow2.f32 %v2298_v51 }
 0xb43   :  { %v9245_v57 = vpop.eup %9244 }
 0xb44   :  { %v2303_v60 = vsel %vm823_vm6, %v9245_v57, 0.0 }
 0xb45   :  { %2304 = vadd.xlane.f32.xlu0 %v2303_v60 }
 0xb47   :  { %v9247_v2 = vpop.eup %9246 }
 0xb48   :  { %v2306_v4 = vsel %vm823_vm6, %v9247_v2, 0.0 }
 0xb49   :  { %2307 = vadd.xlane.f32.xlu1 %v2306_v4 }
 0xb4b   :  { %v9249_v8 = vpop.eup %9248 }
 0xb4c   :  { %v2309_v49 = vsel %vm823_vm6, %v9249_v8, 0.0 }
 0xb4d   :  { %2310 = vadd.xlane.f32.xlu0 %v2309_v49 }
 0xb4f   :  { %v9251_v55 = vpop.eup %9250 }
 0xb50   :  { %v2312_v59 = vsel %vm836_vm7, %v9251_v55, 0.0 }
 0xb51   :  { %2313 = vadd.xlane.f32.xlu1 %v2312_v59 }
 0xbca   :  { %v2302_v50 = vpop.xlane.xlu1 %2301 }
 0xbcb   :  { %9252 = vrcp.f32 %v2302_v50 }
 0xbce   :  { %v2305_v10 = vpop.xlane.xlu0 %2304 }
 0xbcf   :  { %9254 = vrcp.f32 %v2305_v10 }
 0xbd2   :  { %v2308_v56 = vpop.xlane.xlu1 %2307 }
 0xbd3   :  { %9256 = vrcp.f32 %v2308_v56 }
 0xbd6   :  { %v2311_v13 = vpop.xlane.xlu0 %2310 }
 0xbd7   :  { %9258 = vrcp.f32 %v2311_v13  ;;  %v7433_v13 = vld [vmem:[%s11559_s10 + $0xb] ss:$0 sm:$0xff] }
 0xbd8   :  { %v9253_v15 = vpop.eup %9252 }
 0xbd9   :  { %v2320_v62 = vmul.f32 %v9253_v15, %v9243_v48 }
 0xbda   :  { %v2314_v5 = vpop.xlane.xlu1 %2313 }
 0xbdb   :  { %9260 = vrcp.f32 %v2314_v5  ;;  %8544 = vmatmul.mubr.msk.f32.vlgmr.msra.gmra.mxu0 %vm823_vm6, %v2320_v62 }
 0xbdc   :  { %v9255_v47 = vpop.eup %9254  ;;  %8546 = vmatprep.mubr.msk.f32.mxu0 %vm9587_vm0, %v9586_v0  ;;  %8578 = vmatpush3.xpose.msk.msra.mxu0 %vm272_vm2, %v7409_v17 }
 0xbdd   :  { %v2321_v20 = vmul.f32 %v9255_v47, %v9245_v57  ;;  %8579 = vmatprep.subr.mxu0 %v9586_v0 }
 0xbdf   :  { %8547 = vmatmul.mubr.msk.f32.gmra.mxu0 %vm823_vm6, %v2321_v20 }
 0xbe0   :  { %v9257_v25 = vpop.eup %9256  ;;  %8549 = vmatprep.mubr.msk.f32.mxu0 %vm9587_vm0, %v9586_v0  ;;  %8580 = vmatpush3.xpose.msk.msra.mxu0 %vm272_vm2, %v7408_v22  ;;  %v1796_v22 = vadd.f32 %v10301_v11, %v10371_v63  ;;  %v1811_v11 = vadd.f32 %v10326_v18, %v10377_v9  ;;  %v7422_v18 = vld [vmem:[%s11559_s10 + $0x7] ss:$0 sm:$0xff] }
 0xbe1   :  { %v2322_v28 = vmul.f32 %v9257_v25, %v9247_v2  ;;  %8615 = vmatprep.subr.mxu0 %v9586_v0 }
 0xbe3   :  { %8550 = vmatmul.mubr.msk.f32.gmra.mxu0 %vm823_vm6, %v2322_v28 }
 0xbe4   :  { %v9259_v52 = vpop.eup %9258  ;;  %8552 = vmatprep.mubr.msk.f32.mxu0 %vm9587_vm0, %v9586_v0 }
 0xbe5   :  { %v2323_v16 = vmul.f32 %v9259_v52, %v9249_v8 }
 0xbe7   :  { %8553 = vmatmul.mubr.msk.f32.gmra.mxu0 %vm823_vm6, %v2323_v16  ;;  %v1801_v16 = vadd.f32 %v10312_v26, %v10373_v3  ;;  %v1816_v26 = vadd.f32 %v10332_v31, %v10379_v53 }
 0xbe8   :  { %v9261_v30 = vpop.eup %9260  ;;  %8555 = vmatprep.mubr.msk.f32.mxu0 %vm9587_vm0, %v9586_v0 }
 0xbe9   :  { %v2324_v32 = vmul.f32 %v9261_v30, %v9251_v55 }
 0xbeb   :  { %8556 = vmatmul.mubr.msk.f32.gmra.mxu0 %vm823_vm6, %v2324_v32 }
 0xbec   :  { %8581 = vmatprep.mubr.msk.f32.mxu0 %vm9587_vm0, %v9586_v0 }
 0xbef   :  { %8582 = vmatmul.mubr.msk.f32.vlgmr.msra.gmra.mxu0 %vm272_vm2, %v9831_v27 }
 0xbf0   :  { %8584 = vmatprep.mubr.msk.f32.mxu0 %vm9587_vm0, %v9586_v0  ;;  %8616 = vmatpush3.xpose.msk.msra.mxu0 %vm272_vm2, %v7431_v58 }
 0xbf1   :  { %8617 = vmatprep.subr.mxu0 %v9586_v0 }
 0xbf3   :  { %8585 = vmatmul.mubr.msk.f32.gmra.mxu0 %vm272_vm2, %v9845_v33 }
 0xbf4   :  { %8587 = vmatprep.mubr.msk.f32.mxu0 %vm9587_vm0, %v9586_v0  ;;  %8618 = vmatpush3.xpose.msk.msra.mxu0 %vm272_vm2, %v7430_v35  ;;  %v1806_v35 = vadd.f32 %v10320_v12, %v10375_v6 }
 0xbf5   :  { %8659 = vmatprep.subr.mxu0 %v9586_v0 }
 0xbf7   :  { %8588 = vmatmul.mubr.msk.f32.gmra.mxu0 %vm272_vm2, %v9861_v39 }
 0xbf8   :  { %8590 = vmatprep.mubr.msk.f32.mxu0 %vm9587_vm0, %v9586_v0 }
 0xbfb   :  { %8591 = vmatmul.mubr.msk.f32.gmra.mxu0 %vm272_vm2, %v9874_v43 }
 0xbfc   :  { %8593 = vmatprep.mubr.msk.f32.mxu0 %vm9587_vm0, %v9586_v0 }
 0xbff   :  { %8594 = vmatmul.mubr.msk.f32.gmra.mxu0 %vm272_vm2, %v9885_v46 }
 0xc00   :  { %8619 = vmatprep.mubr.msk.f32.mxu0 %vm9587_vm0, %v9586_v0 }
 0xc03   :  { %8620 = vmatmul.mubr.msk.f32.vlgmr.msra.gmra.mxu0 %vm272_vm2, %v9831_v27 }
 0xc04   :  { %8622 = vmatprep.mubr.msk.f32.mxu0 %vm9587_vm0, %v9586_v0 }
 0xc07   :  { %8623 = vmatmul.mubr.msk.f32.gmra.mxu0 %vm272_vm2, %v9845_v33 }
 0xc08   :  { %8625 = vmatprep.mubr.msk.f32.mxu0 %vm9587_vm0, %v9586_v0 }
 0xc0b   :  { %8626 = vmatmul.mubr.msk.f32.gmra.mxu0 %vm272_vm2, %v9861_v39 }
 0xc0c   :  { %8628 = vmatprep.mubr.msk.f32.mxu0 %vm9587_vm0, %v9586_v0 }
 0xc0f   :  { %8629 = vmatmul.mubr.msk.f32.gmra.mxu0 %vm272_vm2, %v9874_v43 }
 0xc10   :  { %8631 = vmatprep.mubr.msk.f32.mxu0 %vm9587_vm0, %v9586_v0 }
 0xc13   :  { %8632 = vmatmul.mubr.msk.f32.gmra.mxu0 %vm272_vm2, %v9885_v46 }
 0xc14   :  { %8669 = vmatprep.mubr.msk.f32.mxu0 %vm9587_vm0, %v9586_v0 }
 0xc9b   :  { %v2409_v37 = vpop.f32.mrf.mxu0 }
 0xc9c   :  { %8563 = vmatmul.mubr.msk.f32.vlgmr.msra.gmra.mxu1 %vm692_vm5, %v2409_v37 }
 0xc9d   :  { %v8545_v38 = vpop.f32.mrf.mxu0  ;;  %8565 = vmatprep.mubr.msk.f32.mxu1 %vm9587_vm0, %v9586_v0  ;;  %8597 = vmatpush3.xpose.msk.msra.mxu1 %vm272_vm2, %v7420_v21 }
 0xc9e   :  { %8598 = vmatprep.subr.mxu1 %v9586_v0 }
 0xc9f   :  { %v2414_v1 = vpop.f32.mrf.mxu0 }
 0xca0   :  { %8566 = vmatmul.mubr.msk.f32.gmra.mxu1 %vm692_vm5, %v2414_v1 }
 0xca1   :  { %v8548_v23 = vpop.f32.mrf.mxu0  ;;  %8568 = vmatprep.mubr.msk.f32.mxu1 %vm9587_vm0, %v9586_v0  ;;  %8599 = vmatpush3.xpose.msk.msra.mxu1 %vm272_vm2, %v7419_v40 }
 0xca2   :  { %8634 = vmatprep.subr.mxu1 %v9586_v0 }
 0xca3   :  { %v2419_v41 = vpop.f32.mrf.mxu0 }
 0xca4   :  { %8569 = vmatmul.mubr.msk.f32.gmra.mxu1 %vm692_vm5, %v2419_v41 }
 0xca5   :  { %v8551_v42 = vpop.f32.mrf.mxu0  ;;  %8571 = vmatprep.mubr.msk.f32.mxu1 %vm9587_vm0, %v9586_v0 }
 0xca7   :  { %v2424_v44 = vpop.f32.mrf.mxu0 }
 0xca8   :  { %8572 = vmatmul.mubr.msk.f32.gmra.mxu1 %vm692_vm5, %v2424_v44 }
 0xca9   :  { %v8554_v45 = vpop.f32.mrf.mxu0  ;;  %8574 = vmatprep.mubr.msk.f32.mxu1 %vm9587_vm0, %v9586_v0 }
 0xcab   :  { %v2429_v7 = vpop.f32.mrf.mxu0 }
 0xcac   :  { %8575 = vmatmul.mubr.msk.f32.gmra.mxu1 %vm692_vm5, %v2429_v7 }
 0xcad   :  { %v8557_v48 = vpop.f32.mrf.mxu0  ;;  %8600 = vmatprep.mubr.msk.f32.mxu1 %vm9587_vm0, %v9586_v0 }
 0xcaf   :  { %v10531_v51 = vpop.f32.mrf.mxu0 }
 0xcb0   :  { %8601 = vmatmul.mubr.msk.f32.vlgmr.msra.gmra.mxu1 %vm272_vm2, %v9831_v27 }
 0xcb1   :  { %v8583_v54 = vpop.f32.mrf.mxu0  ;;  %8603 = vmatprep.mubr.msk.f32.mxu1 %vm9587_vm0, %v9586_v0 }
 0xcb3   :  { %v10537_v57 = vpop.f32.mrf.mxu0 }
 0xcb4   :  { %8604 = vmatmul.mubr.msk.f32.gmra.mxu1 %vm272_vm2, %v9845_v33 }
 0xcb5   :  { %v8586_v60 = vpop.f32.mrf.mxu0  ;;  %8606 = vmatprep.mubr.msk.f32.mxu1 %vm9587_vm0, %v9586_v0 }
 0xcb7   :  { %v10543_v2 = vpop.f32.mrf.mxu0 }
 0xcb8   :  { %8607 = vmatmul.mubr.msk.f32.gmra.mxu1 %vm272_vm2, %v9861_v39 }
 0xcb9   :  { %v8589_v4 = vpop.f32.mrf.mxu0  ;;  %8609 = vmatprep.mubr.msk.f32.mxu1 %vm9587_vm0, %v9586_v0 }
 0xcbb   :  { %v10549_v27 = vpop.f32.mrf.mxu0 }
 0xcbc   :  { %8610 = vmatmul.mubr.msk.f32.gmra.mxu1 %vm272_vm2, %v9874_v43 }
 0xcbd   :  { %v8592_v8 = vpop.f32.mrf.mxu0  ;;  %8612 = vmatprep.mubr.msk.f32.mxu1 %vm9587_vm0, %v9586_v0 }
 0xcbe   :  { %v7411_v8 = vld [vmem:[%s11559_s10 + $0x3] ss:$0 sm:$0xff] }
 0xcbf   :  { %v10555_v33 = vpop.f32.mrf.mxu0 }
 0xcc0   :  { %8613 = vmatmul.mubr.msk.f32.gmra.mxu1 %vm272_vm2, %v9885_v46 }
 0xcc1   :  { %v8595_v49 = vpop.f32.mrf.mxu0  ;;  %8644 = vmatprep.mubr.msk.f32.mxu1 %vm9587_vm0, %v9586_v0 }
 0xcc3   :  { %v2843_v39 = vpop.f32.mrf.mxu0 }
 0xcc4   :  { %v2844_v20 = vadd.f32 %v7433_v13, %v2843_v39  ;;  %v2630_v39 = vadd.f32 %v7411_v8, %v10531_v51  ;;  %v2645_v51 = vadd.f32 %v7411_v8, %v10549_v27 }
 0xcc5   :  { %v8621_v55 = vpop.f32.mrf.mxu0 }
 0xcc6   :  { %v2635_v55 = vadd.f32 %v7411_v8, %v10537_v57  ;;  %v2650_v57 = vadd.f32 %v7411_v8, %v10555_v33 }
 0xcc7   :  { %v2848_v59 = vpop.f32.mrf.mxu0 }
 0xcc8   :  { %v2849_v47 = vadd.f32 %v7433_v13, %v2848_v59  ;;  %v2640_v59 = vadd.f32 %v7411_v8, %v10543_v2 }
 0xcc9   :  { %v8624_v61 = vpop.f32.mrf.mxu0 }
 0xccb   :  { %v2853_v50 = vpop.f32.mrf.mxu0 }
 0xccc   :  { %v2854_v5 = vadd.f32 %v7433_v13, %v2853_v50 }
 0xccd   :  { %v8627_v10 = vpop.f32.mrf.mxu0 }
 0xcce   :  { %v9398_v10 = vld [vmem:[#allocation6] sm:$0xff] }
 0xccf   :  { %v2858_v43 = vpop.f32.mrf.mxu0 }
 0xcd0   :  { %v2859_v46 = vadd.f32 %v7433_v13, %v2858_v43 }
 0xcd1   :  { %v8630_v56 = vpop.f32.mrf.mxu0 }
 0xcd3   :  { %v2863_v15 = vpop.f32.mrf.mxu0 }
 0xcd4   :  { %v2864_v62 = vadd.f32 %v7433_v13, %v2863_v15 }
 0xcd5   :  { %v8633_v17 = vpop.f32.mrf.mxu0 }
 0xcd6   :  { %8660 = vmatpush3.msk.msra.mxu0 %vm895_vm4, %v2864_v62  ;;  %v9399_v62 = vld [vmem:[#allocation6 + $0x8] sm:$0xff] }
 0xcd7   :  { %8661 = vmatprep.subr.mxu0 %v9586_v0 }
 0xcd8   :  { %8662 = vmatpush3.msra.mxu0 %v2859_v46 }
 0xcd9   :  { %8663 = vmatprep.subr.mxu0 %v9586_v0 }
 0xcda   :  { %8664 = vmatpush3.msra.mxu0 %v2854_v5 }
 0xcdb   :  { %8665 = vmatprep.subr.mxu0 %v9586_v0 }
 0xcdc   :  { %8666 = vmatpush3.msra.mxu0 %v2849_v47 }
 0xcdd   :  { %8667 = vmatprep.subr.mxu0 %v9586_v0 }
 0xcde   :  { %8668 = vmatpush3.msra.mxu0 %v2844_v20  ;;  %v9400_v20 = vld [vmem:[#allocation6 + $0x10] sm:$0xff] }
 0xcdf   :  { %8703 = vmatprep.subr.mxu0 %v9586_v0 }
 0xd5c   :  { %v2517_v25 = vpop.f32.mrf.mxu1 }
 0xd5d   :  { %v10572_v28 = vadd.f32 %v2517_v25, %v1796_v22 }
 0xd5e   :  { %v8564_v52 = vpop.f32.mrf.mxu1 }
 0xd60   :  { %v2522_v30 = vpop.f32.mrf.mxu1 }
 0xd61   :  { %v10576_v32 = vadd.f32 %v2522_v30, %v1801_v16 }
 0xd62   :  { %v8567_v58 = vpop.f32.mrf.mxu1 }
 0xd63   :  { %v9401_v58 = vld [vmem:[#allocation6 + $0x18] sm:$0xff] }
 0xd64   :  { %v2527_v36 = vpop.f32.mrf.mxu1 }
 0xd65   :  { %v10580_v21 = vadd.f32 %v2527_v36, %v1806_v35 }
 0xd66   :  { %v8570_v37 = vpop.f32.mrf.mxu1 }
 0xd68   :  { %v2532_v63 = vpop.f32.mrf.mxu1 }
 0xd69   :  { %v10584_v38 = vadd.f32 %v2532_v63, %v1811_v11 }
 0xd6a   :  { %v8573_v40 = vpop.f32.mrf.mxu1 }
 0xd6b   :  { %v9402_v40 = vld [vmem:[#allocation6 + $0x20] sm:$0x3] }
 0xd6c   :  { %v2537_v3 = vpop.f32.mrf.mxu1 }
 0xd6d   :  { %v10588_v1 = vadd.f32 %v2537_v3, %v1816_v26 }
 0xd6e   :  { %v8576_v23 = vpop.f32.mrf.mxu1 }
 0xd70   :  { %v2736_v41 = vpop.f32.mrf.mxu1 }
 0xd71   :  { %v2737_v49 = vadd.f32 %v7422_v18, %v2736_v41 }
 0xd72   :  { %v8602_v12 = vpop.f32.mrf.mxu1 }
 0xd74   :  { %v2741_v6 = vpop.f32.mrf.mxu1 }
 0xd75   :  { %v2742_v4 = vadd.f32 %v7422_v18, %v2741_v6 }
 0xd76   :  { %v8605_v42 = vpop.f32.mrf.mxu1 }
 0xd78   :  { %v2746_v44 = vpop.f32.mrf.mxu1 }
 0xd79   :  { %v2747_v53 = vadd.f32 %v7422_v18, %v2746_v44 }
 0xd7a   :  { %v8608_v45 = vpop.f32.mrf.mxu1 }
 0xd7c   :  { %v2751_v7 = vpop.f32.mrf.mxu1 }
 0xd7d   :  { %v2752_v31 = vadd.f32 %v7422_v18, %v2751_v7 }
 0xd7e   :  { %v8611_v48 = vpop.f32.mrf.mxu1 }
 0xd80   :  { %v2756_v9 = vpop.f32.mrf.mxu1 }
 0xd81   :  { %v2757_v54 = vadd.f32 %v7422_v18, %v2756_v9 }
 0xd82   :  { %v8614_v60 = vpop.f32.mrf.mxu1 }
 0xd83   :  { %8635 = vmatpush3.xpose.msk.msra.mxu1 %vm692_vm5, %v2757_v54 }
 0xd84   :  { %8636 = vmatprep.subr.mxu1 %v9586_v0 }
 0xd87   :  { %8637 = vmatpush3.xpose.msk.msra.mxu1 %vm692_vm5, %v2752_v31 }
 0xd88   :  { %8638 = vmatprep.subr.mxu1 %v9586_v0 }
 0xd8b   :  { %8639 = vmatpush3.xpose.msk.msra.mxu1 %vm692_vm5, %v2747_v53 }
 0xd8c   :  { %8640 = vmatprep.subr.mxu1 %v9586_v0 }
 0xd8f   :  { %8641 = vmatpush3.xpose.msk.msra.mxu1 %vm692_vm5, %v2742_v4 }
 0xd90   :  { %8642 = vmatprep.subr.mxu1 %v9586_v0 }
 0xd93   :  { %8643 = vmatpush3.xpose.msk.msra.mxu1 %vm692_vm5, %v2737_v49 }
 0xd94   :  { %8684 = vmatprep.subr.mxu1 %v9586_v0 }
 0xd96   :  { %8645 = vmatmul.mubr.msk.f32.vlgmr.msra.gmra.mxu1 %vm692_vm5, %v2630_v39 }
 0xd97   :  { %8647 = vmatprep.mubr.msk.f32.mxu1 %vm9587_vm0, %v9586_v0 }
 0xd9a   :  { %8648 = vmatmul.mubr.msk.f32.gmra.mxu1 %vm692_vm5, %v2635_v55 }
 0xd9b   :  { %8650 = vmatprep.mubr.msk.f32.mxu1 %vm9587_vm0, %v9586_v0 }
 0xd9e   :  { %8651 = vmatmul.mubr.msk.f32.gmra.mxu1 %vm692_vm5, %v2640_v59 }
 0xd9f   :  { %8653 = vmatprep.mubr.msk.f32.mxu1 %vm9587_vm0, %v9586_v0 }
 0xda2   :  { %8654 = vmatmul.mubr.msk.f32.gmra.mxu1 %vm692_vm5, %v2645_v51 }
 0xda3   :  { %8656 = vmatprep.mubr.msk.f32.mxu1 %vm9587_vm0, %v9586_v0 }
 0xda6   :  { %8657 = vmatmul.mubr.msk.f32.gmra.mxu1 %vm692_vm5, %v2650_v57 }
 0xda7   :  { %8688 = vmatprep.mubr.msk.f32.mxu1 %vm9587_vm0, %v9586_v0 }
 0xe56   :  { %v2963_v2 = vpop.f32.mrf.mxu1 }
 0xe57   :  { %v2987_v61 = vmul.f32 0.25, %v2963_v2 }
 0xe58   :  { %v8646_v50 = vpop.f32.mrf.mxu1 }
 0xe59   :  { %v2992_v43 = vadd.f32 %v9398_v10, %v2987_v61  ;;  %v7458_v50 = vld [vmem:[%s11558_s9 + $0xf8] sm:$0xff] }
 0xe5a   :  { %v2968_v56 = vpop.f32.mrf.mxu1  ;;  %8685 = vmatpush3.msra.mxu1 %v7458_v50 }
 0xe5b   :  { %v2988_v13 = vmul.f32 0.25, %v2968_v56  ;;  %v2997_v27 = vsel %vm823_vm6, %v2992_v43, -inf  ;;  %8686 = vmatprep.subr.mxu1 %v9586_v0 }
 0xe5c   :  { %2998 = vmax.xlane.f32.xlu0 %v2997_v27  ;;  %v8649_v15 = vpop.f32.mrf.mxu1 }
 0xe5d   :  { %v2993_v17 = vadd.f32 %v9399_v62, %v2988_v13 }
 0xe5e   :  { %v2973_v46 = vpop.f32.mrf.mxu1 }
 0xe5f   :  { %v2989_v33 = vmul.f32 0.25, %v2973_v46  ;;  %v3000_v5 = vsel %vm823_vm6, %v2993_v17, -inf }
 0xe60   :  { %3001 = vmax.xlane.f32.xlu1 %v3000_v5  ;;  %v8652_v47 = vpop.f32.mrf.mxu1 }
 0xe61   :  { %v2994_v22 = vadd.f32 %v9400_v20, %v2989_v33 }
 0xe62   :  { %v2978_v25 = vpop.f32.mrf.mxu1 }
 0xe63   :  { %v2990_v52 = vmul.f32 0.25, %v2978_v25  ;;  %v3003_v16 = vsel %vm823_vm6, %v2994_v22, -inf }
 0xe64   :  { %3004 = vmax.xlane.f32.xlu0 %v3003_v16  ;;  %v8655_v30 = vpop.f32.mrf.mxu1 }
 0xe65   :  { %v2995_v35 = vadd.f32 %v9401_v58, %v2990_v52  ;;  %v7457_v52 = vld [vmem:[%s11558_s9 + $0xf0] sm:$0xff] }
 0xe66   :  { %v2983_v36 = vpop.f32.mrf.mxu1  ;;  %8687 = vmatpush3.msra.mxu1 %v7457_v52 }
 0xe67   :  { %v2991_v37 = vmul.f32 0.25, %v2983_v36  ;;  %v3006_v11 = vsel %vm823_vm6, %v2995_v35, -inf  ;;  %8734 = vmatprep.subr.mxu1 %v9586_v0 }
 0xe68   :  { %3007 = vmax.xlane.f32.xlu1 %v3006_v11  ;;  %v8658_v63 = vpop.f32.mrf.mxu1 }
 0xe69   :  { %v2996_v26 = vadd.f32 %v9402_v40, %v2991_v37 }
 0xe6b   :  { %v3009_v3 = vsel %vm836_vm7, %v2996_v26, -inf }
 0xe6c   :  { %3010 = vmax.xlane.f32.xlu0 %v3009_v3 }
 0xee5   :  { %v2999_v23 = vpop.xlane.xlu0 %2998 }
 0xee6   :  { %v3012_v41 = vsub.f32 %v2992_v43, %v2999_v23 }
 0xee8   :  { %v3017_v12 = vmul.f32 1.442695, %v3012_v41  ;;  %v7464_v41 = vld [vmem:[#allocation14 + $0x6] ss:$0 sm:$0xff] }
 0xee9   :  { %v3002_v6 = vpop.xlane.xlu1 %3001 }
 0xeea   :  { %9262 = vpow2.f32 %v3017_v12  ;;  %v3013_v42 = vsub.f32 %v2993_v17, %v3002_v6 }
 0xeec   :  { %v3019_v44 = vmul.f32 1.442695, %v3013_v42 }
 0xeed   :  { %v3005_v45 = vpop.xlane.xlu0 %3004 }
 0xeee   :  { %9264 = vpow2.f32 %v3019_v44  ;;  %v3014_v7 = vsub.f32 %v2994_v22, %v3005_v45 }
 0xef0   :  { %v3021_v48 = vmul.f32 1.442695, %v3014_v7 }
 0xef1   :  { %v3008_v18 = vpop.xlane.xlu1 %3007 }
 0xef2   :  { %9266 = vpow2.f32 %v3021_v48  ;;  %v3015_v9 = vsub.f32 %v2995_v35, %v3008_v18 }
 0xef4   :  { %v3023_v54 = vmul.f32 1.442695, %v3015_v9 }
 0xef5   :  { %v3011_v60 = vpop.xlane.xlu0 %3010 }
 0xef6   :  { %9268 = vpow2.f32 %v3023_v54  ;;  %v3016_v31 = vsub.f32 %v2996_v26, %v3011_v60 }
 0xef7   :  { %v9263_v53 = vpop.eup %9262 }
 0xef8   :  { %v3025_v4 = vmul.f32 1.442695, %v3016_v31  ;;  %v3027_v8 = vsel %vm823_vm6, %v9263_v53, 0.0 }
 0xef9   :  { %3028 = vadd.xlane.f32.xlu1 %v3027_v8 }
 0xefa   :  { %9270 = vpow2.f32 %v3025_v4 }
 0xefb   :  { %v9265_v49 = vpop.eup %9264 }
 0xefc   :  { %v3030_v39 = vsel %vm823_vm6, %v9265_v49, 0.0 }
 0xefd   :  { %3031 = vadd.xlane.f32.xlu0 %v3030_v39 }
 0xeff   :  { %v9267_v55 = vpop.eup %9266 }
 0xf00   :  { %v3033_v59 = vsel %vm823_vm6, %v9267_v55, 0.0 }
 0xf01   :  { %3034 = vadd.xlane.f32.xlu1 %v3033_v59 }
 0xf03   :  { %v9269_v51 = vpop.eup %9268 }
 0xf04   :  { %v3036_v57 = vsel %vm823_vm6, %v9269_v51, 0.0 }
 0xf05   :  { %3037 = vadd.xlane.f32.xlu0 %v3036_v57 }
 0xf07   :  { %v9271_v2 = vpop.eup %9270 }
 0xf08   :  { %v3039_v61 = vsel %vm836_vm7, %v9271_v2, 0.0 }
 0xf09   :  { %3040 = vadd.xlane.f32.xlu1 %v3039_v61 }
 0xf82   :  { %v3029_v10 = vpop.xlane.xlu1 %3028 }
 0xf83   :  { %9272 = vrcp.f32 %v3029_v10 }
 0xf86   :  { %v3032_v43 = vpop.xlane.xlu0 %3031 }
 0xf87   :  { %9274 = vrcp.f32 %v3032_v43 }
 0xf8a   :  { %v3035_v56 = vpop.xlane.xlu1 %3034 }
 0xf8b   :  { %9276 = vrcp.f32 %v3035_v56 }
 0xf8e   :  { %v3038_v13 = vpop.xlane.xlu0 %3037 }
 0xf8f   :  { %9278 = vrcp.f32 %v3038_v13 }
 0xf90   :  { %v9273_v27 = vpop.eup %9272 }
 0xf91   :  { %v3047_v15 = vmul.f32 %v9273_v27, %v9263_v53 }
 0xf92   :  { %v3041_v62 = vpop.xlane.xlu1 %3040 }
 0xf93   :  { %9280 = vrcp.f32 %v3041_v62  ;;  %8670 = vmatmul.mubr.msk.f32.vlgmr.msra.gmra.mxu0 %vm823_vm6, %v3047_v15 }
 0xf94   :  { %v9275_v17 = vpop.eup %9274  ;;  %8672 = vmatprep.mubr.msk.f32.mxu0 %vm9587_vm0, %v9586_v0 }
 0xf95   :  { %v3048_v46 = vmul.f32 %v9275_v17, %v9265_v49 }
 0xf97   :  { %8673 = vmatmul.mubr.msk.f32.gmra.mxu0 %vm823_vm6, %v3048_v46 }
 0xf98   :  { %v9277_v33 = vpop.eup %9276  ;;  %8675 = vmatprep.mubr.msk.f32.mxu0 %vm9587_vm0, %v9586_v0 }
 0xf99   :  { %v3049_v5 = vmul.f32 %v9277_v33, %v9267_v55 }
 0xf9b   :  { %8676 = vmatmul.mubr.msk.f32.gmra.mxu0 %vm823_vm6, %v3049_v5 }
 0xf9c   :  { %v9279_v47 = vpop.eup %9278  ;;  %8678 = vmatprep.mubr.msk.f32.mxu0 %vm9587_vm0, %v9586_v0 }
 0xf9d   :  { %v3050_v20 = vmul.f32 %v9279_v47, %v9269_v51 }
 0xf9f   :  { %8679 = vmatmul.mubr.msk.f32.gmra.mxu0 %vm823_vm6, %v3050_v20 }
 0xfa0   :  { %v9281_v22 = vpop.eup %9280  ;;  %8681 = vmatprep.mubr.msk.f32.mxu0 %vm9587_vm0, %v9586_v0 }
 0xfa1   :  { %v3051_v25 = vmul.f32 %v9281_v22, %v9271_v2 }
 0xfa3   :  { %8682 = vmatmul.mubr.msk.f32.gmra.mxu0 %vm823_vm6, %v3051_v25 }
 0xfa4   :  { %8719 = vmatprep.mubr.msk.f32.mxu0 %vm9587_vm0, %v9586_v0 }
0x1053   :  { %v3136_v16 = vpop.f32.mrf.mxu0 }
0x1054   :  { %8689 = vmatmul.mubr.msk.f32.vlgmr.msra.gmra.mxu1 %vm692_vm5, %v3136_v16 }
0x1055   :  { %v8671_v30 = vpop.f32.mrf.mxu0  ;;  %8691 = vmatprep.mubr.msk.f32.mxu1 %vm9587_vm0, %v9586_v0 }
0x1057   :  { %v3141_v58 = vpop.f32.mrf.mxu0 }
0x1058   :  { %8692 = vmatmul.mubr.msk.f32.gmra.mxu1 %vm692_vm5, %v3141_v58 }
0x1059   :  { %v8674_v35 = vpop.f32.mrf.mxu0  ;;  %8694 = vmatprep.mubr.msk.f32.mxu1 %vm9587_vm0, %v9586_v0 }
0x105a   :  { %v3380_v35 = vld [vmem:[#allocation12 + $0x38] sm:$0xff] }
0x105b   :  { %v3146_v36 = vpop.f32.mrf.mxu0  ;;  %8704 = vmatpush3.msra.mxu0 %v3380_v35  ;;  %v3538_v35 = vld [vmem:[%s11561_s12 + $0x10] sm:$0xff] }
0x105c   :  { %8695 = vmatmul.mubr.msk.f32.gmra.mxu1 %vm692_vm5, %v3146_v36  ;;  %8705 = vmatprep.subr.mxu0 %v9586_v0  ;;  %v3379_v36 = vld [vmem:[#allocation12 + $0x30] sm:$0xff] }
0x105d   :  { %v8677_v37 = vpop.f32.mrf.mxu0  ;;  %8697 = vmatprep.mubr.msk.f32.mxu1 %vm9587_vm0, %v9586_v0  ;;  %8706 = vmatpush3.msra.mxu0 %v3379_v36  ;;  %v3537_v36 = vld [vmem:[%s11561_s12 + $0x8] sm:$0xff] }
0x105e   :  { %8707 = vmatprep.subr.mxu0 %v9586_v0  ;;  %v3378_v37 = vld [vmem:[#allocation12 + $0x28] sm:$0xff] }
0x105f   :  { %v3151_v11 = vpop.f32.mrf.mxu0  ;;  %8708 = vmatpush3.msra.mxu0 %v3378_v37  ;;  %v3536_v37 = vld [vmem:[%s11561_s12] sm:$0xff] }
0x1060   :  { %8698 = vmatmul.mubr.msk.f32.gmra.mxu1 %vm692_vm5, %v3151_v11  ;;  %8709 = vmatprep.subr.mxu0 %v9586_v0  ;;  %v3377_v11 = vld [vmem:[#allocation12 + $0x20] sm:$0xff] }
0x1061   :  { %v8680_v63 = vpop.f32.mrf.mxu0  ;;  %8700 = vmatprep.mubr.msk.f32.mxu1 %vm9587_vm0, %v9586_v0  ;;  %8710 = vmatpush3.msra.mxu0 %v3377_v11  ;;  %v7467_v11 = vld [vmem:[#allocation14 + $0x8] ss:$0 sm:$0xff] }
0x1062   :  { %8711 = vmatprep.subr.mxu0 %v9586_v0  ;;  %v3376_v63 = vld [vmem:[#allocation12 + $0x18] sm:$0xff] }
0x1063   :  { %v3156_v40 = vpop.f32.mrf.mxu0  ;;  %8712 = vmatpush3.msra.mxu0 %v3376_v63 }
0x1064   :  { %8701 = vmatmul.mubr.msk.f32.gmra.mxu1 %vm692_vm5, %v3156_v40  ;;  %8713 = vmatprep.subr.mxu0 %v9586_v0  ;;  %v3375_v40 = vld [vmem:[#allocation12 + $0x10] sm:$0xff] }
0x1065   :  { %v8683_v26 = vpop.f32.mrf.mxu0  ;;  %8766 = vmatprep.mubr.msk.f32.mxu1 %vm9587_vm0, %v9586_v0  ;;  %8714 = vmatpush3.msra.mxu0 %v3375_v40 }
0x1066   :  { %8715 = vmatprep.subr.mxu0 %v9586_v0  ;;  %v3374_v26 = vld [vmem:[#allocation12 + $0x8] sm:$0xff] }
0x1067   :  { %8716 = vmatpush3.msra.mxu0 %v3374_v26 }
0x1068   :  { %8717 = vmatprep.subr.mxu0 %v9586_v0 }
0x1114   :  { %v3244_v3 = vpop.f32.mrf.mxu1 }
0x1115   :  { %v3268_v23 = vadd.f32 %v3244_v3, %v10572_v28  ;;  %v3373_v3 = vld [vmem:[#allocation12] sm:$0xff] }
0x1116   :  { %v8690_v12 = vpop.f32.mrf.mxu1  ;;  %8718 = vmatpush3.msra.mxu0 %v3373_v3 }
0x1117   :  { %v3273_v6 = vadd.f32 %v3268_v23, %v9765_v14  ;;  %8781 = vmatprep.subr.mxu0 %v9586_v0 }
0x1118   :  { %v3249_v42 = vpop.f32.mrf.mxu1 }
0x1119   :  { %v10676_v44 = vadd.f32 %v7464_v41, %v3273_v6  ;;  %v3269_v45 = vadd.f32 %v3249_v42, %v10576_v32 }
0x111a   :  { %v8693_v7 = vpop.f32.mrf.mxu1 }
0x111b   :  { %v3274_v48 = vadd.f32 %v3269_v45, %v9769_v19  ;;  %v3290_v18 = vsel %vm272_vm2, %v10676_v44, 0.0 }
0x111c   :  { %3291 = vadd.xlane.f32.xlu0 %v3290_v18  ;;  %v3254_v9 = vpop.f32.mrf.mxu1 }
0x111d   :  { %v10682_v54 = vadd.f32 %v7464_v41, %v3274_v48  ;;  %v3270_v28 = vadd.f32 %v3254_v9, %v10580_v21 }
0x111e   :  { %v8696_v60 = vpop.f32.mrf.mxu1 }
0x111f   :  { %v3275_v14 = vadd.f32 %v3270_v28, %v9773_v24  ;;  %v3293_v31 = vsel %vm272_vm2, %v10682_v54, 0.0 }
0x1120   :  { %3294 = vadd.xlane.f32.xlu1 %v3293_v31  ;;  %v3259_v32 = vpop.f32.mrf.mxu1 }
0x1121   :  { %v10688_v53 = vadd.f32 %v7464_v41, %v3275_v14  ;;  %v3271_v19 = vadd.f32 %v3259_v32, %v10584_v38 }
0x1122   :  { %v8699_v4 = vpop.f32.mrf.mxu1 }
0x1123   :  { %v3276_v8 = vadd.f32 %v3271_v19, %v9777_v29  ;;  %v3296_v49 = vsel %vm272_vm2, %v10688_v53, 0.0  ;;  %v7465_v19 = vld [vmem:[#allocation14 + $0x2] ss:$0 sm:$0xff] }
0x1124   :  { %3297 = vadd.xlane.f32.xlu0 %v3296_v49  ;;  %v3264_v21 = vpop.f32.mrf.mxu1  ;;  %v7466_v49 = vld [vmem:[#allocation14 + $0x3] ss:$0 sm:$0xff] }
0x1125   :  { %v10694_v39 = vadd.f32 %v7464_v41, %v3276_v8  ;;  %v3272_v24 = vadd.f32 %v3264_v21, %v10588_v1 }
0x1126   :  { %v8702_v55 = vpop.f32.mrf.mxu1 }
0x1127   :  { %v3277_v59 = vadd.f32 %v3272_v24, %v9781_v34  ;;  %v3299_v51 = vsel %vm272_vm2, %v10694_v39, 0.0 }
0x1128   :  { %3300 = vadd.xlane.f32.xlu1 %v3299_v51 }
0x1129   :  { %v10700_v38 = vadd.f32 %v7464_v41, %v3277_v59 }
0x112b   :  { %v3302_v29 = vsel %vm285_vm3, %v10700_v38, 0.0 }
0x112c   :  { %3303 = vadd.xlane.f32.xlu0 %v3302_v29 }
0x11a5   :  { %v3292_v57 = vpop.xlane.xlu0 %3291 }
0x11a6   :  { %v3305_v2 = vmul.f32 0.015625, %v3292_v57 }
0x11a8   :  { %v10705_v61 = vsub.f32 %v10676_v44, %v3305_v2 }
0x11a9   :  { %v3295_v50 = vpop.xlane.xlu1 %3294 }
0x11aa   :  { %v3306_v1 = vmul.f32 0.015625, %v3295_v50  ;;  %v3315_v34 = vmul.f32 %v10705_v61, %v10705_v61 }
0x11ac   :  { %v10710_v10 = vsub.f32 %v10682_v54, %v3306_v1  ;;  %v3320_v43 = vsel %vm272_vm2, %v3315_v34, 0.0 }
0x11ad   :  { %v3298_v56 = vpop.xlane.xlu0 %3297  ;;  %3321 = vadd.xlane.f32.xlu1 %v3320_v43 }
0x11ae   :  { %v3307_v13 = vmul.f32 0.015625, %v3298_v56  ;;  %v3316_v27 = vmul.f32 %v10710_v10, %v10710_v10 }
0x11b0   :  { %v10716_v15 = vsub.f32 %v10688_v53, %v3307_v13  ;;  %v3323_v62 = vsel %vm272_vm2, %v3316_v27, 0.0 }
0x11b1   :  { %v3301_v17 = vpop.xlane.xlu1 %3300  ;;  %3324 = vadd.xlane.f32.xlu0 %v3323_v62  ;;  %v3551_v62 = vld [vmem:[%s11561_s12 + $0x78] sm:$0xff] }
0x11b2   :  { %v3308_v46 = vmul.f32 0.015625, %v3301_v17  ;;  %v3317_v33 = vmul.f32 %v10716_v15, %v10716_v15  ;;  %8735 = vmatpush3.msra.mxu1 %v3551_v62  ;;  %v3550_v17 = vld [vmem:[%s11561_s12 + $0x70] sm:$0xff] }
0x11b3   :  { %8736 = vmatprep.subr.mxu1 %v9586_v0 }
0x11b4   :  { %v10722_v5 = vsub.f32 %v10694_v39, %v3308_v46  ;;  %v3326_v47 = vsel %vm272_vm2, %v3317_v33, 0.0  ;;  %8737 = vmatpush3.msra.mxu1 %v3550_v17  ;;  %v3549_v46 = vld [vmem:[%s11561_s12 + $0x68] sm:$0xff]  ;;  %v3548_v33 = vld [vmem:[%s11561_s12 + $0x60] sm:$0xff] }
0x11b5   :  { %3327 = vadd.xlane.f32.xlu1 %v3326_v47  ;;  %v3304_v20 = vpop.xlane.xlu0 %3303  ;;  %8738 = vmatprep.subr.mxu1 %v9586_v0  ;;  %v3546_v47 = vld [vmem:[%s11561_s12 + $0x50] sm:$0xff] }
0x11b6   :  { %v3309_v22 = vmul.f32 0.015625, %v3304_v20  ;;  %v3318_v25 = vmul.f32 %v10722_v5, %v10722_v5  ;;  %8739 = vmatpush3.msra.mxu1 %v3549_v46  ;;  %v3545_v20 = vld [vmem:[%s11561_s12 + $0x48] sm:$0xff] }
0x11b7   :  { %8740 = vmatprep.subr.mxu1 %v9586_v0 }
0x11b8   :  { %v10728_v52 = vsub.f32 %v10700_v38, %v3309_v22  ;;  %v3329_v16 = vsel %vm272_vm2, %v3318_v25, 0.0  ;;  %8741 = vmatpush3.msra.mxu1 %v3548_v33  ;;  %v3544_v22 = vld [vmem:[%s11561_s12 + $0x40] sm:$0xff]  ;;  %v3543_v25 = vld [vmem:[%s11561_s12 + $0x38] sm:$0xff] }
0x11b9   :  { %3330 = vadd.xlane.f32.xlu0 %v3329_v16  ;;  %8742 = vmatprep.subr.mxu1 %v9586_v0  ;;  %v3541_v16 = vld [vmem:[%s11561_s12 + $0x28] sm:$0xff] }
0x11ba   :  { %v3319_v30 = vmul.f32 %v10728_v52, %v10728_v52 }
0x11bc   :  { %v3332_v58 = vsel %vm285_vm3, %v3319_v30, 0.0  ;;  %v3540_v30 = vld [vmem:[%s11561_s12 + $0x20] sm:$0xff] }
0x11bd   :  { %3333 = vadd.xlane.f32.xlu1 %v3332_v58  ;;  %v3539_v58 = vld [vmem:[%s11561_s12 + $0x18] sm:$0xff] }
0x1236   :  { %v3322_v23 = vpop.xlane.xlu1 %3321 }
0x1237   :  { %v3335_v41 = vmul.f32 0.015625, %v3322_v23 }
0x1239   :  { %v3340_v12 = vadd.f32 1e-05, %v3335_v41 }
0x123a   :  { %v3325_v6 = vpop.xlane.xlu0 %3324 }
0x123b   :  { %9282 = vrsqrt.f32 %v3340_v12  ;;  %v3336_v42 = vmul.f32 0.015625, %v3325_v6 }
0x123d   :  { %v3341_v45 = vadd.f32 1e-05, %v3336_v42 }
0x123e   :  { %v3328_v7 = vpop.xlane.xlu1 %3327 }
0x123f   :  { %9284 = vrsqrt.f32 %v3341_v45  ;;  %v3337_v48 = vmul.f32 0.015625, %v3328_v7 }
0x1241   :  { %v3342_v18 = vadd.f32 1e-05, %v3337_v48 }
0x1242   :  { %v3331_v9 = vpop.xlane.xlu0 %3330 }
0x1243   :  { %9286 = vrsqrt.f32 %v3342_v18  ;;  %v3338_v28 = vmul.f32 0.015625, %v3331_v9 }
0x1245   :  { %v3343_v60 = vadd.f32 1e-05, %v3338_v28 }
0x1246   :  { %v3334_v14 = vpop.xlane.xlu1 %3333 }
0x1247   :  { %9288 = vrsqrt.f32 %v3343_v60  ;;  %v3339_v31 = vmul.f32 0.015625, %v3334_v14 }
0x1248   :  { %v9283_v32 = vpop.eup %9282 }
0x1249   :  { %v3350_v4 = vmul.f32 %v9283_v32, %v10705_v61  ;;  %v3344_v8 = vadd.f32 1e-05, %v3339_v31 }
0x124b   :  { %v3359_v21 = vmul.f32 %v7465_v19, %v3350_v4  ;;  %9290 = vrsqrt.f32 %v3344_v8 }
0x124c   :  { %v9285_v24 = vpop.eup %9284 }
0x124d   :  { %v3368_v55 = vadd.f32 %v7466_v49, %v3359_v21  ;;  %v3351_v59 = vmul.f32 %v9285_v24, %v10710_v10 }
0x124f   :  { %8720 = vmatmul.mubr.msk.f32.vlgmr.msra.gmra.mxu0 %vm272_vm2, %v3368_v55  ;;  %v3360_v51 = vmul.f32 %v7465_v19, %v3351_v59 }
0x1250   :  { %v9287_v29 = vpop.eup %9286  ;;  %8722 = vmatprep.mubr.msk.f32.mxu0 %vm9587_vm0, %v9586_v0 }
0x1251   :  { %v3352_v57 = vmul.f32 %v9287_v29, %v10716_v15  ;;  %v3369_v2 = vadd.f32 %v7466_v49, %v3360_v51 }
0x1253   :  { %8723 = vmatmul.mubr.msk.f32.gmra.mxu0 %vm272_vm2, %v3369_v2  ;;  %v3361_v61 = vmul.f32 %v7465_v19, %v3352_v57 }
0x1254   :  { %v9289_v50 = vpop.eup %9288  ;;  %8725 = vmatprep.mubr.msk.f32.mxu0 %vm9587_vm0, %v9586_v0 }
0x1255   :  { %v3353_v1 = vmul.f32 %v9289_v50, %v10722_v5  ;;  %v3370_v34 = vadd.f32 %v7466_v49, %v3361_v61  ;;  %v3547_v5 = vld [vmem:[%s11561_s12 + $0x58] sm:$0xff] }
0x1256   :  { %8743 = vmatpush3.msra.mxu1 %v3547_v5 }
0x1257   :  { %8726 = vmatmul.mubr.msk.f32.gmra.mxu0 %vm272_vm2, %v3370_v34  ;;  %v3362_v10 = vmul.f32 %v7465_v19, %v3353_v1  ;;  %8744 = vmatprep.subr.mxu1 %v9586_v0 }
0x1258   :  { %v9291_v43 = vpop.eup %9290  ;;  %8728 = vmatprep.mubr.msk.f32.mxu0 %vm9587_vm0, %v9586_v0  ;;  %8745 = vmatpush3.msra.mxu1 %v3546_v47 }
0x1259   :  { %v3354_v56 = vmul.f32 %v9291_v43, %v10728_v52  ;;  %v3371_v13 = vadd.f32 %v7466_v49, %v3362_v10  ;;  %8746 = vmatprep.subr.mxu1 %v9586_v0  ;;  %v3542_v52 = vld [vmem:[%s11561_s12 + $0x30] sm:$0xff] }
0x125a   :  { %8747 = vmatpush3.msra.mxu1 %v3545_v20 }
0x125b   :  { %8729 = vmatmul.mubr.msk.f32.gmra.mxu0 %vm272_vm2, %v3371_v13  ;;  %v3363_v27 = vmul.f32 %v7465_v19, %v3354_v56  ;;  %8748 = vmatprep.subr.mxu1 %v9586_v0 }
0x125c   :  { %8731 = vmatprep.mubr.msk.f32.mxu0 %vm9587_vm0, %v9586_v0  ;;  %8749 = vmatpush3.msra.mxu1 %v3544_v22 }
0x125d   :  { %v3372_v15 = vadd.f32 %v7466_v49, %v3363_v27  ;;  %8750 = vmatprep.subr.mxu1 %v9586_v0 }
0x125e   :  { %8751 = vmatpush3.msra.mxu1 %v3543_v25 }
0x125f   :  { %8732 = vmatmul.mubr.msk.f32.gmra.mxu0 %vm272_vm2, %v3372_v15  ;;  %8752 = vmatprep.subr.mxu1 %v9586_v0 }
0x1260   :  { %8791 = vmatprep.mubr.msk.f32.mxu0 %vm9587_vm0, %v9586_v0  ;;  %8753 = vmatpush3.msra.mxu1 %v3542_v52 }
0x1261   :  { %8754 = vmatprep.subr.mxu1 %v9586_v0 }
0x1262   :  { %8755 = vmatpush3.msra.mxu1 %v3541_v16 }
0x1263   :  { %8756 = vmatprep.subr.mxu1 %v9586_v0 }
0x1264   :  { %8757 = vmatpush3.msra.mxu1 %v3540_v30 }
0x1265   :  { %8758 = vmatprep.subr.mxu1 %v9586_v0 }
0x1266   :  { %8759 = vmatpush3.msra.mxu1 %v3539_v58 }
0x1267   :  { %8760 = vmatprep.subr.mxu1 %v9586_v0 }
0x1268   :  { %8761 = vmatpush3.msra.mxu1 %v3538_v35 }
0x1269   :  { %8762 = vmatprep.subr.mxu1 %v9586_v0 }
0x126a   :  { %8763 = vmatpush3.msra.mxu1 %v3537_v36 }
0x126b   :  { %8764 = vmatprep.subr.mxu1 %v9586_v0 }
0x126c   :  { %8765 = vmatpush3.msra.mxu1 %v3536_v37 }
0x130f   :  { %v3467_v63 = vpop.f32.mrf.mxu0 }
0x1310   :  { %v3468_v40 = vadd.f32 %v7467_v11, %v3467_v63 }
0x1311   :  { %v8721_v26 = vpop.f32.mrf.mxu0 }
0x1312   :  { %v3491_v3 = vmul.f32 %v3468_v40, %v3468_v40  ;;  %v3847_v26 = vld [vmem:[%s11551_s2] sm:$0xff] }
0x1313   :  { %v3472_v23 = vpop.f32.mrf.mxu0 }
0x1314   :  { %v3496_v41 = vmul.f32 %v3491_v3, %v3468_v40  ;;  %v3473_v12 = vadd.f32 %v7467_v11, %v3472_v23  ;;  %v3849_v3 = vld [vmem:[%s11551_s2 + $0x10] sm:$0xff]  ;;  %v10842_v23 = vld [vmem:[%s11551_s2 + $0x8] sm:$0xff] }
0x1315   :  { %v8724_v6 = vpop.f32.mrf.mxu0 }
0x1316   :  { %v3501_v42 = vmul.f32 0.044715, %v3496_v41  ;;  %v3492_v45 = vmul.f32 %v3473_v12, %v3473_v12  ;;  %v3858_v41 = vsel %vm272_vm2, %v3847_v26, 0.0  ;;  %v10850_v6 = vld [vmem:[%s11551_s2 + $0x18] sm:$0xff] }
0x1317   :  { %v3477_v7 = vpop.f32.mrf.mxu0  ;;  %3859 = vadd.xlane.f32.xlu0 %v3858_v41 }
0x1318   :  { %v3506_v48 = vadd.f32 %v3501_v42, %v3468_v40  ;;  %v3497_v18 = vmul.f32 %v3492_v45, %v3473_v12  ;;  %v3478_v9 = vadd.f32 %v7467_v11, %v3477_v7  ;;  %v3864_v42 = vsel %vm272_vm2, %v3849_v3, 0.0 }
0x1319   :  { %v8727_v28 = vpop.f32.mrf.mxu0  ;;  %v3867_v45 = vsel %vm272_vm2, %v10850_v6, 0.0 }
0x131a   :  { %v3511_v60 = vmul.f32 0.7978846, %v3506_v48  ;;  %v3502_v14 = vmul.f32 0.044715, %v3497_v18  ;;  %v3493_v31 = vmul.f32 %v3478_v9, %v3478_v9 }
0x131b   :  { %v3482_v32 = vpop.f32.mrf.mxu0  ;;  %3865 = vadd.xlane.f32.xlu0 %v3864_v42 }
0x131c   :  { %9292 = vtanh.f32 %v3511_v60  ;;  %v3507_v19 = vadd.f32 %v3502_v14, %v3473_v12  ;;  %v3498_v4 = vmul.f32 %v3493_v31, %v3478_v9  ;;  %v3483_v8 = vadd.f32 %v7467_v11, %v3482_v32 }
0x131d   :  { %v8730_v49 = vpop.f32.mrf.mxu0 }
0x131e   :  { %v3512_v21 = vmul.f32 0.7978846, %v3507_v19  ;;  %v3503_v24 = vmul.f32 0.044715, %v3498_v4  ;;  %v3494_v55 = vmul.f32 %v3483_v8, %v3483_v8 }
0x131f   :  { %v3487_v59 = vpop.f32.mrf.mxu0 }
0x1320   :  { %9294 = vtanh.f32 %v3512_v21  ;;  %v3508_v51 = vadd.f32 %v3503_v24, %v3478_v9  ;;  %v3499_v29 = vmul.f32 %v3494_v55, %v3483_v8  ;;  %v3488_v57 = vadd.f32 %v7467_v11, %v3487_v59 }
0x1321   :  { %v8733_v2 = vpop.f32.mrf.mxu0 }
0x1322   :  { %v3513_v61 = vmul.f32 0.7978846, %v3508_v51  ;;  %v3504_v50 = vmul.f32 0.044715, %v3499_v29  ;;  %v3495_v1 = vmul.f32 %v3488_v57, %v3488_v57 }
0x1324   :  { %9296 = vtanh.f32 %v3513_v61  ;;  %v3509_v34 = vadd.f32 %v3504_v50, %v3483_v8  ;;  %v3500_v10 = vmul.f32 %v3495_v1, %v3488_v57 }
0x1326   :  { %v3514_v43 = vmul.f32 0.7978846, %v3509_v34  ;;  %v3505_v56 = vmul.f32 0.044715, %v3500_v10 }
0x1328   :  { %9298 = vtanh.f32 %v3514_v43  ;;  %v3510_v13 = vadd.f32 %v3505_v56, %v3488_v57 }
0x1329   :  { %v9293_v27 = vpop.eup %9292 }
0x132a   :  { %v3521_v15 = vadd.f32 1.0, %v9293_v27  ;;  %v3515_v62 = vmul.f32 0.7978846, %v3510_v13 }
0x132c   :  { %v3526_v17 = vmul.f32 0.5, %v3521_v15  ;;  %9300 = vtanh.f32 %v3515_v62 }
0x132d   :  { %v9295_v46 = vpop.eup %9294 }
0x132e   :  { %v3531_v33 = vmul.f32 %v3526_v17, %v3468_v40  ;;  %v3522_v5 = vadd.f32 1.0, %v9295_v46  ;;  %v7479_v46 = vld [vmem:[#allocation14 + $0x10] ss:$0 sm:$0xff] }
0x1330   :  { %8767 = vmatmul.mubr.f32.vlgmr.msra.gmra.mxu1 %v3531_v33  ;;  %v3527_v47 = vmul.f32 0.5, %v3522_v5  ;;  %v10871_v5 = vld [vmem:[#allocation14 + $0x11] ss:$0 sm:$0xff] }
0x1331   :  { %v9297_v20 = vpop.eup %9296  ;;  %8769 = vmatprep.mubr.msk.f32.mxu1 %vm9587_vm0, %v9586_v0 }
0x1332   :  { %v3532_v22 = vmul.f32 %v3527_v47, %v3473_v12  ;;  %v3523_v25 = vadd.f32 1.0, %v9297_v20  ;;  %v3861_v12 = vsel %vm272_vm2, %v10842_v23, 0.0 }
0x1333   :  { %3862 = vadd.xlane.f32.xlu1 %v3861_v12 }
0x1334   :  { %8770 = vmatmul.mubr.f32.gmra.mxu1 %v3532_v22  ;;  %v3528_v52 = vmul.f32 0.5, %v3523_v25 }
0x1335   :  { %v9299_v16 = vpop.eup %9298  ;;  %8772 = vmatprep.mubr.msk.f32.mxu1 %vm9587_vm0, %v9586_v0 }
0x1336   :  { %v3533_v30 = vmul.f32 %v3528_v52, %v3478_v9  ;;  %v3524_v58 = vadd.f32 1.0, %v9299_v16 }
0x1337   :  { %3868 = vadd.xlane.f32.xlu1 %v3867_v45 }
0x1338   :  { %8773 = vmatmul.mubr.f32.gmra.mxu1 %v3533_v30  ;;  %v3529_v35 = vmul.f32 0.5, %v3524_v58 }
0x1339   :  { %v9301_v36 = vpop.eup %9300  ;;  %8775 = vmatprep.mubr.msk.f32.mxu1 %vm9587_vm0, %v9586_v0 }
0x133a   :  { %v3534_v37 = vmul.f32 %v3529_v35, %v3483_v8  ;;  %v3525_v11 = vadd.f32 1.0, %v9301_v36  ;;  %v7473_v8 = vld [vmem:[#allocation14 + $0x7] ss:$0 sm:$0xff] }
0x133c   :  { %8776 = vmatmul.mubr.f32.gmra.mxu1 %v3534_v37  ;;  %v3530_v63 = vmul.f32 0.5, %v3525_v11 }
0x133d   :  { %8778 = vmatprep.mubr.msk.f32.mxu1 %vm9587_vm0, %v9586_v0 }
0x133e   :  { %v3535_v40 = vmul.f32 %v3530_v63, %v3488_v57 }
0x1340   :  { %8779 = vmatmul.mubr.f32.gmra.mxu1 %v3535_v40  ;;  %v7492_v40 = vld [vmem:[%s11558_s9 + $0x148] sm:$0xff] }
0x1341   :  { %8823 = vmatprep.subr.msk.mxu1 %vm272_vm2, %v7492_v40 }
0x1342   :  { %8824 = vmatpush3.xpose.msk.msra.mxu1 %vm272_vm2, %v7492_v40  ;;  %v7484_v40 = vld [vmem:[%s11559_s10 + $0xc] ss:$0 sm:$0xff] }
0x13bc   :  { %v3863_v56 = vpop.xlane.xlu1 %3862 }
0x13bd   :  { %v3871_v22 = vmul.f32 0.015625, %v3863_v56  ;;  %v7476_v56 = vld [vmem:[#allocation14 + $0x4] ss:$0 sm:$0xff] }
0x13bf   :  { %v3875_v25 = vsub.f32 %v10842_v23, %v3871_v22  ;;  %v7494_v22 = vld [vmem:[%s11559_s10 + $0x10] ss:$0 sm:$0xff] }
0x13c0   :  { %v3869_v13 = vpop.xlane.xlu1 %3868 }
0x13c1   :  { %v3873_v52 = vmul.f32 0.015625, %v3869_v13  ;;  %v3879_v30 = vmul.f32 %v3875_v25, %v3875_v25 }
0x13c3   :  { %v3877_v16 = vsub.f32 %v10850_v6, %v3873_v52  ;;  %v3885_v37 = vsel %vm272_vm2, %v3879_v30, 0.0 }
0x13c5   :  { %v3881_v11 = vmul.f32 %v3877_v16, %v3877_v16 }
0x13c7   :  { %v3891_v63 = vsel %vm272_vm2, %v3881_v11, 0.0 }
0x13f0   :  { %v3618_v7 = vpop.f32.mrf.mxu1 }
0x13f1   :  { %v3642_v51 = vadd.f32 %v3618_v7, %v10676_v44  ;;  %v3860_v44 = vpop.xlane.xlu0 %3859 }
0x13f2   :  { %v8768_v48 = vpop.f32.mrf.mxu1 }
0x13f4   :  { %v3623_v18 = vpop.f32.mrf.mxu1 }
0x13f5   :  { %v3643_v55 = vadd.f32 %v3623_v18, %v10682_v54  ;;  %v3870_v54 = vmul.f32 0.015625, %v3860_v44  ;;  %v3866_v2 = vpop.xlane.xlu0 %3865  ;;  %v3763_v44 = vld [vmem:[%s11562_s13 + $0x20] sm:$0xff] }
0x13f6   :  { %v8771_v9 = vpop.f32.mrf.mxu1  ;;  %v3872_v61 = vmul.f32 0.015625, %v3866_v2  ;;  %v3760_v2 = vld [vmem:[%s11562_s13 + $0x8] sm:$0xff] }
0x13f7   :  { %v3874_v57 = vsub.f32 %v3847_v26, %v3870_v54  ;;  %v7491_v26 = vld [vmem:[%s11558_s9 + $0x140] sm:$0xff]  ;;  %v3762_v54 = vld [vmem:[%s11562_s13 + $0x18] sm:$0xff] }
0x13f8   :  { %v3628_v28 = vpop.f32.mrf.mxu1  ;;  %v3876_v1 = vsub.f32 %v3849_v3, %v3872_v61  ;;  %8825 = vmatprep.subr.msk.mxu1 %vm272_vm2, %v7491_v26  ;;  %v3759_v61 = vld [vmem:[%s11562_s13] sm:$0xff] }
0x13f9   :  { %v3644_v21 = vadd.f32 %v3628_v28, %v10688_v53  ;;  %v3657_v53 = vld [vmem:[#allocation9] sm:$0x3]  ;;  %v3878_v50 = vmul.f32 %v3874_v57, %v3874_v57  ;;  %8826 = vmatpush3.xpose.msk.msra.mxu1 %vm272_vm2, %v7491_v26 }
0x13fa   :  { %v8774_v60 = vpop.f32.mrf.mxu1  ;;  %v3880_v10 = vmul.f32 %v3876_v1, %v3876_v1 }
0x13fb   :  { %v3654_v29 = vadd.f32 %v7473_v8, %v3644_v21  ;;  %v3882_v34 = vsel %vm272_vm2, %v3878_v50, 0.0  ;;  %v3766_v21 = vld [vmem:[%s11562_s13 + $0x38] sm:$0xff]  ;;  %v7482_v50 = vld [vmem:[%s11558_s9 + $0x108] sm:$0xff] }
0x13fc   :  { %v3633_v14 = vpop.f32.mrf.mxu1  ;;  %3883 = vadd.xlane.f32.xlu1 %v3882_v34  ;;  %v3888_v43 = vsel %vm272_vm2, %v3880_v10, 0.0 }
0x13fd   :  { %v3645_v19 = vadd.f32 %v3633_v14, %v10694_v39  ;;  %v3653_v39 = vadd.f32 %v7473_v8, %v3643_v55 }
0x13fe   :  { %v8777_v31 = vpop.f32.mrf.mxu1 }
0x13ff   :  { %v3655_v59 = vadd.f32 %v7473_v8, %v3645_v19 }
0x1400   :  { %v3638_v32 = vpop.f32.mrf.mxu1  ;;  %3889 = vadd.xlane.f32.xlu1 %v3888_v43 }
0x1401   :  { %v3646_v4 = vadd.f32 %v3638_v32, %v10700_v38  ;;  %v3652_v38 = vadd.f32 %v7473_v8, %v3642_v51  ;;  %v3765_v51 = vld [vmem:[%s11562_s13 + $0x30] sm:$0xff] }
0x1402   :  { %v8780_v49 = vpop.f32.mrf.mxu1 }
0x1403   :  { %v3656_v24 = vadd.f32 %v7473_v8, %v3646_v4 }
0x1405   :  { %8782 = vmatpush3.msk.msra.mxu0 %vm895_vm4, %v3656_v24 }
0x1406   :  { %8783 = vmatprep.subr.mxu0 %v9586_v0 }
0x1407   :  { %8784 = vmatpush3.msra.mxu0 %v3655_v59 }
0x1408   :  { %8785 = vmatprep.subr.mxu0 %v9586_v0 }
0x1409   :  { %8786 = vmatpush3.msra.mxu0 %v3654_v29 }
0x140a   :  { %8787 = vmatprep.subr.mxu0 %v9586_v0 }
0x140b   :  { %8788 = vmatpush3.msra.mxu0 %v3653_v39 }
0x140c   :  { %8789 = vmatprep.subr.mxu0 %v9586_v0 }
0x140d   :  { %8790 = vmatpush3.msra.mxu0 %v3652_v38  ;;  %v3764_v38 = vld [vmem:[%s11562_s13 + $0x28] sm:$0xff] }
0x140e   :  { %8792 = vmatmul.mubr.msk.f32.vlgmr.msra.gmra.mxu0 %vm823_vm6, %v3657_v53  ;;  %8794 = vmatprep.subr.mxu0 %v9586_v0 }
0x140f   :  { %8810 = vmatprep.mubr.msk.f32.mxu0 %vm9587_vm0, %v9586_v0  ;;  %8795 = vmatpush3.msra.mxu0 %v3766_v21  ;;  %v11020_v21 = vld [vmem:[#allocation8] sm:$0xff] }
0x1410   :  { %8796 = vmatprep.subr.mxu0 %v9586_v0 }
0x1411   :  { %8797 = vmatpush3.msra.mxu0 %v3765_v51 }
0x1412   :  { %8798 = vmatprep.subr.mxu0 %v9586_v0 }
0x1413   :  { %8799 = vmatpush3.msra.mxu0 %v3764_v38 }
0x1414   :  { %8800 = vmatprep.subr.mxu0 %v9586_v0 }
0x1415   :  { %8801 = vmatpush3.msra.mxu0 %v3763_v44 }
0x1416   :  { %8802 = vmatprep.subr.mxu0 %v9586_v0 }
0x1417   :  { %8803 = vmatpush3.msra.mxu0 %v3762_v54 }
0x1418   :  { %8804 = vmatprep.subr.mxu0 %v9586_v0 }
0x1485   :  { %v3884_v27 = vpop.xlane.xlu1 %3883 }
0x1486   :  { %v3894_v15 = vmul.f32 0.015625, %v3884_v27  ;;  %v7477_v27 = vld [vmem:[#allocation14 + $0x5] ss:$0 sm:$0xff] }
0x1488   :  { %v3898_v62 = vadd.f32 1e-05, %v3894_v15 }
0x1489   :  { %v3890_v3 = vpop.xlane.xlu1 %3889 }
0x148a   :  { %9302 = vrsqrt.f32 %v3898_v62  ;;  %v3896_v23 = vmul.f32 0.015625, %v3890_v3 }
0x148c   :  { %v3900_v41 = vadd.f32 1e-05, %v3896_v23 }
0x148e   :  { %9304 = vrsqrt.f32 %v3900_v41 }
0x1497   :  { %v9303_v17 = vpop.eup %9302 }
0x1498   :  { %v3906_v33 = vmul.f32 %v9303_v17, %v3874_v57  ;;  %v3761_v57 = vld [vmem:[%s11562_s13 + $0x10] sm:$0xff]  ;;  %v7481_v17 = vld [vmem:[%s11558_s9 + $0x100] sm:$0xff] }
0x1499   :  { %8805 = vmatpush3.msra.mxu0 %v3761_v57 }
0x149a   :  { %v3914_v47 = vmul.f32 %v7479_v46, %v3906_v33  ;;  %8806 = vmatprep.subr.mxu0 %v9586_v0  ;;  %v7501_v33 = vld [vmem:[%s11558_s9 + $0x180] sm:$0xff] }
0x149b   :  { %v9305_v31 = vpop.eup %9304  ;;  %8807 = vmatpush3.msra.mxu0 %v3760_v2  ;;  %v11027_v2 = vld [vmem:[#allocation8 + $0x10] sm:$0xff] }
0x149c   :  { %v10874_v20 = vadd.f32 %v10871_v5, %v3914_v47  ;;  %v3908_v32 = vmul.f32 %v9305_v31, %v3876_v1  ;;  %8808 = vmatprep.subr.mxu0 %v9586_v0 }
0x149d   :  { %8809 = vmatpush3.msra.mxu0 %v3759_v61 }
0x149e   :  { %8827 = vmatprep.mubr.msk.f32.mxu1 %vm272_vm2, %v10874_v20  ;;  %v3916_v8 = vmul.f32 %v7479_v46, %v3908_v32  ;;  %8813 = vmatprep.subr.msk.mxu0 %vm272_vm2, %v7482_v50 }
0x14a0   :  { %v10905_v29 = vadd.f32 %v10871_v5, %v3916_v8 }
0x14ce   :  { %v3730_v58 = vpop.f32.mrf.mxu0 }
0x14cf   :  { %v3736_v35 = vsel %vm285_vm3, %v3730_v58, 0.0 }
0x14d0   :  { %3737 = vadd.xlane.f32.xlu0 %v3736_v35  ;;  %v8793_v36 = vpop.f32.mrf.mxu0 }
0x14d1   :  { %v7536_v36 = vld [vmem:[%s11558_s9 + $0x158] sm:$0xff] }
0x14d4   :  { %3886 = vadd.xlane.f32.xlu0 %v3885_v37 }
0x14d8   :  { %3892 = vadd.xlane.f32.xlu0 %v3891_v63 }
0x1559   :  { %v3738_v12 = vpop.xlane.xlu0 %3737 }
0x155a   :  { %v3739_v6 = vmul.f32 0.015625, %v3738_v12  ;;  %v7535_v12 = vld [vmem:[%s11558_s9 + $0x150] sm:$0xff] }
0x155c   :  { %v3740_v42 = vsub.f32 %v3730_v58, %v3739_v6 }
0x155d   :  { %v3887_v45 = vpop.xlane.xlu0 %3886 }
0x155e   :  { %v3895_v7 = vmul.f32 0.015625, %v3887_v45  ;;  %v3741_v48 = vmul.f32 %v3740_v42, %v3740_v42 }
0x1560   :  { %v3899_v18 = vadd.f32 1e-05, %v3895_v7  ;;  %v3742_v9 = vsel %vm285_vm3, %v3741_v48, 0.0 }
0x1561   :  { %3743 = vadd.xlane.f32.xlu1 %v3742_v9  ;;  %v3893_v28 = vpop.xlane.xlu0 %3892 }
0x1562   :  { %9306 = vrsqrt.f32 %v3899_v18  ;;  %v3897_v60 = vmul.f32 0.015625, %v3893_v28  ;;  %v7504_v18 = vld [vmem:[%s11559_s10 + $0x14] ss:$0 sm:$0xff] }
0x1564   :  { %v3901_v14 = vadd.f32 1e-05, %v3897_v60 }
0x1566   :  { %9308 = vrsqrt.f32 %v3901_v14 }
0x156f   :  { %v9307_v19 = vpop.eup %9306 }
0x1570   :  { %v3907_v4 = vmul.f32 %v9307_v19, %v3875_v25 }
0x1572   :  { %v3915_v49 = vmul.f32 %v7479_v46, %v3907_v4  ;;  %v11018_v4 = vld [vmem:[#allocation8 + $0x8] sm:$0xff] }
0x1573   :  { %v9309_v24 = vpop.eup %9308 }
0x1574   :  { %v10898_v55 = vadd.f32 %v10871_v5, %v3915_v49  ;;  %v3909_v59 = vmul.f32 %v9309_v24, %v3877_v16 }
0x1576   :  { %v3917_v39 = vmul.f32 %v7479_v46, %v3909_v59  ;;  %8828 = vmatmul.mubr.msk.f32.vlgmr.msra.gmra.mxu1 %vm272_vm2, %v10898_v55  ;;  %v7502_v46 = vld [vmem:[%s11558_s9 + $0x188] sm:$0xff] }
0x1577   :  { %8830 = vmatprep.mubr.msk.f32.mxu1 %vm272_vm2, %v10905_v29 }
0x1578   :  { %v10916_v53 = vadd.f32 %v10871_v5, %v3917_v39  ;;  %v11023_v39 = vld [vmem:[#allocation8 + $0x18] sm:$0xff] }
0x157a   :  { %8831 = vmatmul.mubr.msk.f32.gmra.mxu1 %vm272_vm2, %v10916_v53 }
0x15ea   :  { %v3744_v1 = vpop.xlane.xlu1 %3743 }
0x15eb   :  { %v3745_v34 = vmul.f32 0.015625, %v3744_v1 }
0x15ed   :  { %v3746_v10 = vadd.f32 1e-05, %v3745_v34 }
0x15ef   :  { %9310 = vrsqrt.f32 %v3746_v10 }
0x15fc   :  { %v9311_v43 = vpop.eup %9310 }
0x15fd   :  { %v3748_v13 = vmul.f32 %v9311_v43, %v3740_v42 }
0x15ff   :  { %v3753_v15 = vmul.f32 %v7476_v56, %v3748_v13 }
0x1601   :  { %v3758_v62 = vadd.f32 %v7477_v27, %v3753_v15  ;;  %v7538_v27 = vld [vmem:[%s11559_s10 + $0x11] ss:$0 sm:$0xff] }
0x1603   :  { %8811 = vmatmul.mubr.msk.f32.vlgmr.msra.gmra.mxu0 %vm272_vm2, %v3758_v62 }
0x1604   :  { %8814 = vmatpush3.xpose.msk.msra.mxu0 %vm272_vm2, %v7482_v50  ;;  %8817 = vmatprep.mubr.msk.f32.mxu0 %vm272_vm2, %v10874_v20 }
0x1605   :  { %8815 = vmatprep.subr.msk.mxu0 %vm272_vm2, %v7481_v17 }
0x1608   :  { %8816 = vmatpush3.xpose.msk.msra.mxu0 %vm272_vm2, %v7481_v17 }
0x1609   :  { %8833 = vmatprep.subr.msk.mxu0 %vm272_vm2, %v7502_v46 }
0x160b   :  { %8818 = vmatmul.mubr.msk.f32.vlgmr.msra.gmra.mxu0 %vm272_vm2, %v10898_v55 }
0x160c   :  { %8820 = vmatprep.mubr.msk.f32.mxu0 %vm272_vm2, %v10905_v29  ;;  %8834 = vmatpush3.xpose.msk.msra.mxu0 %vm272_vm2, %v7502_v46 }
0x160d   :  { %8835 = vmatprep.subr.msk.mxu0 %vm272_vm2, %v7501_v33 }
0x160f   :  { %8821 = vmatmul.mubr.msk.f32.gmra.mxu0 %vm272_vm2, %v10916_v53 }
0x1610   :  { %8836 = vmatpush3.xpose.msk.msra.mxu0 %vm272_vm2, %v7501_v33  ;;  %8837 = vmatprep.mubr.msk.f32.mxu0 %vm272_vm2, %v10874_v20 }
0x1613   :  { %8838 = vmatmul.mubr.msk.f32.vlgmr.msra.gmra.mxu0 %vm272_vm2, %v10898_v55 }
0x1614   :  { %8840 = vmatprep.mubr.msk.f32.mxu0 %vm272_vm2, %v10905_v29 }
0x1617   :  { %8841 = vmatmul.mubr.msk.f32.gmra.mxu0 %vm272_vm2, %v10916_v53 }
0x1636   :  { %v8829_v5 = vpop.f32.mrf.mxu1 }
0x1637   :  { %v4129_v58 = vadd.f32 %v8829_v5, %v7494_v22 }
0x1638   :  { %v4123_v47 = vpop.f32.mrf.mxu1 }
0x1639   :  { %v4124_v35 = vadd.f32 %v7494_v22, %v4123_v47 }
0x163a   :  { %v8832_v25 = vpop.f32.mrf.mxu1 }
0x163b   :  { %v4139_v52 = vadd.f32 %v8832_v25, %v7494_v22 }
0x163c   :  { %v4133_v16 = vpop.f32.mrf.mxu1 }
0x163d   :  { %v4134_v30 = vadd.f32 %v7494_v22, %v4133_v16  ;;  %8843 = vmatprep.subr.msk.mxu1 %vm692_vm5, %v4139_v52 }
0x163e   :  { %8844 = vmatpush3.xpose.msk.msra.mxu1 %vm692_vm5, %v4139_v52 }
0x163f   :  { %8845 = vmatprep.subr.msk.mxu1 %vm692_vm5, %v4134_v30 }
0x1642   :  { %8846 = vmatpush3.xpose.msk.msra.mxu1 %vm692_vm5, %v4134_v30 }
0x1643   :  { %8847 = vmatprep.subr.msk.mxu1 %vm692_vm5, %v4129_v58 }
0x1646   :  { %8848 = vmatpush3.xpose.msk.msra.mxu1 %vm692_vm5, %v4129_v58 }
0x1647   :  { %8849 = vmatprep.subr.msk.mxu1 %vm692_vm5, %v4124_v35 }
0x164a   :  { %8850 = vmatpush3.xpose.msk.msra.mxu1 %vm692_vm5, %v4124_v35 }
0x164b   :  { %8881 = vmatprep.subr.msk.mxu1 %vm272_vm2, %v7536_v36 }
0x16c3   :  { %v10992_v37 = vpop.f32.mrf.mxu0 }
0x16c5   :  { %v8812_v11 = vpop.f32.mrf.mxu0 }
0x16cb   :  { %v8819_v63 = vpop.f32.mrf.mxu0 }
0x16cc   :  { %v4027_v23 = vadd.f32 %v8819_v63, %v7484_v40 }
0x16cd   :  { %v4021_v26 = vpop.f32.mrf.mxu0 }
0x16ce   :  { %v4022_v3 = vadd.f32 %v7484_v40, %v4021_v26 }
0x16cf   :  { %v8822_v41 = vpop.f32.mrf.mxu0 }
0x16d0   :  { %8851 = vmatprep.mubr.msk.f32.mxu1 %vm692_vm5, %v4022_v3  ;;  %v4037_v45 = vadd.f32 %v8822_v41, %v7484_v40 }
0x16d1   :  { %v4031_v6 = vpop.f32.mrf.mxu0  ;;  %8852 = vmatmul.mubr.msk.f32.vlgmr.msra.gmra.mxu1 %vm692_vm5, %v4027_v23 }
0x16d2   :  { %v4032_v42 = vadd.f32 %v7484_v40, %v4031_v6  ;;  %8882 = vmatpush3.xpose.msk.msra.mxu1 %vm272_vm2, %v7536_v36 }
0x16d3   :  { %v8839_v7 = vpop.f32.mrf.mxu0  ;;  %8883 = vmatprep.subr.msk.mxu1 %vm272_vm2, %v7535_v12 }
0x16d4   :  { %8854 = vmatprep.mubr.msk.f32.mxu1 %vm692_vm5, %v4032_v42  ;;  %v4231_v31 = vadd.f32 %v8839_v7, %v7504_v18  ;;  %v7526_v7 = vld [vmem:[%s11558_s9 + $0x118] sm:$0xff] }
0x16d5   :  { %v4225_v48 = vpop.f32.mrf.mxu0  ;;  %8855 = vmatmul.mubr.msk.f32.gmra.mxu1 %vm692_vm5, %v4037_v45 }
0x16d6   :  { %8884 = vmatpush3.xpose.msk.msra.mxu1 %vm272_vm2, %v7535_v12  ;;  %8885 = vmatprep.mubr.msk.f32.mxu1 %vm272_vm2, %v10874_v20  ;;  %v4226_v32 = vadd.f32 %v7504_v18, %v4225_v48 }
0x16d7   :  { %v8842_v9 = vpop.f32.mrf.mxu0 }
0x16d8   :  { %v4241_v28 = vadd.f32 %v8842_v9, %v7504_v18 }
0x16d9   :  { %v4235_v60 = vpop.f32.mrf.mxu0  ;;  %8886 = vmatmul.mubr.msk.f32.vlgmr.msra.gmra.mxu1 %vm272_vm2, %v10898_v55 }
0x16da   :  { %v4236_v14 = vadd.f32 %v7504_v18, %v4235_v60  ;;  %8857 = vmatprep.subr.mxu0 %v4241_v28  ;;  %8888 = vmatprep.mubr.msk.f32.mxu1 %vm272_vm2, %v10905_v29 }
0x16db   :  { %8858 = vmatpush3.msra.mxu0 %v4241_v28 }
0x16dc   :  { %8859 = vmatprep.subr.mxu0 %v4236_v14 }
0x16dd   :  { %8860 = vmatpush3.msra.mxu0 %v4236_v14  ;;  %8889 = vmatmul.mubr.msk.f32.gmra.mxu1 %vm272_vm2, %v10916_v53 }
0x16de   :  { %8861 = vmatprep.subr.mxu0 %v4231_v31 }
0x16df   :  { %8862 = vmatpush3.msra.mxu0 %v4231_v31 }
0x16e0   :  { %8863 = vmatprep.subr.mxu0 %v4226_v32 }
0x16e1   :  { %8864 = vmatpush3.msra.mxu0 %v4226_v32 }
0x16e2   :  { %8871 = vmatprep.subr.msk.mxu0 %vm272_vm2, %v7526_v7 }
0x1791   :  { %v8853_v19 = vpop.f32.mrf.mxu1 }
0x1792   :  { %v4354_v8 = vmul.f32 0.25, %v8853_v19 }
0x1793   :  { %v4334_v49 = vpop.f32.mrf.mxu1 }
0x1794   :  { %v4353_v24 = vmul.f32 0.25, %v4334_v49  ;;  %v4358_v59 = vadd.f32 %v4354_v8, %v11018_v4  ;;  %v7525_v8 = vld [vmem:[%s11558_s9 + $0x110] sm:$0xff] }
0x1795   :  { %v8856_v51 = vpop.f32.mrf.mxu1 }
0x1796   :  { %v4356_v38 = vmul.f32 0.25, %v8856_v51  ;;  %v4365_v44 = vsel %vm4361_vm8, %v4358_v59, -inf  ;;  %v4357_v54 = vadd.f32 %v4353_v24, %v11020_v21  ;;  %v7546_v51 = vld [vmem:[%s11558_s9 + $0x198] sm:$0xff] }
0x1797   :  { %4366 = vmax.xlane.f32.xlu1 %v4365_v44  ;;  %v4344_v57 = vpop.f32.mrf.mxu1  ;;  %v7524_v44 = vld [vmem:[%s11558_s9 + $0x1c8] sm:$0xff] }
0x1798   :  { %v4355_v61 = vmul.f32 0.25, %v4344_v57  ;;  %v4362_v50 = vsel %vm4361_vm8, %v4357_v54, -inf  ;;  %v4360_v1 = vadd.f32 %v4356_v38, %v11023_v39  ;;  %v7545_v38 = vld [vmem:[%s11558_s9 + $0x190] sm:$0xff] }
0x1799   :  { %4363 = vmax.xlane.f32.xlu0 %v4362_v50  ;;  %v8887_v34 = vpop.f32.mrf.mxu1 }
0x179a   :  { %v4371_v10 = vsel %vm4361_vm8, %v4360_v1, -inf  ;;  %v4359_v43 = vadd.f32 %v4355_v61, %v11027_v2  ;;  %v4697_v33 = vadd.f32 %v8887_v34, %v7538_v27  ;;  %v7528_v34 = vld [vmem:[%s11559_s10 + $0xd] ss:$0 sm:$0xff] }
0x179b   :  { %4372 = vmax.xlane.f32.xlu1 %v4371_v10  ;;  %v4691_v56 = vpop.f32.mrf.mxu1 }
0x179c   :  { %v4368_v13 = vsel %vm4361_vm8, %v4359_v43, -inf  ;;  %v4692_v5 = vadd.f32 %v7538_v27, %v4691_v56 }
0x179d   :  { %v8890_v15 = vpop.f32.mrf.mxu1  ;;  %4369 = vmax.xlane.f32.xlu0 %v4368_v13 }
0x179e   :  { %v4707_v62 = vadd.f32 %v8890_v15, %v7538_v27 }
0x179f   :  { %v4701_v17 = vpop.f32.mrf.mxu1 }
0x17a0   :  { %v4702_v46 = vadd.f32 %v7538_v27, %v4701_v17  ;;  %8901 = vmatprep.subr.msk.mxu1 %vm692_vm5, %v4707_v62  ;;  %v7523_v27 = vld [vmem:[%s11558_s9 + $0x1c0] sm:$0xff]  ;;  %v7588_v17 = vld [vmem:[%s11558_s9 + $0x168] sm:$0xff] }
0x17a1   :  { %8902 = vmatpush3.xpose.msk.msra.mxu1 %vm692_vm5, %v4707_v62 }
0x17a2   :  { %8903 = vmatprep.subr.msk.mxu1 %vm692_vm5, %v4702_v46 }
0x17a5   :  { %8904 = vmatpush3.xpose.msk.msra.mxu1 %vm692_vm5, %v4702_v46 }
0x17a6   :  { %8905 = vmatprep.subr.msk.mxu1 %vm692_vm5, %v4697_v33 }
0x17a9   :  { %8906 = vmatpush3.xpose.msk.msra.mxu1 %vm692_vm5, %v4697_v33 }
0x17aa   :  { %8907 = vmatprep.subr.msk.mxu1 %vm692_vm5, %v4692_v5 }
0x17ad   :  { %8908 = vmatpush3.xpose.msk.msra.mxu1 %vm692_vm5, %v4692_v5 }
0x17ae   :  { %8939 = vmatprep.subr.mxu1 %v7524_v44 }
0x1820   :  { %v4367_v47 = vpop.xlane.xlu1 %4366 }
0x1821   :  { %v4375_v22 = vsub.f32 %v4358_v59, %v4367_v47  ;;  %v7548_v47 = vld [vmem:[%s11559_s10 + $0x15] ss:$0 sm:$0xff] }
0x1822   :  { %v4364_v25 = vpop.xlane.xlu0 %4363 }
0x1823   :  { %v4380_v52 = vmul.f32 1.442695, %v4375_v22  ;;  %v4374_v16 = vsub.f32 %v4357_v54, %v4364_v25 }
0x1824   :  { %v4373_v30 = vpop.xlane.xlu1 %4372 }
0x1825   :  { %9312 = vpow2.f32 %v4380_v52  ;;  %v4378_v58 = vmul.f32 1.442695, %v4374_v16  ;;  %v4377_v35 = vsub.f32 %v4360_v1, %v4373_v30  ;;  %v7587_v16 = vld [vmem:[%s11558_s9 + $0x160] sm:$0xff] }
0x1826   :  { %v4370_v36 = vpop.xlane.xlu0 %4369 }
0x1827   :  { %9314 = vpow2.f32 %v4378_v58  ;;  %v4384_v11 = vmul.f32 1.442695, %v4377_v35  ;;  %v4376_v63 = vsub.f32 %v4359_v43, %v4370_v36 }
0x1829   :  { %9316 = vpow2.f32 %v4384_v11  ;;  %v4382_v40 = vmul.f32 1.442695, %v4376_v63 }
0x182b   :  { %9318 = vpow2.f32 %v4382_v40 }
0x1832   :  { %v9313_v26 = vpop.eup %9312 }
0x1833   :  { %v4389_v3 = vsel %vm4361_vm8, %v9313_v26, 0.0 }
0x1834   :  { %v9315_v23 = vpop.eup %9314  ;;  %4390 = vadd.xlane.f32.xlu1 %v4389_v3 }
0x1835   :  { %v4386_v41 = vsel %vm4361_vm8, %v9315_v23, 0.0 }
0x1836   :  { %v9317_v12 = vpop.eup %9316  ;;  %4387 = vadd.xlane.f32.xlu0 %v4386_v41 }
0x1837   :  { %v4395_v6 = vsel %vm4361_vm8, %v9317_v12, 0.0 }
0x1838   :  { %v9319_v42 = vpop.eup %9318  ;;  %4396 = vadd.xlane.f32.xlu1 %v4395_v6 }
0x1839   :  { %v4392_v45 = vsel %vm4361_vm8, %v9319_v42, 0.0 }
0x183a   :  { %4393 = vadd.xlane.f32.xlu0 %v4392_v45 }
0x18bd   :  { %v4391_v48 = vpop.xlane.xlu1 %4390 }
0x18be   :  { %9320 = vrcp.f32 %v4391_v48 }
0x18bf   :  { %v4388_v18 = vpop.xlane.xlu0 %4387 }
0x18c0   :  { %9322 = vrcp.f32 %v4388_v18 }
0x18c1   :  { %v4397_v9 = vpop.xlane.xlu1 %4396 }
0x18c2   :  { %9324 = vrcp.f32 %v4397_v9 }
0x18c3   :  { %v4394_v28 = vpop.xlane.xlu0 %4393 }
0x18c4   :  { %9326 = vrcp.f32 %v4394_v28 }
0x18cb   :  { %v9321_v60 = vpop.eup %9320 }
0x18cc   :  { %v4403_v32 = vmul.f32 %v9321_v60, %v9313_v26 }
0x18cd   :  { %v9323_v14 = vpop.eup %9322 }
0x18ce   :  { %v4402_v31 = vmul.f32 %v9323_v14, %v9315_v23 }
0x18cf   :  { %v9325_v19 = vpop.eup %9324 }
0x18d0   :  { %8865 = vmatprep.mubr.msk.f32.mxu0 %vm4361_vm8, %v4402_v31  ;;  %v4405_v59 = vmul.f32 %v9325_v19, %v9317_v12 }
0x18d1   :  { %v9327_v49 = vpop.eup %9326  ;;  %8866 = vmatmul.mubr.msk.f32.vlgmr.msra.gmra.mxu0 %vm4361_vm8, %v4403_v32 }
0x18d2   :  { %8872 = vmatpush3.xpose.msk.msra.mxu0 %vm272_vm2, %v7526_v7  ;;  %v4404_v24 = vmul.f32 %v9327_v49, %v9319_v42 }
0x18d3   :  { %8873 = vmatprep.subr.msk.mxu0 %vm272_vm2, %v7525_v8 }
0x18d4   :  { %8868 = vmatprep.mubr.msk.f32.mxu0 %vm4361_vm8, %v4404_v24 }
0x18d5   :  { %8869 = vmatmul.mubr.msk.f32.gmra.mxu0 %vm4361_vm8, %v4405_v59 }
0x18d6   :  { %8874 = vmatpush3.xpose.msk.msra.mxu0 %vm272_vm2, %v7525_v8  ;;  %8875 = vmatprep.mubr.msk.f32.mxu0 %vm272_vm2, %v10874_v20  ;;  %v7590_v8 = vld [vmem:[%s11559_s10 + $0x12] ss:$0 sm:$0xff] }
0x18d7   :  { %8891 = vmatprep.subr.msk.mxu0 %vm272_vm2, %v7546_v51 }
0x18d9   :  { %8876 = vmatmul.mubr.msk.f32.vlgmr.msra.gmra.mxu0 %vm272_vm2, %v10898_v55 }
0x18da   :  { %8878 = vmatprep.mubr.msk.f32.mxu0 %vm272_vm2, %v10905_v29  ;;  %8892 = vmatpush3.xpose.msk.msra.mxu0 %vm272_vm2, %v7546_v51 }
0x18db   :  { %8893 = vmatprep.subr.msk.mxu0 %vm272_vm2, %v7545_v38 }
0x18dd   :  { %8879 = vmatmul.mubr.msk.f32.gmra.mxu0 %vm272_vm2, %v10916_v53 }
0x18de   :  { %8894 = vmatpush3.xpose.msk.msra.mxu0 %vm272_vm2, %v7545_v38  ;;  %8895 = vmatprep.mubr.msk.f32.mxu0 %vm272_vm2, %v10874_v20 }
0x18e1   :  { %8896 = vmatmul.mubr.msk.f32.vlgmr.msra.gmra.mxu0 %vm272_vm2, %v10898_v55 }
0x18e2   :  { %8898 = vmatprep.mubr.msk.f32.mxu0 %vm272_vm2, %v10905_v29 }
0x18e5   :  { %8899 = vmatmul.mubr.msk.f32.gmra.mxu0 %vm272_vm2, %v10916_v53 }
0x1991   :  { %v8867_v54 = vpop.f32.mrf.mxu0 }
0x1993   :  { %v4484_v57 = vpop.f32.mrf.mxu0 }
0x1995   :  { %v8870_v61 = vpop.f32.mrf.mxu0 }
0x1997   :  { %v4494_v50 = vpop.f32.mrf.mxu0 }
0x1999   :  { %v8877_v1 = vpop.f32.mrf.mxu0 }
0x199a   :  { %v4595_v56 = vadd.f32 %v8877_v1, %v7528_v34 }
0x199b   :  { %v4589_v10 = vpop.f32.mrf.mxu0 }
0x199c   :  { %v4590_v43 = vadd.f32 %v7528_v34, %v4589_v10 }
0x199d   :  { %v8880_v13 = vpop.f32.mrf.mxu0 }
0x199e   :  { %8909 = vmatprep.mubr.msk.f32.mxu1 %vm692_vm5, %v4590_v43  ;;  %v4605_v46 = vadd.f32 %v8880_v13, %v7528_v34 }
0x199f   :  { %v4599_v15 = vpop.f32.mrf.mxu0  ;;  %8910 = vmatmul.mubr.msk.f32.vlgmr.msra.gmra.mxu1 %vm692_vm5, %v4595_v56 }
0x19a0   :  { %v4600_v62 = vadd.f32 %v7528_v34, %v4599_v15  ;;  %8940 = vmatpush3.msra.mxu1 %v7524_v44 }
0x19a1   :  { %v8897_v33 = vpop.f32.mrf.mxu0  ;;  %8941 = vmatprep.subr.mxu1 %v7523_v27 }
0x19a2   :  { %8912 = vmatprep.mubr.msk.f32.mxu1 %vm692_vm5, %v4600_v62  ;;  %8942 = vmatpush3.msra.mxu1 %v7523_v27  ;;  %v4799_v58 = vadd.f32 %v8897_v33, %v7548_v47 }
0x19a3   :  { %v4793_v5 = vpop.f32.mrf.mxu0  ;;  %8913 = vmatmul.mubr.msk.f32.gmra.mxu1 %vm692_vm5, %v4605_v46  ;;  %8959 = vmatprep.subr.msk.mxu1 %vm272_vm2, %v7588_v17 }
0x19a4   :  { %8943 = vmatprep.mubr.msk.f32.mxu1 %vm692_vm5, %v4484_v57  ;;  %v4794_v35 = vadd.f32 %v7548_v47, %v4793_v5 }
0x19a5   :  { %v8900_v22 = vpop.f32.mrf.mxu0 }
0x19a6   :  { %v4809_v25 = vadd.f32 %v8900_v22, %v7548_v47 }
0x19a7   :  { %v4803_v52 = vpop.f32.mrf.mxu0  ;;  %8944 = vmatmul.mubr.msk.f32.vlgmr.msra.gmra.mxu1 %vm692_vm5, %v8867_v54 }
0x19a8   :  { %v4804_v30 = vadd.f32 %v7548_v47, %v4803_v52  ;;  %8915 = vmatprep.subr.mxu0 %v4809_v25  ;;  %8946 = vmatprep.mubr.msk.f32.mxu1 %vm692_vm5, %v4494_v50 }
0x19a9   :  { %8960 = vmatpush3.xpose.msk.msra.mxu1 %vm272_vm2, %v7588_v17  ;;  %8916 = vmatpush3.msra.mxu0 %v4809_v25 }
0x19aa   :  { %8917 = vmatprep.subr.mxu0 %v4804_v30  ;;  %8961 = vmatprep.subr.msk.mxu1 %vm272_vm2, %v7587_v16 }
0x19ab   :  { %8918 = vmatpush3.msra.mxu0 %v4804_v30  ;;  %8947 = vmatmul.mubr.msk.f32.gmra.mxu1 %vm692_vm5, %v8870_v61 }
0x19ac   :  { %8919 = vmatprep.subr.mxu0 %v4799_v58  ;;  %8963 = vmatprep.mubr.msk.f32.mxu1 %vm272_vm2, %v10874_v20 }
0x19ad   :  { %8962 = vmatpush3.xpose.msk.msra.mxu1 %vm272_vm2, %v7587_v16  ;;  %8920 = vmatpush3.msra.mxu0 %v4799_v58 }
0x19ae   :  { %8921 = vmatprep.subr.mxu0 %v4794_v35 }
0x19af   :  { %8922 = vmatpush3.msra.mxu0 %v4794_v35 }
0x19b0   :  { %8964 = vmatmul.mubr.msk.f32.vlgmr.msra.gmra.mxu1 %vm272_vm2, %v10898_v55 }
0x19b1   :  { %8966 = vmatprep.mubr.msk.f32.mxu1 %vm272_vm2, %v10905_v29 }
0x19b4   :  { %8967 = vmatmul.mubr.msk.f32.gmra.mxu1 %vm272_vm2, %v10916_v53 }
0x1a5f   :  { %v8911_v36 = vpop.f32.mrf.mxu1 }
0x1a60   :  { %v4922_v11 = vmul.f32 0.25, %v8911_v36 }
0x1a61   :  { %v4902_v63 = vpop.f32.mrf.mxu1 }
0x1a62   :  { %v4921_v40 = vmul.f32 0.25, %v4902_v63  ;;  %v4926_v26 = vadd.f32 %v4922_v11, %v11018_v4 }
0x1a63   :  { %v8914_v3 = vpop.f32.mrf.mxu1 }
0x1a64   :  { %v4924_v23 = vmul.f32 0.25, %v8914_v3  ;;  %v4932_v41 = vsel %vm4361_vm8, %v4926_v26, -inf  ;;  %v4925_v12 = vadd.f32 %v4921_v40, %v11020_v21 }
0x1a65   :  { %4933 = vmax.xlane.f32.xlu1 %v4932_v41  ;;  %v4912_v6 = vpop.f32.mrf.mxu1  ;;  %v7568_v41 = vld [vmem:[%s11558_s9 + $0x1d8] sm:$0xff] }
0x1a66   :  { %v4923_v42 = vmul.f32 0.25, %v4912_v6  ;;  %v4929_v45 = vsel %vm4361_vm8, %v4925_v12, -inf  ;;  %v4928_v7 = vadd.f32 %v4924_v23, %v11023_v39  ;;  %8929 = vmatprep.subr.mxu0 %v7568_v41  ;;  %v7578_v6 = vld [vmem:[%s11558_s9 + $0x128] sm:$0xff] }
0x1a67   :  { %4930 = vmax.xlane.f32.xlu0 %v4929_v45  ;;  %v11132_v48 = vpop.f32.mrf.mxu1 }
0x1a68   :  { %v4938_v18 = vsel %vm4361_vm8, %v4928_v7, -inf  ;;  %v4927_v9 = vadd.f32 %v4923_v42, %v11027_v2 }
0x1a69   :  { %4939 = vmax.xlane.f32.xlu1 %v4938_v18  ;;  %v11136_v28 = vpop.f32.mrf.mxu1 }
0x1a6a   :  { %v4935_v60 = vsel %vm4361_vm8, %v4927_v9, -inf }
0x1a6b   :  { %v11139_v14 = vpop.f32.mrf.mxu1  ;;  %4936 = vmax.xlane.f32.xlu0 %v4935_v60  ;;  %v7598_v60 = vld [vmem:[%s11558_s9 + $0x1a8] sm:$0xff] }
0x1a6d   :  { %v11141_v31 = vpop.f32.mrf.mxu1 }
0x1a70   :  { %v8965_v32 = vpop.f32.mrf.mxu1 }
0x1a71   :  { %v5458_v38 = vadd.f32 %v8965_v32, %v7590_v8  ;;  %v7597_v32 = vld [vmem:[%s11558_s9 + $0x1a0] sm:$0xff] }
0x1a72   :  { %v5452_v19 = vpop.f32.mrf.mxu1 }
0x1a73   :  { %v5453_v44 = vadd.f32 %v7590_v8, %v5452_v19  ;;  %v7626_v19 = vld [vmem:[%s11558_s9 + $0x138] sm:$0xff] }
0x1a74   :  { %v8968_v49 = vpop.f32.mrf.mxu1 }
0x1a75   :  { %v5468_v24 = vadd.f32 %v8968_v49, %v7590_v8 }
0x1a76   :  { %v5462_v59 = vpop.f32.mrf.mxu1 }
0x1a77   :  { %v5463_v51 = vadd.f32 %v7590_v8, %v5462_v59  ;;  %8979 = vmatprep.subr.msk.mxu1 %vm692_vm5, %v5468_v24 }
0x1a78   :  { %8980 = vmatpush3.xpose.msk.msra.mxu1 %vm692_vm5, %v5468_v24 }
0x1a79   :  { %8981 = vmatprep.subr.msk.mxu1 %vm692_vm5, %v5463_v51 }
0x1a7c   :  { %8982 = vmatpush3.xpose.msk.msra.mxu1 %vm692_vm5, %v5463_v51 }
0x1a7d   :  { %8983 = vmatprep.subr.msk.mxu1 %vm692_vm5, %v5458_v38 }
0x1a80   :  { %8984 = vmatpush3.xpose.msk.msra.mxu1 %vm692_vm5, %v5458_v38  ;;  %v7580_v38 = vld [vmem:[%s11559_s10 + $0xe] ss:$0 sm:$0xff] }
0x1a81   :  { %8985 = vmatprep.subr.msk.mxu1 %vm692_vm5, %v5453_v44 }
0x1a84   :  { %8986 = vmatpush3.xpose.msk.msra.mxu1 %vm692_vm5, %v5453_v44 }
0x1a85   :  { %9017 = vmatprep.subr.msk.mxu1 %vm272_vm2, %v7626_v19 }
0x1aee   :  { %v4934_v54 = vpop.xlane.xlu1 %4933 }
0x1aef   :  { %v4942_v57 = vsub.f32 %v4926_v26, %v4934_v54 }
0x1af0   :  { %v4931_v61 = vpop.xlane.xlu0 %4930 }
0x1af1   :  { %v4947_v50 = vmul.f32 1.442695, %v4942_v57  ;;  %v4941_v1 = vsub.f32 %v4925_v12, %v4931_v61  ;;  %v7567_v12 = vld [vmem:[%s11558_s9 + $0x1d0] sm:$0xff] }
0x1af2   :  { %v4940_v34 = vpop.xlane.xlu1 %4939 }
0x1af3   :  { %9328 = vpow2.f32 %v4947_v50  ;;  %v4945_v10 = vmul.f32 1.442695, %v4941_v1  ;;  %v4944_v43 = vsub.f32 %v4928_v7, %v4940_v34  ;;  %v7577_v7 = vld [vmem:[%s11558_s9 + $0x120] sm:$0xff]  ;;  %v7625_v50 = vld [vmem:[%s11558_s9 + $0x130] sm:$0xff] }
0x1af4   :  { %v4937_v56 = vpop.xlane.xlu0 %4936 }
0x1af5   :  { %9330 = vpow2.f32 %v4945_v10  ;;  %v4951_v13 = vmul.f32 1.442695, %v4944_v43  ;;  %v4943_v27 = vsub.f32 %v4927_v9, %v4937_v56  ;;  %v7646_v56 = vld [vmem:[%s11558_s9 + $0x1b8] sm:$0xff] }
0x1af7   :  { %9332 = vpow2.f32 %v4951_v13  ;;  %v4949_v15 = vmul.f32 1.442695, %v4943_v27  ;;  %v7600_v27 = vld [vmem:[%s11559_s10 + $0x16] ss:$0 sm:$0xff] }
0x1af9   :  { %9334 = vpow2.f32 %v4949_v15 }
0x1b00   :  { %v9329_v62 = vpop.eup %9328 }
0x1b01   :  { %v4956_v17 = vsel %vm4361_vm8, %v9329_v62, 0.0 }
0x1b02   :  { %v9331_v46 = vpop.eup %9330  ;;  %4957 = vadd.xlane.f32.xlu1 %v4956_v17 }
0x1b03   :  { %v4953_v33 = vsel %vm4361_vm8, %v9331_v46, 0.0 }
0x1b04   :  { %v9333_v5 = vpop.eup %9332  ;;  %4954 = vadd.xlane.f32.xlu0 %v4953_v33 }
0x1b05   :  { %v4962_v47 = vsel %vm4361_vm8, %v9333_v5, 0.0 }
0x1b06   :  { %v9335_v22 = vpop.eup %9334  ;;  %4963 = vadd.xlane.f32.xlu1 %v4962_v47 }
0x1b07   :  { %v4959_v25 = vsel %vm4361_vm8, %v9335_v22, 0.0 }
0x1b08   :  { %4960 = vadd.xlane.f32.xlu0 %v4959_v25 }
0x1b8b   :  { %v4958_v52 = vpop.xlane.xlu1 %4957 }
0x1b8c   :  { %9336 = vrcp.f32 %v4958_v52 }
0x1b8d   :  { %v4955_v16 = vpop.xlane.xlu0 %4954 }
0x1b8e   :  { %9338 = vrcp.f32 %v4955_v16 }
0x1b8f   :  { %v4964_v30 = vpop.xlane.xlu1 %4963 }
0x1b90   :  { %9340 = vrcp.f32 %v4964_v30 }
0x1b91   :  { %v4961_v58 = vpop.xlane.xlu0 %4960 }
0x1b92   :  { %9342 = vrcp.f32 %v4961_v58 }
0x1b99   :  { %v9337_v35 = vpop.eup %9336 }
0x1b9a   :  { %v4970_v63 = vmul.f32 %v9337_v35, %v9329_v62 }
0x1b9b   :  { %v9339_v36 = vpop.eup %9338 }
0x1b9c   :  { %v4969_v11 = vmul.f32 %v9339_v36, %v9331_v46  ;;  %v7645_v46 = vld [vmem:[%s11558_s9 + $0x1b0] sm:$0xff] }
0x1b9d   :  { %v9341_v40 = vpop.eup %9340 }
0x1b9e   :  { %8923 = vmatprep.mubr.msk.f32.mxu0 %vm4361_vm8, %v4969_v11  ;;  %v4972_v23 = vmul.f32 %v9341_v40, %v9333_v5  ;;  %v11268_v40 = vld [vmem:[%s11559_s10 + $0xf] ss:$0 sm:$0xff] }
0x1b9f   :  { %v9343_v26 = vpop.eup %9342  ;;  %8924 = vmatmul.mubr.msk.f32.vlgmr.msra.gmra.mxu0 %vm4361_vm8, %v4970_v63 }
0x1ba0   :  { %v4971_v3 = vmul.f32 %v9343_v26, %v9335_v22  ;;  %8930 = vmatpush3.msra.mxu0 %v7568_v41 }
0x1ba1   :  { %8931 = vmatprep.subr.mxu0 %v7567_v12 }
0x1ba2   :  { %8926 = vmatprep.mubr.msk.f32.mxu0 %vm4361_vm8, %v4971_v3  ;;  %8932 = vmatpush3.msra.mxu0 %v7567_v12 }
0x1ba3   :  { %8927 = vmatmul.mubr.msk.f32.gmra.mxu0 %vm4361_vm8, %v4972_v23  ;;  %8949 = vmatprep.subr.msk.mxu0 %vm272_vm2, %v7578_v6 }
0x1c5f   :  { %v8925_v42 = vpop.f32.mrf.mxu0 }
0x1c61   :  { %v5051_v45 = vpop.f32.mrf.mxu0 }
0x1c62   :  { %8933 = vmatprep.mubr.msk.f32.mxu0 %vm692_vm5, %v5051_v45 }
0x1c63   :  { %v8928_v18 = vpop.f32.mrf.mxu0  ;;  %8934 = vmatmul.mubr.msk.f32.vlgmr.msra.gmra.mxu0 %vm692_vm5, %v8925_v42 }
0x1c64   :  { %8950 = vmatpush3.xpose.msk.msra.mxu0 %vm272_vm2, %v7578_v6 }
0x1c65   :  { %v5061_v9 = vpop.f32.mrf.mxu0  ;;  %8951 = vmatprep.subr.msk.mxu0 %vm272_vm2, %v7577_v7 }
0x1c66   :  { %8936 = vmatprep.mubr.msk.f32.mxu0 %vm692_vm5, %v5061_v9 }
0x1c67   :  { %8937 = vmatmul.mubr.msk.f32.gmra.mxu0 %vm692_vm5, %v8928_v18 }
0x1c68   :  { %8952 = vmatpush3.xpose.msk.msra.mxu0 %vm272_vm2, %v7577_v7  ;;  %8953 = vmatprep.mubr.msk.f32.mxu0 %vm272_vm2, %v10874_v20 }
0x1c69   :  { %8969 = vmatprep.subr.msk.mxu0 %vm272_vm2, %v7598_v60 }
0x1c6b   :  { %8954 = vmatmul.mubr.msk.f32.vlgmr.msra.gmra.mxu0 %vm272_vm2, %v10898_v55 }
0x1c6c   :  { %8956 = vmatprep.mubr.msk.f32.mxu0 %vm272_vm2, %v10905_v29  ;;  %8970 = vmatpush3.xpose.msk.msra.mxu0 %vm272_vm2, %v7598_v60 }
0x1c6d   :  { %8971 = vmatprep.subr.msk.mxu0 %vm272_vm2, %v7597_v32 }
0x1c6f   :  { %8957 = vmatmul.mubr.msk.f32.gmra.mxu0 %vm272_vm2, %v10916_v53 }
0x1c70   :  { %8972 = vmatpush3.xpose.msk.msra.mxu0 %vm272_vm2, %v7597_v32  ;;  %8973 = vmatprep.mubr.msk.f32.mxu0 %vm272_vm2, %v10874_v20 }
0x1c73   :  { %8974 = vmatmul.mubr.msk.f32.vlgmr.msra.gmra.mxu0 %vm272_vm2, %v10898_v55 }
0x1c74   :  { %8976 = vmatprep.mubr.msk.f32.mxu0 %vm272_vm2, %v10905_v29 }
0x1c77   :  { %8977 = vmatmul.mubr.msk.f32.gmra.mxu0 %vm272_vm2, %v10916_v53 }
0x1d23   :  { %v11212_v8 = vpop.f32.mrf.mxu0 }
0x1d25   :  { %v11214_v49 = vpop.f32.mrf.mxu0 }
0x1d27   :  { %v11216_v24 = vpop.f32.mrf.mxu0 }
0x1d29   :  { %v11218_v59 = vpop.f32.mrf.mxu0 }
0x1d2b   :  { %v8955_v51 = vpop.f32.mrf.mxu0 }
0x1d2c   :  { %v5356_v57 = vadd.f32 %v8955_v51, %v7580_v38 }
0x1d2d   :  { %v5350_v44 = vpop.f32.mrf.mxu0 }
0x1d2e   :  { %v5351_v54 = vadd.f32 %v7580_v38, %v5350_v44 }
0x1d2f   :  { %v8958_v61 = vpop.f32.mrf.mxu0 }
0x1d30   :  { %8987 = vmatprep.mubr.msk.f32.mxu1 %vm692_vm5, %v5351_v54  ;;  %v5366_v10 = vadd.f32 %v8958_v61, %v7580_v38 }
0x1d31   :  { %v5360_v1 = vpop.f32.mrf.mxu0  ;;  %8988 = vmatmul.mubr.msk.f32.vlgmr.msra.gmra.mxu1 %vm692_vm5, %v5356_v57 }
0x1d32   :  { %v5361_v34 = vadd.f32 %v7580_v38, %v5360_v1  ;;  %9018 = vmatpush3.xpose.msk.msra.mxu1 %vm272_vm2, %v7626_v19  ;;  %v7648_v38 = vld [vmem:[%s11559_s10 + $0x17] ss:$0 sm:$0xff] }
0x1d33   :  { %v8975_v43 = vpop.f32.mrf.mxu0  ;;  %9019 = vmatprep.subr.msk.mxu1 %vm272_vm2, %v7625_v50 }
0x1d34   :  { %8990 = vmatprep.mubr.msk.f32.mxu1 %vm692_vm5, %v5361_v34  ;;  %v5560_v5 = vadd.f32 %v8975_v43, %v7600_v27 }
0x1d35   :  { %v5554_v13 = vpop.f32.mrf.mxu0  ;;  %8991 = vmatmul.mubr.msk.f32.gmra.mxu1 %vm692_vm5, %v5366_v10 }
0x1d36   :  { %9020 = vmatpush3.xpose.msk.msra.mxu1 %vm272_vm2, %v7625_v50  ;;  %9021 = vmatprep.mubr.msk.f32.mxu1 %vm272_vm2, %v10874_v20  ;;  %v5555_v47 = vadd.f32 %v7600_v27, %v5554_v13 }
0x1d37   :  { %v8978_v15 = vpop.f32.mrf.mxu0  ;;  %9037 = vmatprep.subr.msk.mxu1 %vm272_vm2, %v7646_v56 }
0x1d38   :  { %v5570_v62 = vadd.f32 %v8978_v15, %v7600_v27 }
0x1d39   :  { %v5564_v17 = vpop.f32.mrf.mxu0  ;;  %9022 = vmatmul.mubr.msk.f32.vlgmr.msra.gmra.mxu1 %vm272_vm2, %v10898_v55 }
0x1d3a   :  { %v5565_v33 = vadd.f32 %v7600_v27, %v5564_v17  ;;  %8993 = vmatprep.subr.mxu0 %v5570_v62  ;;  %9024 = vmatprep.mubr.msk.f32.mxu1 %vm272_vm2, %v10905_v29 }
0x1d3b   :  { %9038 = vmatpush3.xpose.msk.msra.mxu1 %vm272_vm2, %v7646_v56  ;;  %8994 = vmatpush3.msra.mxu0 %v5570_v62 }
0x1d3c   :  { %8995 = vmatprep.subr.mxu0 %v5565_v33  ;;  %9039 = vmatprep.subr.msk.mxu1 %vm272_vm2, %v7645_v46 }
0x1d3d   :  { %8996 = vmatpush3.msra.mxu0 %v5565_v33  ;;  %9025 = vmatmul.mubr.msk.f32.gmra.mxu1 %vm272_vm2, %v10916_v53 }
0x1d3e   :  { %8997 = vmatprep.subr.mxu0 %v5560_v5  ;;  %9041 = vmatprep.mubr.msk.f32.mxu1 %vm272_vm2, %v10874_v20 }
0x1d3f   :  { %9040 = vmatpush3.xpose.msk.msra.mxu1 %vm272_vm2, %v7645_v46  ;;  %8998 = vmatpush3.msra.mxu0 %v5560_v5 }
0x1d40   :  { %8999 = vmatprep.subr.mxu0 %v5555_v47 }
0x1d41   :  { %9000 = vmatpush3.msra.mxu0 %v5555_v47 }
0x1d42   :  { %9042 = vmatmul.mubr.msk.f32.vlgmr.msra.gmra.mxu1 %vm272_vm2, %v10898_v55 }
0x1d43   :  { %9044 = vmatprep.mubr.msk.f32.mxu1 %vm272_vm2, %v10905_v29 }
0x1d46   :  { %9045 = vmatmul.mubr.msk.f32.gmra.mxu1 %vm272_vm2, %v10916_v53 }
0x1df1   :  { %v8989_v22 = vpop.f32.mrf.mxu1 }
0x1df2   :  { %v5683_v25 = vmul.f32 0.25, %v8989_v22 }
0x1df3   :  { %v5663_v52 = vpop.f32.mrf.mxu1 }
0x1df4   :  { %v5682_v16 = vmul.f32 0.25, %v5663_v52  ;;  %v5687_v30 = vadd.f32 %v5683_v25, %v11018_v4 }
0x1df5   :  { %v8992_v58 = vpop.f32.mrf.mxu1 }
0x1df6   :  { %v5685_v35 = vmul.f32 0.25, %v8992_v58  ;;  %v5693_v36 = vsel %vm4361_vm8, %v5687_v30, -inf  ;;  %v5686_v11 = vadd.f32 %v5682_v16, %v11020_v21 }
0x1df7   :  { %5694 = vmax.xlane.f32.xlu1 %v5693_v36  ;;  %v5673_v63 = vpop.f32.mrf.mxu1 }
0x1df8   :  { %v5684_v26 = vmul.f32 0.25, %v5673_v63  ;;  %v5690_v3 = vsel %vm4361_vm8, %v5686_v11, -inf  ;;  %v5689_v23 = vadd.f32 %v5685_v35, %v11023_v39 }
0x1df9   :  { %5691 = vmax.xlane.f32.xlu0 %v5690_v3  ;;  %v9023_v41 = vpop.f32.mrf.mxu1 }
0x1dfa   :  { %v11273_v12 = vadd.f32 %v9023_v41, %v11268_v40  ;;  %v5699_v6 = vsel %vm4361_vm8, %v5689_v23, -inf  ;;  %v5688_v42 = vadd.f32 %v5684_v26, %v11027_v2 }
0x1dfb   :  { %5700 = vmax.xlane.f32.xlu1 %v5699_v6  ;;  %v11277_v45 = vpop.f32.mrf.mxu1 }
0x1dfc   :  { %v5696_v7 = vsel %vm4361_vm8, %v5688_v42, -inf }
0x1dfd   :  { %v9026_v18 = vpop.f32.mrf.mxu1  ;;  %5697 = vmax.xlane.f32.xlu0 %v5696_v7 }
0x1dfe   :  { %v11281_v9 = vadd.f32 %v9026_v18, %v11268_v40 }
0x1dff   :  { %v6028_v60 = vpop.f32.mrf.mxu1 }
0x1e00   :  { %v11284_v32 = vadd.f32 %v11268_v40, %v6028_v60 }
0x1e02   :  { %v9043_v19 = vpop.f32.mrf.mxu1 }
0x1e03   :  { %v6228_v50 = vadd.f32 %v9043_v19, %v7648_v38  ;;  %v7620_v19 = vld [vmem:[%s11558_s9 + $0x1e8] sm:$0xff] }
0x1e04   :  { %v6222_v51 = vpop.f32.mrf.mxu1  ;;  %9007 = vmatprep.subr.mxu0 %v7620_v19 }
0x1e05   :  { %v6223_v1 = vadd.f32 %v7648_v38, %v6222_v51  ;;  %v7619_v51 = vld [vmem:[%s11558_s9 + $0x1e0] sm:$0xff] }
0x1e06   :  { %v9046_v44 = vpop.f32.mrf.mxu1 }
0x1e07   :  { %v6238_v54 = vadd.f32 %v9046_v44, %v7648_v38 }
0x1e08   :  { %v6232_v57 = vpop.f32.mrf.mxu1 }
0x1e09   :  { %v6233_v61 = vadd.f32 %v7648_v38, %v6232_v57  ;;  %9061 = vmatprep.subr.mxu1 %v6238_v54  ;;  %v7636_v38 = vld [vmem:[%s11558_s9 + $0x178] sm:$0xff]  ;;  %v7635_v57 = vld [vmem:[%s11558_s9 + $0x170] sm:$0xff] }
0x1e0a   :  { %9062 = vmatpush3.msra.mxu1 %v6238_v54 }
0x1e0b   :  { %9063 = vmatprep.subr.mxu1 %v6233_v61 }
0x1e0c   :  { %9064 = vmatpush3.msra.mxu1 %v6233_v61 }
0x1e0d   :  { %9065 = vmatprep.subr.mxu1 %v6228_v50 }
0x1e0e   :  { %9066 = vmatpush3.msra.mxu1 %v6228_v50 }
0x1e0f   :  { %9067 = vmatprep.subr.mxu1 %v6223_v1 }
0x1e10   :  { %9068 = vmatpush3.msra.mxu1 %v6223_v1  ;;  %v6019_v1 = vadd.f32 %v11268_v40, %v11277_v45 }
0x1e80   :  { %v5695_v34 = vpop.xlane.xlu1 %5694 }
0x1e81   :  { %v5703_v10 = vsub.f32 %v5687_v30, %v5695_v34  ;;  %v5254_v34 = vadd.f32 %v11132_v48, %v11212_v8 }
0x1e82   :  { %v5692_v43 = vpop.xlane.xlu0 %5691 }
0x1e83   :  { %v5708_v56 = vmul.f32 1.442695, %v5703_v10  ;;  %v5702_v13 = vsub.f32 %v5686_v11, %v5692_v43 }
0x1e84   :  { %v5701_v27 = vpop.xlane.xlu1 %5700 }
0x1e85   :  { %9344 = vpow2.f32 %v5708_v56  ;;  %v5706_v15 = vmul.f32 1.442695, %v5702_v13  ;;  %v5705_v62 = vsub.f32 %v5689_v23, %v5701_v27 }
0x1e86   :  { %v5698_v17 = vpop.xlane.xlu0 %5697 }
0x1e87   :  { %9346 = vpow2.f32 %v5706_v15  ;;  %v5712_v46 = vmul.f32 1.442695, %v5705_v62  ;;  %v5704_v33 = vsub.f32 %v5688_v42, %v5698_v17 }
0x1e89   :  { %9348 = vpow2.f32 %v5712_v46  ;;  %v5710_v5 = vmul.f32 1.442695, %v5704_v33 }
0x1e8b   :  { %9350 = vpow2.f32 %v5710_v5 }
0x1e92   :  { %v9345_v47 = vpop.eup %9344 }
0x1e93   :  { %v5717_v22 = vsel %vm4361_vm8, %v9345_v47, 0.0 }
0x1e94   :  { %v9347_v25 = vpop.eup %9346  ;;  %5718 = vadd.xlane.f32.xlu1 %v5717_v22 }
0x1e95   :  { %v5714_v52 = vsel %vm4361_vm8, %v9347_v25, 0.0 }
0x1e96   :  { %v9349_v16 = vpop.eup %9348  ;;  %5715 = vadd.xlane.f32.xlu0 %v5714_v52 }
0x1e97   :  { %v5723_v30 = vsel %vm4361_vm8, %v9349_v16, 0.0 }
0x1e98   :  { %v9351_v58 = vpop.eup %9350  ;;  %5724 = vadd.xlane.f32.xlu1 %v5723_v30 }
0x1e99   :  { %v5720_v35 = vsel %vm4361_vm8, %v9351_v58, 0.0 }
0x1e9a   :  { %5721 = vadd.xlane.f32.xlu0 %v5720_v35 }
0x1f1d   :  { %v5719_v36 = vpop.xlane.xlu1 %5718 }
0x1f1e   :  { %9352 = vrcp.f32 %v5719_v36 }
0x1f1f   :  { %v5716_v11 = vpop.xlane.xlu0 %5715 }
0x1f20   :  { %9354 = vrcp.f32 %v5716_v11 }
0x1f21   :  { %v5725_v63 = vpop.xlane.xlu1 %5724 }
0x1f22   :  { %9356 = vrcp.f32 %v5725_v63 }
0x1f23   :  { %v5722_v26 = vpop.xlane.xlu0 %5721 }
0x1f24   :  { %9358 = vrcp.f32 %v5722_v26 }
0x1f2b   :  { %v9353_v3 = vpop.eup %9352 }
0x1f2c   :  { %v5731_v6 = vmul.f32 %v9353_v3, %v9345_v47 }
0x1f2d   :  { %v9355_v23 = vpop.eup %9354 }
0x1f2e   :  { %v5730_v41 = vmul.f32 %v9355_v23, %v9347_v25 }
0x1f2f   :  { %v9357_v42 = vpop.eup %9356 }
0x1f30   :  { %9001 = vmatprep.mubr.msk.f32.mxu0 %vm4361_vm8, %v5730_v41  ;;  %v5733_v60 = vmul.f32 %v9357_v42, %v9349_v16 }
0x1f31   :  { %v9359_v7 = vpop.eup %9358  ;;  %9002 = vmatmul.mubr.msk.f32.vlgmr.msra.gmra.mxu0 %vm4361_vm8, %v5731_v6 }
0x1f32   :  { %v5732_v18 = vmul.f32 %v9359_v7, %v9351_v58  ;;  %9008 = vmatpush3.msra.mxu0 %v7620_v19 }
0x1f33   :  { %9009 = vmatprep.subr.mxu0 %v7619_v51 }
0x1f34   :  { %9004 = vmatprep.mubr.msk.f32.mxu0 %vm4361_vm8, %v5732_v18  ;;  %9010 = vmatpush3.msra.mxu0 %v7619_v51 }
0x1f35   :  { %9005 = vmatmul.mubr.msk.f32.gmra.mxu0 %vm4361_vm8, %v5733_v60  ;;  %9027 = vmatprep.subr.msk.mxu0 %vm272_vm2, %v7636_v38 }
0x1ff1   :  { %v9003_v44 = vpop.f32.mrf.mxu0 }
0x1ff3   :  { %v5812_v54 = vpop.f32.mrf.mxu0 }
0x1ff4   :  { %9011 = vmatprep.mubr.msk.f32.mxu0 %vm692_vm5, %v5812_v54 }
0x1ff5   :  { %v9006_v61 = vpop.f32.mrf.mxu0  ;;  %9012 = vmatmul.mubr.msk.f32.vlgmr.msra.gmra.mxu0 %vm692_vm5, %v9003_v44 }
0x1ff6   :  { %9028 = vmatpush3.xpose.msk.msra.mxu0 %vm272_vm2, %v7636_v38 }
0x1ff7   :  { %v5822_v50 = vpop.f32.mrf.mxu0  ;;  %9029 = vmatprep.subr.msk.mxu0 %vm272_vm2, %v7635_v57 }
0x1ff8   :  { %9014 = vmatprep.mubr.msk.f32.mxu0 %vm692_vm5, %v5822_v50 }
0x1ff9   :  { %9015 = vmatmul.mubr.msk.f32.gmra.mxu0 %vm692_vm5, %v9006_v61 }
0x1ffa   :  { %9030 = vmatpush3.xpose.msk.msra.mxu0 %vm272_vm2, %v7635_v57  ;;  %9031 = vmatprep.mubr.msk.f32.mxu0 %vm272_vm2, %v10874_v20  ;;  %v5249_v20 = vadd.f32 %v11136_v28, %v11214_v49  ;;  %v7638_v28 = vld [vmem:[%s11559_s10 + $0x13] ss:$0 sm:$0xff] }
0x1ffd   :  { %9032 = vmatmul.mubr.msk.f32.vlgmr.msra.gmra.mxu0 %vm272_vm2, %v10898_v55 }
0x1ffe   :  { %9034 = vmatprep.mubr.msk.f32.mxu0 %vm272_vm2, %v10905_v29  ;;  %v5264_v29 = vadd.f32 %v11139_v14, %v11216_v24 }
0x2001   :  { %9035 = vmatmul.mubr.msk.f32.gmra.mxu0 %vm272_vm2, %v10916_v53  ;;  %v5259_v53 = vadd.f32 %v11141_v31, %v11218_v59 }
0x2002   :  { %9055 = vmatprep.mubr.msk.f32.mxu0 %vm692_vm5, %v6019_v1 }
0x20b5   :  { %v9013_v10 = vpop.f32.mrf.mxu0 }
0x20b6   :  { %v11332_v43 = vadd.f32 %v9013_v10, %v5254_v34 }
0x20b7   :  { %v5912_v55 = vpop.f32.mrf.mxu0 }
0x20b8   :  { %v11336_v56 = vadd.f32 %v5912_v55, %v5249_v20 }
0x20b9   :  { %v9016_v40 = vpop.f32.mrf.mxu0 }
0x20ba   :  { %v11340_v45 = vadd.f32 %v9016_v40, %v5264_v29 }
0x20bb   :  { %v5922_v13 = vpop.f32.mrf.mxu0 }
0x20bc   :  { %v11342_v48 = vadd.f32 %v5922_v13, %v5259_v53  ;;  %v7668_v13 = vld [vmem:[%s11558_s9 + $0x1f8] sm:$0xff] }
0x20bd   :  { %v9033_v8 = vpop.f32.mrf.mxu0  ;;  %9075 = vmatprep.subr.mxu1 %v7668_v13 }
0x20be   :  { %v6126_v31 = vadd.f32 %v9033_v8, %v7638_v28  ;;  %v7667_v8 = vld [vmem:[%s11558_s9 + $0x1f0] sm:$0xff] }
0x20bf   :  { %v6120_v27 = vpop.f32.mrf.mxu0 }
0x20c0   :  { %v6121_v59 = vadd.f32 %v7638_v28, %v6120_v27 }
0x20c1   :  { %v9036_v49 = vpop.f32.mrf.mxu0 }
0x20c2   :  { %v6136_v15 = vadd.f32 %v9036_v49, %v7638_v28 }
0x20c3   :  { %v6130_v14 = vpop.f32.mrf.mxu0 }
0x20c4   :  { %v6131_v24 = vadd.f32 %v7638_v28, %v6130_v14  ;;  %9047 = vmatprep.subr.msk.mxu0 %vm692_vm5, %v6136_v15 }
0x20c5   :  { %9048 = vmatpush3.xpose.msk.msra.mxu0 %vm692_vm5, %v6136_v15 }
0x20c6   :  { %9049 = vmatprep.subr.msk.mxu0 %vm692_vm5, %v6131_v24 }
0x20c9   :  { %9050 = vmatpush3.xpose.msk.msra.mxu0 %vm692_vm5, %v6131_v24 }
0x20ca   :  { %9051 = vmatprep.subr.msk.mxu0 %vm692_vm5, %v6126_v31 }
0x20cd   :  { %9052 = vmatpush3.xpose.msk.msra.mxu0 %vm692_vm5, %v6126_v31  ;;  %v7673_v31 = vld [vmem:[#allocation14 + $0x16] ss:$0 sm:$0xff] }
0x20ce   :  { %9053 = vmatprep.subr.msk.mxu0 %vm692_vm5, %v6121_v59 }
0x20d1   :  { %9054 = vmatpush3.xpose.msk.msra.mxu0 %vm692_vm5, %v6121_v59 }
0x20d4   :  { %9056 = vmatmul.mubr.msk.f32.vlgmr.msra.gmra.mxu0 %vm692_vm5, %v11273_v12 }
0x20d5   :  { %9058 = vmatprep.mubr.msk.f32.mxu0 %vm692_vm5, %v11284_v32 }
0x20d8   :  { %9059 = vmatmul.mubr.msk.f32.gmra.mxu0 %vm692_vm5, %v11281_v9 }
0x2194   :  { %v9057_v62 = vpop.f32.mrf.mxu0 }
0x2195   :  { %v6351_v17 = vmul.f32 0.25, %v9057_v62  ;;  %v9403_v62 = vld [vmem:[%s11551_s2 + $0x8] sm:$0xff] }
0x2196   :  { %v6331_v46 = vpop.f32.mrf.mxu0 }
0x2197   :  { %v6350_v33 = vmul.f32 0.25, %v6331_v46  ;;  %v6355_v5 = vadd.f32 %v6351_v17, %v11018_v4 }
0x2198   :  { %v9060_v47 = vpop.f32.mrf.mxu0 }
0x2199   :  { %v6353_v22 = vmul.f32 0.25, %v9060_v47  ;;  %v6361_v25 = vsel %vm4361_vm8, %v6355_v5, -inf  ;;  %v6354_v52 = vadd.f32 %v6350_v33, %v11020_v21  ;;  %v9404_v47 = vld [vmem:[%s11551_s2] sm:$0xff] }
0x219a   :  { %6362 = vmax.xlane.f32.xlu1 %v6361_v25  ;;  %v6341_v12 = vpop.f32.mrf.mxu0 }
0x219b   :  { %v6352_v16 = vmul.f32 0.25, %v6341_v12  ;;  %v6358_v32 = vsel %vm4361_vm8, %v6354_v52, -inf  ;;  %v6357_v30 = vadd.f32 %v6353_v22, %v11023_v39  ;;  %v9405_v12 = vld [vmem:[%s11551_s2 + $0x18] sm:$0xff] }
0x219c   :  { %6359 = vmax.xlane.f32.xlu0 %v6358_v32 }
0x219d   :  { %v6367_v9 = vsel %vm4361_vm8, %v6357_v30, -inf  ;;  %v6356_v58 = vadd.f32 %v6352_v16, %v11027_v2 }
0x219e   :  { %6368 = vmax.xlane.f32.xlu1 %v6367_v9 }
0x219f   :  { %v6364_v4 = vsel %vm4361_vm8, %v6356_v58, -inf }
0x21a0   :  { %6365 = vmax.xlane.f32.xlu0 %v6364_v4 }
0x2223   :  { %v6363_v35 = vpop.xlane.xlu1 %6362 }
0x2224   :  { %v6371_v36 = vsub.f32 %v6355_v5, %v6363_v35 }
0x2225   :  { %v6360_v11 = vpop.xlane.xlu0 %6359 }
0x2226   :  { %v6376_v21 = vmul.f32 1.442695, %v6371_v36  ;;  %v6370_v63 = vsub.f32 %v6354_v52, %v6360_v11 }
0x2227   :  { %v6369_v26 = vpop.xlane.xlu1 %6368 }
0x2228   :  { %9360 = vpow2.f32 %v6376_v21  ;;  %v6374_v3 = vmul.f32 1.442695, %v6370_v63  ;;  %v6373_v23 = vsub.f32 %v6357_v30, %v6369_v26 }
0x2229   :  { %v6366_v41 = vpop.xlane.xlu0 %6365 }
0x222a   :  { %9362 = vpow2.f32 %v6374_v3  ;;  %v6380_v39 = vmul.f32 1.442695, %v6373_v23  ;;  %v6372_v6 = vsub.f32 %v6356_v58, %v6366_v41 }
0x222c   :  { %9364 = vpow2.f32 %v6380_v39  ;;  %v6378_v42 = vmul.f32 1.442695, %v6372_v6 }
0x222e   :  { %9366 = vpow2.f32 %v6378_v42 }
0x2235   :  { %v9361_v2 = vpop.eup %9360 }
0x2236   :  { %v6385_v7 = vsel %vm4361_vm8, %v9361_v2, 0.0 }
0x2237   :  { %v9363_v18 = vpop.eup %9362  ;;  %6386 = vadd.xlane.f32.xlu1 %v6385_v7 }
0x2238   :  { %v6382_v60 = vsel %vm4361_vm8, %v9363_v18, 0.0 }
0x2239   :  { %v9365_v19 = vpop.eup %9364  ;;  %6383 = vadd.xlane.f32.xlu0 %v6382_v60 }
0x223a   :  { %v6391_v51 = vsel %vm4361_vm8, %v9365_v19, 0.0 }
0x223b   :  { %v9367_v38 = vpop.eup %9366  ;;  %6392 = vadd.xlane.f32.xlu1 %v6391_v51 }
0x223c   :  { %v6388_v44 = vsel %vm4361_vm8, %v9367_v38, 0.0 }
0x223d   :  { %6389 = vadd.xlane.f32.xlu0 %v6388_v44 }
0x22c0   :  { %v6387_v54 = vpop.xlane.xlu1 %6386 }
0x22c1   :  { %9368 = vrcp.f32 %v6387_v54 }
0x22c2   :  { %v6384_v57 = vpop.xlane.xlu0 %6383 }
0x22c3   :  { %9370 = vrcp.f32 %v6384_v57  ;;  %v6694_v57 = vld [vmem:[#allocation12 + $0x78] sm:$0xff] }
0x22c4   :  { %v6393_v61 = vpop.xlane.xlu1 %6392  ;;  %9085 = vmatprep.subr.mxu0 %v6694_v57 }
0x22c5   :  { %9372 = vrcp.f32 %v6393_v61  ;;  %9086 = vmatpush3.msra.mxu0 %v6694_v57  ;;  %v6693_v61 = vld [vmem:[#allocation12 + $0x70] sm:$0xff] }
0x22c6   :  { %v6390_v50 = vpop.xlane.xlu0 %6389  ;;  %9087 = vmatprep.subr.mxu0 %v6693_v61 }
0x22c7   :  { %9374 = vrcp.f32 %v6390_v50  ;;  %9088 = vmatpush3.msra.mxu0 %v6693_v61  ;;  %v6692_v50 = vld [vmem:[#allocation12 + $0x68] sm:$0xff] }
0x22c8   :  { %9089 = vmatprep.subr.mxu0 %v6692_v50 }
0x22c9   :  { %9090 = vmatpush3.msra.mxu0 %v6692_v50 }
0x22ce   :  { %v9369_v1 = vpop.eup %9368 }
0x22cf   :  { %v6399_v20 = vmul.f32 %v9369_v1, %v9361_v2  ;;  %v6691_v1 = vld [vmem:[#allocation12 + $0x60] sm:$0xff] }
0x22d0   :  { %v9371_v34 = vpop.eup %9370  ;;  %9091 = vmatprep.subr.mxu0 %v6691_v1 }
0x22d1   :  { %v6398_v10 = vmul.f32 %v9371_v34, %v9363_v18  ;;  %9092 = vmatpush3.msra.mxu0 %v6691_v1  ;;  %v6690_v34 = vld [vmem:[#allocation12 + $0x58] sm:$0xff] }
0x22d2   :  { %v9373_v55 = vpop.eup %9372  ;;  %9093 = vmatprep.subr.mxu0 %v6690_v34 }
0x22d3   :  { %9069 = vmatprep.mubr.msk.f32.mxu1 %vm4361_vm8, %v6398_v10  ;;  %v6401_v53 = vmul.f32 %v9373_v55, %v9365_v19  ;;  %9094 = vmatpush3.msra.mxu0 %v6690_v34  ;;  %v6689_v10 = vld [vmem:[#allocation12 + $0x50] sm:$0xff]  ;;  %v6687_v55 = vld [vmem:[#allocation12 + $0x40] sm:$0xff] }
0x22d4   :  { %v9375_v29 = vpop.eup %9374  ;;  %9070 = vmatmul.mubr.msk.f32.vlgmr.msra.gmra.mxu1 %vm4361_vm8, %v6399_v20  ;;  %9095 = vmatprep.subr.mxu0 %v6689_v10  ;;  %v6688_v20 = vld [vmem:[#allocation12 + $0x48] sm:$0xff] }
0x22d5   :  { %v6400_v40 = vmul.f32 %v9375_v29, %v9367_v38  ;;  %9076 = vmatpush3.msra.mxu1 %v7668_v13  ;;  %9096 = vmatpush3.msra.mxu0 %v6689_v10 }
0x22d6   :  { %9077 = vmatprep.subr.mxu1 %v7667_v8  ;;  %9097 = vmatprep.subr.mxu0 %v6688_v20 }
0x22d7   :  { %9072 = vmatprep.mubr.msk.f32.mxu1 %vm4361_vm8, %v6400_v40  ;;  %9078 = vmatpush3.msra.mxu1 %v7667_v8 }
0x22d8   :  { %9073 = vmatmul.mubr.msk.f32.gmra.mxu1 %vm4361_vm8, %v6401_v53  ;;  %9098 = vmatpush3.msra.mxu0 %v6688_v20 }
0x22d9   :  { %9099 = vmatprep.subr.mxu0 %v6687_v55 }
0x22da   :  { %9100 = vmatpush3.msra.mxu0 %v6687_v55 }
0x22db   :  { %9145 = vmatprep.subr.mxu0 %v9586_v0 }
0x2394   :  { %v9071_v27 = vpop.f32.mrf.mxu1 }
0x2396   :  { %v6480_v28 = vpop.f32.mrf.mxu1 }
0x2397   :  { %9079 = vmatprep.mubr.msk.f32.mxu1 %vm692_vm5, %v6480_v28 }
0x2398   :  { %v9074_v49 = vpop.f32.mrf.mxu1  ;;  %9080 = vmatmul.mubr.msk.f32.vlgmr.msra.gmra.mxu1 %vm692_vm5, %v9071_v27 }
0x239a   :  { %v6490_v15 = vpop.f32.mrf.mxu1 }
0x239b   :  { %9082 = vmatprep.mubr.msk.f32.mxu1 %vm692_vm5, %v6490_v15 }
0x239c   :  { %9083 = vmatmul.mubr.msk.f32.gmra.mxu1 %vm692_vm5, %v9074_v49 }
0x2458   :  { %v9081_v14 = vpop.f32.mrf.mxu1 }
0x2459   :  { %v6600_v24 = vadd.f32 %v9081_v14, %v11332_v43 }
0x245a   :  { %v6580_v59 = vpop.f32.mrf.mxu1 }
0x245b   :  { %v6604_v17 = vadd.f32 %v9403_v62, %v6600_v24  ;;  %v6599_v46 = vadd.f32 %v6580_v59, %v11336_v56 }
0x245c   :  { %v9084_v33 = vpop.f32.mrf.mxu1 }
0x245d   :  { %v11392_v5 = vadd.f32 %v7673_v31, %v6604_v17  ;;  %v6603_v22 = vadd.f32 %v9404_v47, %v6599_v46  ;;  %v6602_v25 = vadd.f32 %v9084_v33, %v11340_v45  ;;  %v9406_v45 = vld [vmem:[%s11551_s2 + $0x10] sm:$0xff]  ;;  %v7674_v17 = vld [vmem:[#allocation14 + $0x12] ss:$0 sm:$0xff] }
0x245e   :  { %v6590_v43 = vpop.f32.mrf.mxu1 }
0x245f   :  { %v11398_v52 = vadd.f32 %v7673_v31, %v6603_v22  ;;  %v6606_v16 = vadd.f32 %v9405_v12, %v6602_v25  ;;  %v6601_v56 = vadd.f32 %v6590_v43, %v11342_v48  ;;  %v6621_v32 = vsel %vm272_vm2, %v11392_v5, 0.0  ;;  %v7675_v43 = vld [vmem:[#allocation14 + $0x13] ss:$0 sm:$0xff] }
0x2460   :  { %6622 = vadd.xlane.f32.xlu1 %v6621_v32 }
0x2461   :  { %v11406_v30 = vadd.f32 %v7673_v31, %v6606_v16  ;;  %v6605_v9 = vadd.f32 %v9406_v45, %v6601_v56  ;;  %v6618_v58 = vsel %vm272_vm2, %v11398_v52, 0.0 }
0x2462   :  { %6619 = vadd.xlane.f32.xlu0 %v6618_v58 }
0x2463   :  { %v11413_v4 = vadd.f32 %v7673_v31, %v6605_v9  ;;  %v6627_v48 = vsel %vm272_vm2, %v11406_v30, 0.0 }
0x2464   :  { %6628 = vadd.xlane.f32.xlu1 %v6627_v48 }
0x2465   :  { %v6624_v35 = vsel %vm272_vm2, %v11413_v4, 0.0 }
0x2466   :  { %6625 = vadd.xlane.f32.xlu0 %v6624_v35 }
0x24e9   :  { %v6623_v36 = vpop.xlane.xlu1 %6622 }
0x24ea   :  { %v6631_v11 = vmul.f32 0.015625, %v6623_v36  ;;  %v7696_v36 = vld [vmem:[%s11561_s12 + $0xf8] sm:$0xff] }
0x24eb   :  { %v6620_v21 = vpop.xlane.xlu0 %6619  ;;  %9107 = vmatprep.subr.mxu1 %v7696_v36 }
0x24ec   :  { %v11420_v63 = vsub.f32 %v11392_v5, %v6631_v11  ;;  %v6630_v26 = vmul.f32 0.015625, %v6620_v21  ;;  %9108 = vmatpush3.msra.mxu1 %v7696_v36  ;;  %v7695_v11 = vld [vmem:[%s11561_s12 + $0xf0] sm:$0xff]  ;;  %v7694_v21 = vld [vmem:[%s11561_s12 + $0xe8] sm:$0xff] }
0x24ed   :  { %v6629_v3 = vpop.xlane.xlu1 %6628  ;;  %9109 = vmatprep.subr.mxu1 %v7695_v11 }
0x24ee   :  { %v11423_v23 = vsub.f32 %v11398_v52, %v6630_v26  ;;  %v6633_v41 = vmul.f32 0.015625, %v6629_v3  ;;  %v6639_v39 = vmul.f32 %v11420_v63, %v11420_v63  ;;  %9110 = vmatpush3.msra.mxu1 %v7695_v11  ;;  %v7692_v26 = vld [vmem:[%s11561_s12 + $0xd8] sm:$0xff]  ;;  %v7691_v3 = vld [vmem:[%s11561_s12 + $0xd0] sm:$0xff] }
0x24ef   :  { %v6626_v6 = vpop.xlane.xlu0 %6625  ;;  %9111 = vmatprep.subr.mxu1 %v7694_v21 }
0x24f0   :  { %v6637_v42 = vsub.f32 %v11406_v30, %v6633_v41  ;;  %v6632_v2 = vmul.f32 0.015625, %v6626_v6  ;;  %v6645_v7 = vsel %vm272_vm2, %v6639_v39, 0.0  ;;  %v6638_v18 = vmul.f32 %v11423_v23, %v11423_v23  ;;  %9112 = vmatpush3.msra.mxu1 %v7694_v21  ;;  %v7689_v41 = vld [vmem:[%s11561_s12 + $0xc0] sm:$0xff]  ;;  %v7688_v39 = vld [vmem:[%s11561_s12 + $0xb8] sm:$0xff]  ;;  %v7687_v6 = vld [vmem:[%s11561_s12 + $0xb0] sm:$0xff] }
0x24f1   :  { %6646 = vadd.xlane.f32.xlu1 %v6645_v7  ;;  %v7684_v7 = vld [vmem:[%s11561_s12 + $0x98] sm:$0xff] }
0x24f2   :  { %v6636_v60 = vsub.f32 %v11413_v4, %v6632_v2  ;;  %v6642_v19 = vsel %vm272_vm2, %v6638_v18, 0.0  ;;  %v6641_v51 = vmul.f32 %v6637_v42, %v6637_v42  ;;  %v7685_v2 = vld [vmem:[%s11561_s12 + $0xa0] sm:$0xff]  ;;  %v7683_v18 = vld [vmem:[%s11561_s12 + $0x90] sm:$0xff] }
0x24f3   :  { %6643 = vadd.xlane.f32.xlu0 %v6642_v19  ;;  %v7681_v19 = vld [vmem:[%s11561_s12 + $0x80] sm:$0xff] }
0x24f4   :  { %v6651_v38 = vsel %vm272_vm2, %v6641_v51, 0.0  ;;  %v6640_v44 = vmul.f32 %v6636_v60, %v6636_v60  ;;  %v7676_v51 = vld [vmem:[#allocation14 + $0x18] ss:$0 sm:$0xff] }
0x24f5   :  { %6652 = vadd.xlane.f32.xlu1 %v6651_v38 }
0x24f6   :  { %v6648_v54 = vsel %vm272_vm2, %v6640_v44, 0.0 }
0x24f7   :  { %6649 = vadd.xlane.f32.xlu0 %v6648_v54 }
0x257a   :  { %v6647_v29 = vpop.xlane.xlu1 %6646 }
0x257b   :  { %v6655_v40 = vmul.f32 0.015625, %v6647_v29 }
0x257c   :  { %v6644_v53 = vpop.xlane.xlu0 %6643 }
0x257d   :  { %v6659_v13 = vadd.f32 1e-05, %v6655_v40  ;;  %v6654_v8 = vmul.f32 0.015625, %v6644_v53 }
0x257e   :  { %v6653_v27 = vpop.xlane.xlu1 %6652 }
0x257f   :  { %9376 = vrsqrt.f32 %v6659_v13  ;;  %v6658_v28 = vadd.f32 1e-05, %v6654_v8  ;;  %v6657_v49 = vmul.f32 0.015625, %v6653_v27 }
0x2580   :  { %v6650_v15 = vpop.xlane.xlu0 %6649 }
0x2581   :  { %9378 = vrsqrt.f32 %v6658_v28  ;;  %v6661_v14 = vadd.f32 1e-05, %v6657_v49  ;;  %v6656_v24 = vmul.f32 0.015625, %v6650_v15 }
0x2583   :  { %9380 = vrsqrt.f32 %v6661_v14  ;;  %v6660_v31 = vadd.f32 1e-05, %v6656_v24 }
0x2585   :  { %9382 = vrsqrt.f32 %v6660_v31 }
0x258c   :  { %v9377_v59 = vpop.eup %9376 }
0x258d   :  { %v6667_v62 = vmul.f32 %v9377_v59, %v11420_v63  ;;  %v7693_v63 = vld [vmem:[%s11561_s12 + $0xe0] sm:$0xff] }
0x258e   :  { %v9379_v46 = vpop.eup %9378  ;;  %9113 = vmatprep.subr.mxu1 %v7693_v63 }
0x258f   :  { %v6666_v33 = vmul.f32 %v9379_v46, %v11423_v23  ;;  %v6675_v22 = vmul.f32 %v7674_v17, %v6667_v62  ;;  %9114 = vmatpush3.msra.mxu1 %v7693_v63  ;;  %v7690_v23 = vld [vmem:[%s11561_s12 + $0xc8] sm:$0xff] }
0x2590   :  { %v9381_v47 = vpop.eup %9380  ;;  %9115 = vmatprep.subr.mxu1 %v7692_v26 }
0x2591   :  { %v6669_v25 = vmul.f32 %v9381_v47, %v6637_v42  ;;  %v6674_v12 = vmul.f32 %v7674_v17, %v6666_v33  ;;  %v6683_v45 = vadd.f32 %v7675_v43, %v6675_v22  ;;  %9116 = vmatpush3.msra.mxu1 %v7692_v26  ;;  %v7686_v42 = vld [vmem:[%s11561_s12 + $0xa8] sm:$0xff] }
0x2592   :  { %v9383_v16 = vpop.eup %9382  ;;  %9117 = vmatprep.subr.mxu1 %v7691_v3 }
0x2593   :  { %v6682_v56 = vadd.f32 %v7675_v43, %v6674_v12  ;;  %v6668_v32 = vmul.f32 %v9383_v16, %v6636_v60  ;;  %v6677_v9 = vmul.f32 %v7674_v17, %v6669_v25  ;;  %9118 = vmatpush3.msra.mxu1 %v7691_v3  ;;  %v7682_v60 = vld [vmem:[%s11561_s12 + $0x88] sm:$0xff] }
0x2594   :  { %9119 = vmatprep.subr.mxu1 %v7690_v23 }
0x2595   :  { %9101 = vmatprep.mubr.msk.f32.mxu0 %vm272_vm2, %v6682_v56  ;;  %v6676_v58 = vmul.f32 %v7674_v17, %v6668_v32  ;;  %v6685_v35 = vadd.f32 %v7675_v43, %v6677_v9  ;;  %9120 = vmatpush3.msra.mxu1 %v7690_v23 }
0x2596   :  { %9102 = vmatmul.mubr.msk.f32.vlgmr.msra.gmra.mxu0 %vm272_vm2, %v6683_v45  ;;  %9121 = vmatprep.subr.mxu1 %v7689_v41 }
0x2597   :  { %v6684_v48 = vadd.f32 %v7675_v43, %v6676_v58  ;;  %9122 = vmatpush3.msra.mxu1 %v7689_v41  ;;  %v7697_v41 = vld [vmem:[#allocation14 + $0x17] ss:$0 sm:$0xff] }
0x2598   :  { %9123 = vmatprep.subr.mxu1 %v7688_v39 }
0x2599   :  { %9104 = vmatprep.mubr.msk.f32.mxu0 %vm272_vm2, %v6684_v48  ;;  %9124 = vmatpush3.msra.mxu1 %v7688_v39 }
0x259a   :  { %9105 = vmatmul.mubr.msk.f32.gmra.mxu0 %vm272_vm2, %v6685_v35  ;;  %9125 = vmatprep.subr.mxu1 %v7687_v6 }
0x259b   :  { %9153 = vmatprep.mubr.msk.f32.mxu0 %vm9587_vm0, %v9586_v0  ;;  %9126 = vmatpush3.msra.mxu1 %v7687_v6 }
0x259c   :  { %9127 = vmatprep.subr.mxu1 %v7686_v42 }
0x259d   :  { %9128 = vmatpush3.msra.mxu1 %v7686_v42 }
0x259e   :  { %9129 = vmatprep.subr.mxu1 %v7685_v2 }
0x259f   :  { %9130 = vmatpush3.msra.mxu1 %v7685_v2 }
0x25a0   :  { %9131 = vmatprep.subr.mxu1 %v7684_v7 }
0x25a1   :  { %9132 = vmatpush3.msra.mxu1 %v7684_v7 }
0x25a2   :  { %9133 = vmatprep.subr.mxu1 %v7683_v18 }
0x25a3   :  { %9134 = vmatpush3.msra.mxu1 %v7683_v18 }
0x25a4   :  { %9135 = vmatprep.subr.mxu1 %v7682_v60 }
0x25a5   :  { %9136 = vmatpush3.msra.mxu1 %v7682_v60 }
0x25a6   :  { %9137 = vmatprep.subr.mxu1 %v7681_v19 }
0x25a7   :  { %9138 = vmatpush3.msra.mxu1 %v7681_v19 }
0x2656   :  { %v9103_v38 = vpop.f32.mrf.mxu0 }
0x2657   :  { %v6784_v44 = vadd.f32 %v9103_v38, %v7676_v51 }
0x2658   :  { %v6778_v54 = vpop.f32.mrf.mxu0 }
0x2659   :  { %v6798_v57 = vmul.f32 %v6784_v44, %v6784_v44  ;;  %v6779_v61 = vadd.f32 %v7676_v51, %v6778_v54 }
0x265a   :  { %v9106_v50 = vpop.f32.mrf.mxu0 }
0x265b   :  { %v6802_v1 = vmul.f32 %v6798_v57, %v6784_v44  ;;  %v6797_v34 = vmul.f32 %v6779_v61, %v6779_v61  ;;  %v6794_v10 = vadd.f32 %v9106_v50, %v7676_v51  ;;  %v3840_v57 = vmul.f32 %v10992_v37, %v10992_v37 }
0x265c   :  { %v6788_v20 = vpop.f32.mrf.mxu0 }
0x265d   :  { %v6806_v55 = vmul.f32 0.044715, %v6802_v1  ;;  %v6801_v29 = vmul.f32 %v6797_v34, %v6779_v61  ;;  %v6800_v40 = vmul.f32 %v6794_v10, %v6794_v10  ;;  %v6789_v53 = vadd.f32 %v7676_v51, %v6788_v20  ;;  %v7708_v1 = vld [vmem:[%s11562_s13 + $0x78] sm:$0xff]  ;;  %v7707_v34 = vld [vmem:[%s11562_s13 + $0x70] sm:$0xff]  ;;  %v7705_v20 = vld [vmem:[%s11562_s13 + $0x60] sm:$0xff] }
0x265e   :  { %v3842_v50 = vsel %vm3841_vm10, %v3840_v57, 0.0 }
0x265f   :  { %v6810_v13 = vadd.f32 %v6806_v55, %v6784_v44  ;;  %v6805_v8 = vmul.f32 0.044715, %v6801_v29  ;;  %v6804_v27 = vmul.f32 %v6800_v40, %v6794_v10  ;;  %v6799_v28 = vmul.f32 %v6789_v53, %v6789_v53  ;;  %v7704_v55 = vld [vmem:[%s11562_s13 + $0x58] sm:$0xff]  ;;  %v7703_v29 = vld [vmem:[%s11562_s13 + $0x50] sm:$0xff]  ;;  %v7702_v40 = vld [vmem:[%s11562_s13 + $0x48] sm:$0xff] }
0x2661   :  { %v6814_v49 = vmul.f32 0.7978846, %v6810_v13  ;;  %v6809_v15 = vadd.f32 %v6805_v8, %v6779_v61  ;;  %v6808_v14 = vmul.f32 0.044715, %v6804_v27  ;;  %v6803_v24 = vmul.f32 %v6799_v28, %v6789_v53 }
0x2663   :  { %9384 = vtanh.f32 %v6814_v49  ;;  %v6813_v31 = vmul.f32 0.7978846, %v6809_v15  ;;  %v6812_v59 = vadd.f32 %v6808_v14, %v6794_v10  ;;  %v6807_v62 = vmul.f32 0.044715, %v6803_v24  ;;  %v7699_v49 = vld [vmem:[#allocation14 + $0x14] ss:$0 sm:$0xff] }
0x2664   :  { %v7700_v14 = vld [vmem:[#allocation14 + $0x15] ss:$0 sm:$0xff] }
0x2665   :  { %9386 = vtanh.f32 %v6813_v31  ;;  %v6816_v17 = vmul.f32 0.7978846, %v6812_v59  ;;  %v6811_v46 = vadd.f32 %v6807_v62, %v6789_v53 }
0x2667   :  { %9388 = vtanh.f32 %v6816_v17  ;;  %v6815_v33 = vmul.f32 0.7978846, %v6811_v46 }
0x2669   :  { %9390 = vtanh.f32 %v6815_v33 }
0x2670   :  { %v9385_v47 = vpop.eup %9384 }
0x2671   :  { %v6822_v22 = vadd.f32 1.0, %v9385_v47 }
0x2672   :  { %v9387_v25 = vpop.eup %9386 }
0x2673   :  { %v6821_v43 = vadd.f32 1.0, %v9387_v25  ;;  %v6826_v16 = vmul.f32 0.5, %v6822_v22 }
0x2674   :  { %v9389_v12 = vpop.eup %9388 }
0x2675   :  { %v6825_v56 = vmul.f32 0.5, %v6821_v43  ;;  %v6824_v32 = vadd.f32 1.0, %v9389_v12  ;;  %v6830_v48 = vmul.f32 %v6826_v16, %v6784_v44 }
0x2676   :  { %v9391_v45 = vpop.eup %9390 }
0x2677   :  { %v6829_v9 = vmul.f32 %v6825_v56, %v6779_v61  ;;  %v6823_v58 = vadd.f32 1.0, %v9391_v45  ;;  %v6828_v35 = vmul.f32 0.5, %v6824_v32 }
0x2679   :  { %9139 = vmatprep.mubr.f32.mxu1 %v6829_v9  ;;  %v6827_v36 = vmul.f32 0.5, %v6823_v58  ;;  %v6832_v21 = vmul.f32 %v6828_v35, %v6794_v10  ;;  %v7706_v10 = vld [vmem:[%s11562_s13 + $0x68] sm:$0xff] }
0x267a   :  { %9140 = vmatmul.mubr.f32.vlgmr.msra.gmra.mxu1 %v6830_v48 }
0x267b   :  { %v6831_v11 = vmul.f32 %v6827_v36, %v6789_v53  ;;  %v7701_v53 = vld [vmem:[%s11562_s13 + $0x40] sm:$0xff] }
0x267d   :  { %9142 = vmatprep.mubr.f32.mxu1 %v6831_v11 }
0x267e   :  { %9143 = vmatmul.mubr.f32.gmra.mxu1 %v6832_v21 }
0x273a   :  { %v9141_v63 = vpop.f32.mrf.mxu1 }
0x273b   :  { %v6936_v6 = vadd.f32 %v9141_v63, %v11392_v5 }
0x273c   :  { %v6916_v26 = vpop.f32.mrf.mxu1 }
0x273d   :  { %v6935_v7 = vadd.f32 %v6916_v26, %v11398_v52  ;;  %v6945_v60 = vadd.f32 %v7697_v41, %v6936_v6 }
0x273e   :  { %v9144_v3 = vpop.f32.mrf.mxu1 }
0x273f   :  { %v6938_v23 = vadd.f32 %v9144_v3, %v11406_v30  ;;  %v6944_v19 = vadd.f32 %v7697_v41, %v6935_v7  ;;  %v6948_v30 = vld [vmem:[#allocation11] sm:$0xf] }
0x2740   :  { %v6926_v39 = vpop.f32.mrf.mxu1 }
0x2741   :  { %v6947_v42 = vadd.f32 %v7697_v41, %v6938_v23  ;;  %v6937_v2 = vadd.f32 %v6926_v39, %v11413_v4 }
0x2743   :  { %v6946_v18 = vadd.f32 %v7697_v41, %v6937_v2  ;;  %9146 = vmatpush3.msra.mxu0 %v6947_v42 }
0x2744   :  { %9147 = vmatprep.subr.mxu0 %v9586_v0 }
0x2745   :  { %9148 = vmatpush3.msra.mxu0 %v6946_v18 }
0x2746   :  { %9149 = vmatprep.subr.mxu0 %v9586_v0 }
0x2747   :  { %9150 = vmatpush3.msra.mxu0 %v6945_v60 }
0x2748   :  { %9151 = vmatprep.subr.mxu0 %v9586_v0 }
0x2749   :  { %9152 = vmatpush3.msra.mxu0 %v6944_v19 }
0x274a   :  { %9154 = vmatmul.mubr.msk.f32.vlgmr.msra.gmra.mxu0 %vm4361_vm8, %v6948_v30  ;;  %9156 = vmatprep.subr.mxu0 %v9586_v0 }
0x274b   :  { %9172 = vmatprep.mubr.msk.f32.mxu0 %vm9587_vm0, %v9586_v0  ;;  %9157 = vmatpush3.msra.mxu0 %v7708_v1 }
0x274c   :  { %9158 = vmatprep.subr.mxu0 %v9586_v0 }
0x274d   :  { %9159 = vmatpush3.msra.mxu0 %v7707_v34 }
0x274e   :  { %9160 = vmatprep.subr.mxu0 %v9586_v0 }
0x274f   :  { %9161 = vmatpush3.msra.mxu0 %v7706_v10 }
0x2750   :  { %9162 = vmatprep.subr.mxu0 %v9586_v0 }
0x2751   :  { %9163 = vmatpush3.msra.mxu0 %v7705_v20 }
0x2752   :  { %9164 = vmatprep.subr.mxu0 %v9586_v0 }
0x2753   :  { %9165 = vmatpush3.msra.mxu0 %v7704_v55 }
0x2754   :  { %9166 = vmatprep.subr.mxu0 %v9586_v0 }
0x2755   :  { %9167 = vmatpush3.msra.mxu0 %v7703_v29 }
0x2756   :  { %9168 = vmatprep.subr.mxu0 %v9586_v0 }
0x2757   :  { %9169 = vmatpush3.msra.mxu0 %v7702_v40 }
0x2758   :  { %9170 = vmatprep.subr.mxu0 %v9586_v0 }
0x2759   :  { %9171 = vmatpush3.msra.mxu0 %v7701_v53 }
0x275a   :  { %9175 = vmatprep.subr.mxu0 %v9586_v0 }
0x280a   :  { %v7018_v5 = vpop.f32.mrf.mxu0 }
0x280b   :  { %v7025_v52 = vsel %vm7024_vm9, %v7018_v5, 0.0 }
0x280c   :  { %7026 = vadd.xlane.f32.xlu0 %v7025_v52  ;;  %v9155_v4 = vpop.f32.mrf.mxu0 }
0x2895   :  { %v7027_v51 = vpop.xlane.xlu0 %7026 }
0x2896   :  { %v7028_v38 = vmul.f32 0.015625, %v7027_v51 }
0x2898   :  { %v7029_v44 = vsub.f32 %v7018_v5, %v7028_v38 }
0x289a   :  { %v7030_v54 = vmul.f32 %v7029_v44, %v7029_v44 }
0x289c   :  { %v7031_v61 = vsel %vm7024_vm9, %v7030_v54, 0.0 }
0x289d   :  { %7032 = vadd.xlane.f32.xlu1 %v7031_v61 }
0x28a1   :  { %3843 = vadd.xlane.f32.xlu1 %v3842_v50 }
0x2926   :  { %v7033_v13 = vpop.xlane.xlu1 %7032 }
0x2927   :  { %v7034_v8 = vmul.f32 0.015625, %v7033_v13 }
0x2929   :  { %v7035_v27 = vadd.f32 1e-05, %v7034_v8 }
0x292a   :  { %v3844_v33 = vpop.xlane.xlu1 %3843 }
0x292b   :  { %9392 = vrsqrt.f32 %v7035_v27 }
0x2938   :  { %v9393_v28 = vpop.eup %9392 }
0x2939   :  { %v7037_v15 = vmul.f32 %v9393_v28, %v7029_v44 }
0x293b   :  { %v7042_v24 = vmul.f32 %v7699_v49, %v7037_v15 }
0x293d   :  { %v7047_v31 = vadd.f32 %v7700_v14, %v7042_v24 }
0x293f   :  { %9173 = vmatmul.mubr.msk.f32.vlgmr.msra.gmra.mxu0 %vm272_vm2, %v7047_v31 }
0x2940   :  { %9177 = vmatprep.mubr.msk.f32.mxu0 %vm9587_vm0, %v9586_v0  ;;  %v7214_v0 = vstv %s11549_s0 }
0x29ff   :  { %v7126_v59 = vpop.f32.mrf.mxu0 }
0x2a00   :  { %v7130_v62 = vmul.f32 %v7126_v59, %v7126_v59 }
0x2a01   :  { %v9174_v17 = vpop.f32.mrf.mxu0 }
0x2a02   :  { %v7132_v46 = vsel %vm7131_vm11, %v7130_v62, 0.0 }
0x2a03   :  { %7133 = vadd.xlane.f32.xlu0 %v7132_v46 }
0x2a8c   :  { %v7134_v47 = vpop.xlane.xlu0 %7133 }
0x2a8d   :  { %9394 = vrsqrt.f32 %v7134_v47 }
0x2a8e   :  { %9396 = vrsqrt.f32 %v3844_v33 }
0x2a9a   :  { %v9395_v22 = vpop.eup %9394 }
0x2a9b   :  { %v9397_v25 = vpop.eup %9396  ;;  %v7136_v43 = vmul.f32 %v9395_v22, %v7126_v59 }
0x2a9c   :  { %v3846_v12 = vmul.f32 %v9397_v25, %v10992_v37 }
0x2a9d   :  { %9176 = vmatpush3.xpose.msk.msra.mxu0 %vm4361_vm8, %v7136_v43 }
0x2aa0   :  { %9178 = vmatmul.mubr.msk.f32.vlgmr.msra.gmra.mxu0 %vm4361_vm8, %v3846_v12 }
0x2b60   :  { %v7209_v16 = vpop.f32.mrf.mxu0 }
0x2b61   :  { %v7215_v56 = vmul.f32 %v7214_v0, %v7209_v16 }
0x2b62   :  { %v9179_v32 = vpop.f32.mrf.mxu0 }
0x2b63   :  { %7217 = vst.msk [vmem:[#allocation15] sm:$0x3] %vm7216_vm12, %v7215_v56 }
0x2b64   :  { %9558 = shalt.err (!%p9555_p11)
}
0x2b65   :  { %7227 = dma.vmem_to_hbm [thread:$0]  %s7225_s16, 32, %s11564_s15, [#allocation5]  }
0x2b66   :  { %9575 = dma.done.wait [#allocation5], 32  }
0x2b67   :  { %9576 = vsyncadd [#allocation5], 4294967264 }
0x2b68   :  { %7231 = vsyncpa [#allocation4], 1 }
0x2b69   :  { %7232 = vsyncpa [#allocation7], 1 }
0x2b6a   :  { %7233 = vsyncpa [#allocation10], 1 }
0x2b6b   :  { %7234 = vsyncpa [#allocation13], 1 }
0x2b6c   :  { %7235 = vsyncpa [#allocation5], 1 }

</bundles_post_ra>
